<compile_context>
chip_gen: v5e
topology: v5e:2x2
jax: 0.10.0
libtpu: 0.0.40
codegen_flags: <defaults>
</compile_context>

<pallas_src>
import math
from functools import partial

import numpy as np
import jax
import jax.numpy as jnp
from jax import lax
from jax.experimental import pallas as pl
from jax.experimental.pallas import tpu as pltpu

_EPS = 1e-5
_MAX_MM_TR = 512            # matmul row tile (M)
_MAX_EW_TR = 1024           # elementwise row tile (on lane-dense slabs)
_MM_VMEM_BUDGET = 16 * 1024 * 1024    # conservative: fits v5e/v6e/v7x scoped-VMEM defaults
_CONV_VMEM_BUDGET = 12 * 1024 * 1024  # per-image implicit-conv working set gate


# ----------------------------- tile choosers ---------------------------------

def _choose_mm_tile(rows, k, c):
    """Row tile for (rows,k)@(k,c): as large as fits the VMEM budget, <=512."""
    resident = 2 * k * c * 4                 # weight block (double-buffered)
    per_row = 2 * (k + c) * 4                # double-buffered input + output rows
    cap = max(128, (_MM_VMEM_BUDGET - resident) // max(per_row, 1))
    cap = min(_MAX_MM_TR, cap)
    if rows <= cap:
        return rows, rows                    # single full block -> no padding copy
    tr = max(128, (cap // 128) * 128)
    return tr, pl.cdiv(rows, tr) * tr


def _choose_ew_tile(rows):
    if rows <= _MAX_EW_TR:
        return rows, rows
    tr = _MAX_EW_TR
    return tr, pl.cdiv(rows, tr) * tr


# ------------------------------ Pallas kernels --------------------------------

def _conv3x3_s1_kernel(xf_ref, w_ref, o_ref, s_ref, ss_ref, *, wp, wvalid):
    """Implicit-im2col 3x3 stride-1 conv for one image + fused BN stats.

    xf_ref: (Lp, Cin)   flattened zero-padded image (+slack), one tap per offset
    w_ref:  (9, Cin, Cout) taps in (dy*3+dx) order
    o_ref:  (H*Wp, Cout)  conv output over the (H, Wp) grid (cols >= W are garbage)
    s_ref, ss_ref: (8, Cout) per-image partial sum / sum-of-squares (valid cols only)
    """
    lrows, cout = o_ref.shape
    acc = jnp.zeros((lrows, cout), jnp.float32)
    for t in range(9):
        dy, dx = divmod(t, 3)
        off = dy * wp + dx                                    # static offset
        acc = acc + jnp.dot(xf_ref[pl.ds(off, lrows), :], w_ref[t],
                            preferred_element_type=jnp.float32)
    o_ref[...] = acc
    # BN statistics over valid columns only (row index q encodes (i, j=q%Wp)).
    col = lax.broadcasted_iota(jnp.int32, (lrows, 1), 0) % wp
    am = jnp.where(col < wvalid, acc, 0.0)
    s_ref[...] = jnp.broadcast_to(jnp.sum(am, axis=0, keepdims=True), (8, cout))
    ss_ref[...] = jnp.broadcast_to(jnp.sum(am * am, axis=0, keepdims=True), (8, cout))


def _conv3x3_s1_actin_kernel(y_ref, w_ref, sc_ref, sh_ref,
                             o_ref, s_ref, ss_ref, act_ref, *, wp, wvalid):
    """Fused bn1-affine + ReLU + zero-pad + implicit-im2col 3x3 s1 conv + BN stats.

    y_ref:  (H*Wp, Cin) RAW output of the previous stride-1 conv (cols >= W garbage)
    w_ref:  (9, Cin, Cout)
    sc_ref, sh_ref: (1, Cin)  BN1 scale / shift
    o_ref:  (H*Wp, Cout) conv output (cols >= W garbage)
    s_ref, ss_ref: (8, Cout) per-image partial stats over valid cols
    act_ref: VMEM scratch (Lp, Cin) -- zero-padded activated image built in-kernel
    """
    lrows, cout = o_ref.shape
    col = lax.broadcasted_iota(jnp.int32, (lrows, 1), 0) % wp
    valid = col < wvalid
    # Activate valid pixels, zero the garbage columns (they land on pad positions).
    a = jnp.where(valid,
                  jnp.maximum(y_ref[...] * sc_ref[...] + sh_ref[...], 0.0),
                  0.0)
    act_ref[...] = jnp.zeros_like(act_ref)          # top/bottom pad rows + slack
    act_ref[pl.ds(wp + 1, lrows), :] = a            # interior (+ L/R pads via mask)
    acc = jnp.zeros((lrows, cout), jnp.float32)
    for t in range(9):
        dy, dx = divmod(t, 3)
        off = dy * wp + dx
        acc = acc + jnp.dot(act_ref[pl.ds(off, lrows), :], w_ref[t],
                            preferred_element_type=jnp.float32)
    o_ref[...] = acc
    am = jnp.where(valid, acc, 0.0)
    s_ref[...] = jnp.broadcast_to(jnp.sum(am, axis=0, keepdims=True), (8, cout))
    ss_ref[...] = jnp.broadcast_to(jnp.sum(am * am, axis=0, keepdims=True), (8, cout))


def _matmul_stats_kernel(x_ref, w_ref, o_ref, s_ref, ss_ref):
    """(TR,K)@(K,C) without bias (BN follows) + per-tile channel sum / sumsq."""
    acc = jnp.dot(x_ref[...], w_ref[...], preferred_element_type=jnp.float32)
    o_ref[...] = acc
    c = acc.shape[1]
    s_ref[...] = jnp.broadcast_to(jnp.sum(acc, axis=0, keepdims=True), (8, c))
    ss_ref[...] = jnp.broadcast_to(jnp.sum(acc * acc, axis=0, keepdims=True), (8, c))


def _matmul_bias_kernel(x_ref, w_ref, b_ref, o_ref):
    o_ref[...] = (jnp.dot(x_ref[...], w_ref[...], preferred_element_type=jnp.float32)
                  + b_ref[...])


def _affine_relu_kernel(x_ref, sc_ref, sh_ref, o_ref):
    o_ref[...] = jnp.maximum(x_ref[...] * sc_ref[...] + sh_ref[...], 0.0)


def _affine_add_relu_kernel(x_ref, r_ref, sc_ref, sh_ref, o_ref):
    o_ref[...] = jnp.maximum(x_ref[...] * sc_ref[...] + sh_ref[...] + r_ref[...], 0.0)


# ------------------------------- conv wrappers --------------------------------

def _conv3x3_s1_raw(x_nhwc, w_oihw):
    """3x3, pad 1, stride 1 conv (no bias) + fused per-channel sum / sumsq.

    Returns the RAW (n, H*Wp, Cout) output (cols >= W are garbage) + stats.
    """
    n, h, wd, cin = x_nhwc.shape
    cout = w_oihw.shape[0]
    wp = wd + 2
    lrows = h * wp
    lp = (h + 2) * wp + 8      # +8 slack keeps the last tap's slice in bounds
    xp = jnp.pad(x_nhwc, ((0, 0), (1, 1), (1, 1), (0, 0)))
    xf = jnp.pad(xp.reshape(n, (h + 2) * wp, cin),
                 ((0, 0), (0, lp - (h + 2) * wp), (0, 0)))
    w_taps = jnp.transpose(w_oihw, (2, 3, 1, 0)).reshape(9, cin, cout)
    kern = partial(_conv3x3_s1_kernel, wp=wp, wvalid=wd)
    out, s, ss = pl.pallas_call(
        kern,
        out_shape=(jax.ShapeDtypeStruct((n, lrows, cout), jnp.float32),
                   jax.ShapeDtypeStruct((n, 8, cout), jnp.float32),
                   jax.ShapeDtypeStruct((n, 8, cout), jnp.float32)),
        grid=(n,),
        in_specs=[pl.BlockSpec((None, lp, cin), lambda i: (i, 0, 0)),
                  pl.BlockSpec((9, cin, cout), lambda i: (0, 0, 0))],
        out_specs=(pl.BlockSpec((None, lrows, cout), lambda i: (i, 0, 0)),
                   pl.BlockSpec((None, 8, cout), lambda i: (i, 0, 0)),
                   pl.BlockSpec((None, 8, cout), lambda i: (i, 0, 0))),
        compiler_params=pltpu.CompilerParams(dimension_semantics=("parallel",)),
    )(xf, w_taps)
    return out, jnp.sum(s[:, 0, :], axis=0), jnp.sum(ss[:, 0, :], axis=0)


def _conv3x3_s1_fused_act(y_raw, h, w, scale, shift, w_oihw):
    """conv2 over relu(scale*y1+shift) where y1 is the RAW stride-1 conv1 output.

    y_raw: (n, H*Wp, Cin) raw layout (cols >= W garbage).  BN1 affine + ReLU,
    garbage-column masking and zero-padding all happen inside the kernel.
    """
    n, lrows, cin = y_raw.shape
    cout = w_oihw.shape[0]
    wp = w + 2
    assert lrows == h * wp
    lp = (((h + 2) * wp + 2) + 7) // 8 * 8          # sublane-aligned scratch rows
    w_taps = jnp.transpose(w_oihw, (2, 3, 1, 0)).reshape(9, cin, cout)
    kern = partial(_conv3x3_s1_actin_kernel, wp=wp, wvalid=w)
    out, s, ss = pl.pallas_call(
        kern,
        out_shape=(jax.ShapeDtypeStruct((n, lrows, cout), jnp.float32),
                   jax.ShapeDtypeStruct((n, 8, cout), jnp.float32),
                   jax.ShapeDtypeStruct((n, 8, cout), jnp.float32)),
        grid=(n,),
        in_specs=[pl.BlockSpec((None, lrows, cin), lambda i: (i, 0, 0)),
                  pl.BlockSpec((9, cin, cout), lambda i: (0, 0, 0)),
                  pl.BlockSpec((1, cin), lambda i: (0, 0)),
                  pl.BlockSpec((1, cin), lambda i: (0, 0))],
        out_specs=(pl.BlockSpec((None, lrows, cout), lambda i: (i, 0, 0)),
                   pl.BlockSpec((None, 8, cout), lambda i: (i, 0, 0)),
                   pl.BlockSpec((None, 8, cout), lambda i: (i, 0, 0))),
        scratch_shapes=[pltpu.VMEM((lp, cin), jnp.float32)],
        compiler_params=pltpu.CompilerParams(dimension_semantics=("parallel",)),
    )(y_raw, w_taps, scale.reshape(1, cin), shift.reshape(1, cin))
    return out, jnp.sum(s[:, 0, :], axis=0), jnp.sum(ss[:, 0, :], axis=0)


def _im2col(x_nhwc, kh, kw, stride):
    """Explicit patch extraction (fallback path only)."""
    n, h, w, cin = x_nhwc.shape
    ph, pw = kh // 2, kw // 2
    xp = jnp.pad(x_nhwc, ((0, 0), (ph, ph), (pw, pw), (0, 0)))
    ho = (h + 2 * ph - kh) // stride + 1
    wo = (w + 2 * pw - kw) // stride + 1
    taps = []
    for dy in range(kh):
        for dx in range(kw):
            taps.append(lax.slice(
                xp, (0, dy, dx, 0),
                (n, dy + (ho - 1) * stride + 1, dx + (wo - 1) * stride + 1, cin),
                (1, stride, stride, 1)))
    return jnp.concatenate(taps, axis=-1), ho, wo


def matmul_stats(x, w):
    """(R,K)@(K,C) (no bias) with fused per-channel sum / sumsq partials."""
    rows, k = x.shape
    c = w.shape[1]
    tr, rp = _choose_mm_tile(rows, k, c)
    if rp != rows:
        x = jnp.pad(x, ((0, rp - rows), (0, 0)))    # zero rows -> zero output, stats unaffected
    nt = rp // tr
    out, s, ss = pl.pallas_call(
        _matmul_stats_kernel,
        out_shape=(jax.ShapeDtypeStruct((rp, c), jnp.float32),
                   jax.ShapeDtypeStruct((nt, 8, c), jnp.float32),
                   jax.ShapeDtypeStruct((nt, 8, c), jnp.float32)),
        grid=(nt,),
        in_specs=[pl.BlockSpec((tr, k), lambda i: (i, 0)),
                  pl.BlockSpec((k, c), lambda i: (0, 0))],
        out_specs=(pl.BlockSpec((tr, c), lambda i: (i, 0)),
                   pl.BlockSpec((None, 8, c), lambda i: (i, 0, 0)),
                   pl.BlockSpec((None, 8, c), lambda i: (i, 0, 0))),
        compiler_params=pltpu.CompilerParams(dimension_semantics=("parallel",)),
    )(x, w)
    return out[:rows], jnp.sum(s[:, 0, :], axis=0), jnp.sum(ss[:, 0, :], axis=0)


def _s1_conv_fits(h, w, cin, cout):
    wp = w + 2
    lrows = h * wp
    lp = (h + 2) * wp + 8
    est = 4 * (2 * lp * cin + 4 * lrows * cout + 2 * 9 * cin * cout)
    return est <= _CONV_VMEM_BUDGET


def _fused_path_fits(h, w, cin, cout):
    wp = w + 2
    lrows = h * wp
    lp = (((h + 2) * wp + 2) + 7) // 8 * 8
    est2 = 4 * (2 * lrows * cout + lp * cout + 4 * lrows * cout + 2 * 9 * cout * cout)
    return _s1_conv_fits(h, w, cin, cout) and est2 <= _CONV_VMEM_BUDGET


def conv3x3(x_nhwc, w_oihw, stride):
    """3x3 conv (no bias; BN follows) returning (y_nhwc, chan_sum, chan_sumsq)."""
    n, h, wd, cin = x_nhwc.shape
    cout = w_oihw.shape[0]
    if stride == 1 and _s1_conv_fits(h, wd, cin, cout):
        y_raw, s, ss = _conv3x3_s1_raw(x_nhwc, w_oihw)
        y = y_raw.reshape(n, h, wd + 2, cout)[:, :, :wd, :]   # drop garbage columns
        return y, s, ss
    # Fallback: explicit im2col in HBM + fused-stats matmul kernel.
    patches, ho, wo = _im2col(x_nhwc, 3, 3, stride)
    w_mat = jnp.transpose(w_oihw, (2, 3, 1, 0)).reshape(9 * cin, cout)
    y, s, ss = matmul_stats(patches.reshape(n * ho * wo, 9 * cin), w_mat)
    return y.reshape(n, ho, wo, cout), s, ss


def matmul_bias(x, w, b):
    rows, k = x.shape
    c = w.shape[1]
    tr, rp = _choose_mm_tile(rows, k, c)
    if rp != rows:
        x = jnp.pad(x, ((0, rp - rows), (0, 0)))
    out = pl.pallas_call(
        _matmul_bias_kernel,
        out_shape=jax.ShapeDtypeStruct((rp, c), jnp.float32),
        grid=(rp // tr,),
        in_specs=[pl.BlockSpec((tr, k), lambda i: (i, 0)),
                  pl.BlockSpec((k, c), lambda i: (0, 0)),
                  pl.BlockSpec((1, c), lambda i: (0, 0))],
        out_specs=pl.BlockSpec((tr, c), lambda i: (i, 0)),
        compiler_params=pltpu.CompilerParams(dimension_semantics=("parallel",)),
    )(x, w, b.reshape(1, c))
    return out[:rows]


def conv1x1(x_nhwc, w_oihw, b, stride):
    """1x1 projection shortcut (keeps its bias: no BN follows)."""
    n = x_nhwc.shape[0]
    cout, cin = w_oihw.shape[0], w_oihw.shape[1]
    xs = x_nhwc[:, ::stride, ::stride, :]
    ho, wo = xs.shape[1], xs.shape[2]
    y = matmul_bias(xs.reshape(n * ho * wo, cin), w_oihw.reshape(cout, cin).T, b)
    return y.reshape(n, ho, wo, cout)


# ---------------------- fused BN-affine (+add) + ReLU --------------------------

def _run_affine(kernel, slabs, scale, shift):
    """Run an affine(+add)+relu kernel on (R,C) slabs using a lane-dense view."""
    r, c = slabs[0].shape
    g = 1
    if c % 128 != 0:
        gc = 128 // math.gcd(c, 128)
        if r % gc == 0:
            g = gc                                   # (R,C) -> (R/g, g*C), g*C % 128 == 0
    cols = g * c
    xs = [a.reshape(r // g, cols) for a in slabs]
    sc = jnp.tile(scale.reshape(1, c), (1, g))
    sh = jnp.tile(shift.reshape(1, c), (1, g))
    rows = r // g
    tr, rp = _choose_ew_tile(rows)
    if rp != rows:
        xs = [jnp.pad(a, ((0, rp - rows), (0, 0))) for a in xs]
    out = pl.pallas_call(
        kernel,
        out_shape=jax.ShapeDtypeStruct((rp, cols), jnp.float32),
        grid=(rp // tr,),
        in_specs=[pl.BlockSpec((tr, cols), lambda i: (i, 0)) for _ in xs]
                + [pl.BlockSpec((1, cols), lambda i: (0, 0)),
                   pl.BlockSpec((1, cols), lambda i: (0, 0))],
        out_specs=pl.BlockSpec((tr, cols), lambda i: (i, 0)),
        compiler_params=pltpu.CompilerParams(dimension_semantics=("parallel",)),
    )(*xs, sc, sh)
    return out[:rows].reshape(r, c)


def affine_relu(x2d, scale, shift):
    return _run_affine(_affine_relu_kernel, [x2d], scale, shift)


def affine_add_relu(x2d, res2d, scale, shift):
    return _run_affine(_affine_add_relu_kernel, [x2d, res2d], scale, shift)


def bn_scale_shift(s, ss, nrows, gamma, beta, eps=_EPS):
    """Training-mode BN folded to per-channel scale/shift from batch stats."""
    mean = s / nrows
    var = ss / nrows - mean * mean        # biased variance (single pass; fine at fp32
    inv = lax.rsqrt(var + eps)            # for these magnitudes / tolerances)
    scale = gamma * inv
    shift = beta - mean * scale
    return scale, shift


# --------------------------------- module -------------------------------------

def init_residual_params(key, input_channels, num_channels, use_1x1conv=False):
    k1, k2, k3 = jax.random.split(key, 3)

    def conv_init(k, cout, cin, ksz):
        fan_in = cin * ksz * ksz
        bound = 1.0 / np.sqrt(fan_in)
        kw_, kb_ = jax.random.split(k)
        w = jax.random.uniform(kw_, (cout, cin, ksz, ksz), jnp.float32, -bound, bound)
        b = jax.random.uniform(kb_, (cout,), jnp.float32, -bound, bound)
        return w, b

    return {
        "conv1": conv_init(k1, num_channels, input_channels, 3),
        "conv2": conv_init(k2, num_channels, num_channels, 3),
        "bn1": (jnp.ones((num_channels,), jnp.float32),
                jnp.zeros((num_channels,), jnp.float32)),
        "bn2": (jnp.ones((num_channels,), jnp.float32),
                jnp.zeros((num_channels,), jnp.float32)),
        "conv3": conv_init(k3, num_channels, input_channels, 1) if use_1x1conv else None,
    }


def residual_forward(params, x_nchw, strides=1):
    x = jnp.transpose(x_nchw, (0, 2, 3, 1)).astype(jnp.float32)   # NCHW -> NHWC
    n, h, w, cin = x.shape

    w1, _b1 = params["conv1"]   # conv1/conv2 biases cancel exactly under training BN
    w2, _b2 = params["conv2"]
    g1, be1 = params["bn1"]
    g2, be2 = params["bn2"]
    cout = w1.shape[0]

    if strides == 1 and _fused_path_fits(h, w, cin, cout):
        # Fully fused stride-1 path:
        #   conv1 (raw layout, fused stats) -> bn1 scale/shift ->
        #   conv2 kernel applies affine+relu+pad in-kernel (fused stats).
        wp = w + 2
        ho, wo = h, w
        nrows = n * h * w
        y1_raw, s1, ss1 = _conv3x3_s1_raw(x, w1)
        sc1, sh1 = bn_scale_shift(s1, ss1, nrows, g1, be1)
        y2_raw, s2, ss2 = _conv3x3_s1_fused_act(y1_raw, h, w, sc1, sh1, w2)
        sc2, sh2 = bn_scale_shift(s2, ss2, nrows, g2, be2)
        y2r = y2_raw.reshape(n, h, wp, cout)[:, :, :w, :].reshape(nrows, cout)
    else:
        # General path (strided conv1 and/or very large images).
        y1, s1, ss1 = conv3x3(x, w1, stride=strides)
        ho, wo = y1.shape[1], y1.shape[2]
        nrows = n * ho * wo
        sc1, sh1 = bn_scale_shift(s1, ss1, nrows, g1, be1)
        y1r = affine_relu(y1.reshape(nrows, cout), sc1, sh1)
        y1 = y1r.reshape(n, ho, wo, cout)
        y2, s2, ss2 = conv3x3(y1, w2, stride=1)
        sc2, sh2 = bn_scale_shift(s2, ss2, nrows, g2, be2)
        y2r = y2.reshape(nrows, cout)

    # shortcut
    if params["conv3"] is not None:
        w3, b3 = params["conv3"]
        xs = conv1x1(x, w3, b3, stride=strides)
    else:
        xs = x
    xsr = xs.reshape(nrows, cout)

    out = affine_add_relu(y2r, xsr, sc2, sh2)       # bn2 + residual add + relu fused
    return jnp.transpose(out.reshape(n, ho, wo, cout), (0, 3, 1, 2))


# ----------------------------- pure-JAX reference ------------------------------

def residual_forward_ref(params, x_nchw, strides=1):
    x = x_nchw.astype(jnp.float32)

    def conv(x, w, b, stride, pad):
        y = lax.conv_general_dilated(
            x, w, window_strides=(stride, stride),
            padding=((pad, pad), (pad, pad)),
            dimension_numbers=("NCHW", "OIHW", "NCHW"))
        return y + b[None, :, None, None]

    def bn(y, gamma, beta):
        mean = jnp.mean(y, axis=(0, 2, 3), keepdims=True)
        var = jnp.mean((y - mean) ** 2, axis=(0, 2, 3), keepdims=True)
        yhat = (y - mean) / jnp.sqrt(var + _EPS)
        return yhat * gamma[None, :, None, None] + beta[None, :, None, None]

    w1, b1 = params["conv1"]; w2, b2 = params["conv2"]
    g1, be1 = params["bn1"]; g2, be2 = params["bn2"]
    y = jax.nn.relu(bn(conv(x, w1, b1, strides, 1), g1, be1))
    y = bn(conv(y, w2, b2, 1, 1), g2, be2)
    if params["conv3"] is not None:
        w3, b3 = params["conv3"]
        x = conv(x, w3, b3, strides, 0)
    return jax.nn.relu(y + x)


# ------------------------------------ main -------------------------------------

if __name__ == "__main__":
    key = jax.random.PRNGKey(0)
    kx1, kp1, kx2, kp2, kx3, kp3 = jax.random.split(key, 6)

    # Case 1: defaults (use_1x1conv=False, strides=1), identity shortcut.
    # Exercises the raw stride-1 conv kernel + the fully fused affine-in-conv2 kernel.
    N, C, H, W = 2, 8, 16, 16
    x1 = jax.random.normal(kx1, (N, C, H, W), jnp.float32)
    p1 = init_residual_params(kp1, input_channels=C, num_channels=C,
                              use_1x1conv=False)
    out1 = jax.block_until_ready(residual_forward(p1, x1, strides=1))
    ref1 = residual_forward_ref(p1, x1, strides=1)
    assert out1.shape == (N, C, H, W)
    np.testing.assert_allclose(np.asarray(out1), np.asarray(ref1),
                               rtol=2e-3, atol=2e-3)

    # Case 2: projection shortcut (use_1x1conv=True, strides=2).
    # Exercises the strided fallback matmul+stats kernel, the standalone affine+relu
    # kernel and the 1x1 shortcut kernel.
    x2 = jax.random.normal(kx2, (2, 4, 16, 16), jnp.float32)
    p2 = init_residual_params(kp2, input_channels=4, num_channels=8,
                              use_1x1conv=True)
    out2 = jax.block_until_ready(residual_forward(p2, x2, strides=2))
    ref2 = residual_forward_ref(p2, x2, strides=2)
    assert out2.shape == (2, 8, 8, 8)
    np.testing.assert_allclose(np.asarray(out2), np.asarray(ref2),
                               rtol=2e-3, atol=2e-3)

    # Case 3: stride-1 with channel expansion + 1x1 projection shortcut.
    # Exercises the fused path with cin != cout and the 1x1 conv at stride 1.
    x3 = jax.random.normal(kx3, (2, 4, 8, 8), jnp.float32)
    p3 = init_residual_params(kp3, input_channels=4, num_channels=8,
                              use_1x1conv=True)
    out3 = jax.block_until_ready(residual_forward(p3, x3, strides=1))
    ref3 = residual_forward_ref(p3, x3, strides=1)
    assert out3.shape == (2, 8, 8, 8)
    np.testing.assert_allclose(np.asarray(out3), np.asarray(ref3),
                               rtol=2e-3, atol=2e-3)

    print("KERNEL_OK")
</pallas_src>

<mosaic_0001>
module attributes {stable_mosaic.version = 11 : i64} {
  func.func @_conv3x3_s1_kernel(%arg0: i32, %arg1: memref<1x332x8xf32, #tpu.memory_space<vmem>>, %arg2: memref<9x8x8xf32, #tpu.memory_space<vmem>>, %arg3: memref<1x288x8xf32, #tpu.memory_space<vmem>>, %arg4: memref<1x8x8xf32, #tpu.memory_space<vmem>>, %arg5: memref<1x8x8xf32, #tpu.memory_space<vmem>>) attributes {dimension_semantics = [#tpu.dimension_semantics<parallel>], iteration_bounds = array<i64: 2>, scalar_prefetch = 0 : i64, scratch_operands = 0 : i64, tpu.core_type = #tpu.core_type<tc>, window_params = [{transform_indices = @transform_0, window_bounds = array<i64: 1, 332, 8>}, {pipeline_mode = #tpu.pipeline_mode<synchronous>, transform_indices = @transform_1, window_bounds = array<i64: 9, 8, 8>}, {transform_indices = @transform_2, window_bounds = array<i64: 1, 288, 8>}, {transform_indices = @transform_3, window_bounds = array<i64: 1, 8, 8>}, {transform_indices = @transform_4, window_bounds = array<i64: 1, 8, 8>}]} {
    %cst = arith.constant 0.000000e+00 : f32
    %0 = vector.broadcast %cst : f32 to vector<288x8xf32>
    %c0 = arith.constant 0 : index
    %c0_0 = arith.constant 0 : index
    %c0_1 = arith.constant 0 : index
    %1 = vector.load %arg1[%c0, %c0_0, %c0_1] : memref<1x332x8xf32, #tpu.memory_space<vmem>>, vector<1x288x8xf32>
    %2 = vector.shape_cast %1 : vector<1x288x8xf32> to vector<288x8xf32>
    %c0_2 = arith.constant 0 : index
    %c0_3 = arith.constant 0 : index
    %c0_4 = arith.constant 0 : index
    %3 = vector.load %arg2[%c0_2, %c0_3, %c0_4] : memref<9x8x8xf32, #tpu.memory_space<vmem>>, vector<1x8x8xf32>
    %4 = vector.shape_cast %3 : vector<1x8x8xf32> to vector<8x8xf32>
    %cst_5 = arith.constant dense<0.000000e+00> : vector<288x8xf32>
    %5 = tpu.matmul %2, %4, %cst_5 {dimension_numbers = #tpu.dot_dimension_numbers<[1], [0], [0], [1], [0, 0, 1, 1], [], []>} : vector<288x8xf32>, vector<8x8xf32>, vector<288x8xf32> -> vector<288x8xf32>
    %6 = arith.addf %0, %5 : vector<288x8xf32>
    %c0_6 = arith.constant 0 : index
    %c1 = arith.constant 1 : index
    %c0_7 = arith.constant 0 : index
    %7 = vector.load %arg1[%c0_6, %c1, %c0_7] : memref<1x332x8xf32, #tpu.memory_space<vmem>>, vector<1x288x8xf32>
    %8 = vector.shape_cast %7 : vector<1x288x8xf32> to vector<288x8xf32>
    %c1_8 = arith.constant 1 : index
    %c0_9 = arith.constant 0 : index
    %c0_10 = arith.constant 0 : index
    %9 = vector.load %arg2[%c1_8, %c0_9, %c0_10] : memref<9x8x8xf32, #tpu.memory_space<vmem>>, vector<1x8x8xf32>
    %10 = vector.shape_cast %9 : vector<1x8x8xf32> to vector<8x8xf32>
    %cst_11 = arith.constant dense<0.000000e+00> : vector<288x8xf32>
    %11 = tpu.matmul %8, %10, %cst_11 {dimension_numbers = #tpu.dot_dimension_numbers<[1], [0], [0], [1], [0, 0, 1, 1], [], []>} : vector<288x8xf32>, vector<8x8xf32>, vector<288x8xf32> -> vector<288x8xf32>
    %12 = arith.addf %6, %11 : vector<288x8xf32>
    %c0_12 = arith.constant 0 : index
    %c2 = arith.constant 2 : index
    %c0_13 = arith.constant 0 : index
    %13 = vector.load %arg1[%c0_12, %c2, %c0_13] : memref<1x332x8xf32, #tpu.memory_space<vmem>>, vector<1x288x8xf32>
    %14 = vector.shape_cast %13 : vector<1x288x8xf32> to vector<288x8xf32>
    %c2_14 = arith.constant 2 : index
    %c0_15 = arith.constant 0 : index
    %c0_16 = arith.constant 0 : index
    %15 = vector.load %arg2[%c2_14, %c0_15, %c0_16] : memref<9x8x8xf32, #tpu.memory_space<vmem>>, vector<1x8x8xf32>
    %16 = vector.shape_cast %15 : vector<1x8x8xf32> to vector<8x8xf32>
    %cst_17 = arith.constant dense<0.000000e+00> : vector<288x8xf32>
    %17 = tpu.matmul %14, %16, %cst_17 {dimension_numbers = #tpu.dot_dimension_numbers<[1], [0], [0], [1], [0, 0, 1, 1], [], []>} : vector<288x8xf32>, vector<8x8xf32>, vector<288x8xf32> -> vector<288x8xf32>
    %18 = arith.addf %12, %17 : vector<288x8xf32>
    %c0_18 = arith.constant 0 : index
    %c18 = arith.constant 18 : index
    %c0_19 = arith.constant 0 : index
    %19 = vector.load %arg1[%c0_18, %c18, %c0_19] : memref<1x332x8xf32, #tpu.memory_space<vmem>>, vector<1x288x8xf32>
    %20 = vector.shape_cast %19 : vector<1x288x8xf32> to vector<288x8xf32>
    %c3 = arith.constant 3 : index
    %c0_20 = arith.constant 0 : index
    %c0_21 = arith.constant 0 : index
    %21 = vector.load %arg2[%c3, %c0_20, %c0_21] : memref<9x8x8xf32, #tpu.memory_space<vmem>>, vector<1x8x8xf32>
    %22 = vector.shape_cast %21 : vector<1x8x8xf32> to vector<8x8xf32>
    %cst_22 = arith.constant dense<0.000000e+00> : vector<288x8xf32>
    %23 = tpu.matmul %20, %22, %cst_22 {dimension_numbers = #tpu.dot_dimension_numbers<[1], [0], [0], [1], [0, 0, 1, 1], [], []>} : vector<288x8xf32>, vector<8x8xf32>, vector<288x8xf32> -> vector<288x8xf32>
    %24 = arith.addf %18, %23 : vector<288x8xf32>
    %c0_23 = arith.constant 0 : index
    %c19 = arith.constant 19 : index
    %c0_24 = arith.constant 0 : index
    %25 = vector.load %arg1[%c0_23, %c19, %c0_24] : memref<1x332x8xf32, #tpu.memory_space<vmem>>, vector<1x288x8xf32>
    %26 = vector.shape_cast %25 : vector<1x288x8xf32> to vector<288x8xf32>
    %c4 = arith.constant 4 : index
    %c0_25 = arith.constant 0 : index
    %c0_26 = arith.constant 0 : index
    %27 = vector.load %arg2[%c4, %c0_25, %c0_26] : memref<9x8x8xf32, #tpu.memory_space<vmem>>, vector<1x8x8xf32>
    %28 = vector.shape_cast %27 : vector<1x8x8xf32> to vector<8x8xf32>
    %cst_27 = arith.constant dense<0.000000e+00> : vector<288x8xf32>
    %29 = tpu.matmul %26, %28, %cst_27 {dimension_numbers = #tpu.dot_dimension_numbers<[1], [0], [0], [1], [0, 0, 1, 1], [], []>} : vector<288x8xf32>, vector<8x8xf32>, vector<288x8xf32> -> vector<288x8xf32>
    %30 = arith.addf %24, %29 : vector<288x8xf32>
    %c0_28 = arith.constant 0 : index
    %c20 = arith.constant 20 : index
    %c0_29 = arith.constant 0 : index
    %31 = vector.load %arg1[%c0_28, %c20, %c0_29] : memref<1x332x8xf32, #tpu.memory_space<vmem>>, vector<1x288x8xf32>
    %32 = vector.shape_cast %31 : vector<1x288x8xf32> to vector<288x8xf32>
    %c5 = arith.constant 5 : index
    %c0_30 = arith.constant 0 : index
    %c0_31 = arith.constant 0 : index
    %33 = vector.load %arg2[%c5, %c0_30, %c0_31] : memref<9x8x8xf32, #tpu.memory_space<vmem>>, vector<1x8x8xf32>
    %34 = vector.shape_cast %33 : vector<1x8x8xf32> to vector<8x8xf32>
    %cst_32 = arith.constant dense<0.000000e+00> : vector<288x8xf32>
    %35 = tpu.matmul %32, %34, %cst_32 {dimension_numbers = #tpu.dot_dimension_numbers<[1], [0], [0], [1], [0, 0, 1, 1], [], []>} : vector<288x8xf32>, vector<8x8xf32>, vector<288x8xf32> -> vector<288x8xf32>
    %36 = arith.addf %30, %35 : vector<288x8xf32>
    %c0_33 = arith.constant 0 : index
    %c36 = arith.constant 36 : index
    %c0_34 = arith.constant 0 : index
    %37 = vector.load %arg1[%c0_33, %c36, %c0_34] : memref<1x332x8xf32, #tpu.memory_space<vmem>>, vector<1x288x8xf32>
    %38 = vector.shape_cast %37 : vector<1x288x8xf32> to vector<288x8xf32>
    %c6 = arith.constant 6 : index
    %c0_35 = arith.constant 0 : index
    %c0_36 = arith.constant 0 : index
    %39 = vector.load %arg2[%c6, %c0_35, %c0_36] : memref<9x8x8xf32, #tpu.memory_space<vmem>>, vector<1x8x8xf32>
    %40 = vector.shape_cast %39 : vector<1x8x8xf32> to vector<8x8xf32>
    %cst_37 = arith.constant dense<0.000000e+00> : vector<288x8xf32>
    %41 = tpu.matmul %38, %40, %cst_37 {dimension_numbers = #tpu.dot_dimension_numbers<[1], [0], [0], [1], [0, 0, 1, 1], [], []>} : vector<288x8xf32>, vector<8x8xf32>, vector<288x8xf32> -> vector<288x8xf32>
    %42 = arith.addf %36, %41 : vector<288x8xf32>
    %c0_38 = arith.constant 0 : index
    %c37 = arith.constant 37 : index
    %c0_39 = arith.constant 0 : index
    %43 = vector.load %arg1[%c0_38, %c37, %c0_39] : memref<1x332x8xf32, #tpu.memory_space<vmem>>, vector<1x288x8xf32>
    %44 = vector.shape_cast %43 : vector<1x288x8xf32> to vector<288x8xf32>
    %c7 = arith.constant 7 : index
    %c0_40 = arith.constant 0 : index
    %c0_41 = arith.constant 0 : index
    %45 = vector.load %arg2[%c7, %c0_40, %c0_41] : memref<9x8x8xf32, #tpu.memory_space<vmem>>, vector<1x8x8xf32>
    %46 = vector.shape_cast %45 : vector<1x8x8xf32> to vector<8x8xf32>
    %cst_42 = arith.constant dense<0.000000e+00> : vector<288x8xf32>
    %47 = tpu.matmul %44, %46, %cst_42 {dimension_numbers = #tpu.dot_dimension_numbers<[1], [0], [0], [1], [0, 0, 1, 1], [], []>} : vector<288x8xf32>, vector<8x8xf32>, vector<288x8xf32> -> vector<288x8xf32>
    %48 = arith.addf %42, %47 : vector<288x8xf32>
    %c0_43 = arith.constant 0 : index
    %c38 = arith.constant 38 : index
    %c0_44 = arith.constant 0 : index
    %49 = vector.load %arg1[%c0_43, %c38, %c0_44] : memref<1x332x8xf32, #tpu.memory_space<vmem>>, vector<1x288x8xf32>
    %50 = vector.shape_cast %49 : vector<1x288x8xf32> to vector<288x8xf32>
    %c8 = arith.constant 8 : index
    %c0_45 = arith.constant 0 : index
    %c0_46 = arith.constant 0 : index
    %51 = vector.load %arg2[%c8, %c0_45, %c0_46] : memref<9x8x8xf32, #tpu.memory_space<vmem>>, vector<1x8x8xf32>
    %52 = vector.shape_cast %51 : vector<1x8x8xf32> to vector<8x8xf32>
    %cst_47 = arith.constant dense<0.000000e+00> : vector<288x8xf32>
    %53 = tpu.matmul %50, %52, %cst_47 {dimension_numbers = #tpu.dot_dimension_numbers<[1], [0], [0], [1], [0, 0, 1, 1], [], []>} : vector<288x8xf32>, vector<8x8xf32>, vector<288x8xf32> -> vector<288x8xf32>
    %54 = arith.addf %48, %53 : vector<288x8xf32>
    %c0_48 = arith.constant 0 : index
    %c0_49 = arith.constant 0 : index
    %c0_50 = arith.constant 0 : index
    %55 = vector.load %arg3[%c0_48, %c0_49, %c0_50] : memref<1x288x8xf32, #tpu.memory_space<vmem>>, vector<1x288x8xf32>
    %56 = vector.shape_cast %55 : vector<1x288x8xf32> to vector<288x8xf32>
    %57 = vector.shape_cast %54 : vector<288x8xf32> to vector<1x288x8xf32>
    tpu.vector_store %arg3[%c0_48, %c0_49, %c0_50], %57 {strides = array<i32>} : memref<1x288x8xf32, #tpu.memory_space<vmem>>, vector<1x288x8xf32>,
    %58 = tpu.iota {dimensions = array<i32: 0>} : vector<288x1xi32>
    %c18_i32 = arith.constant 18 : i32
    %c0_i32 = arith.constant 0 : i32
    %59 = arith.cmpi eq, %c18_i32, %c0_i32 : i32
    %c1_i32 = arith.constant 1 : i32
    %60 = arith.select %59, %c1_i32, %c18_i32 : i32
    %61 = vector.broadcast %60 : i32 to vector<288x1xi32>
    %62 = arith.remsi %58, %61 : vector<288x1xi32>
    %c0_i32_51 = arith.constant 0 : i32
    %63 = vector.broadcast %c0_i32_51 : i32 to vector<288x1xi32>
    %64 = arith.cmpi ne, %62, %63 : vector<288x1xi32>
    %c0_i32_52 = arith.constant 0 : i32
    %65 = vector.broadcast %c0_i32_52 : i32 to vector<288x1xi32>
    %66 = arith.cmpi slt, %62, %65 : vector<288x1xi32>
    %c0_i32_53 = arith.constant 0 : i32
    %67 = arith.cmpi slt, %60, %c0_i32_53 : i32
    %68 = vector.broadcast %67 : i1 to vector<288x1xi1>
    %69 = vector.broadcast %68 : vector<288x1xi1> to vector<288x1xi1>
    %70 = arith.xori %66, %69 : vector<288x1xi1>
    %71 = arith.andi %70, %64 : vector<288x1xi1>
    %72 = vector.broadcast %60 : i32 to vector<288x1xi32>
    %73 = arith.addi %62, %72 : vector<288x1xi32>
    %74 = arith.select %71, %73, %62 : vector<288x1xi1>, vector<288x1xi32>
    %c16_i32 = arith.constant 16 : i32
    %75 = vector.broadcast %c16_i32 : i32 to vector<288x1xi32>
    %76 = arith.cmpi slt, %74, %75 : vector<288x1xi32>
    %cst_54 = arith.constant 0.000000e+00 : f32
    %77 = vector.shape_cast %76 : vector<288x1xi1> to vector<288x1xi1>
    %78 = vector.broadcast %77 : vector<288x1xi1> to vector<288x8xi1>
    %79 = vector.broadcast %cst_54 : f32 to vector<288x8xf32>
    %80 = arith.select %78, %54, %79 : vector<288x8xi1>, vector<288x8xf32>
    %cst_55 = arith.constant dense<0.000000e+00> : vector<8xf32>
    %81 = vector.multi_reduction <add>, %80, %cst_55 [0] : vector<288x8xf32> to vector<8xf32>
    %82 = vector.shape_cast %81 : vector<8xf32> to vector<1x8xf32>
    %83 = vector.shape_cast %82 : vector<1x8xf32> to vector<1x8xf32>
    %84 = vector.broadcast %83 : vector<1x8xf32> to vector<8x8xf32>
    %c0_56 = arith.constant 0 : index
    %c0_57 = arith.constant 0 : index
    %c0_58 = arith.constant 0 : index
    %85 = vector.load %arg4[%c0_56, %c0_57, %c0_58] : memref<1x8x8xf32, #tpu.memory_space<vmem>>, vector<1x8x8xf32>
    %86 = vector.shape_cast %85 : vector<1x8x8xf32> to vector<8x8xf32>
    %87 = vector.shape_cast %84 : vector<8x8xf32> to vector<1x8x8xf32>
    tpu.vector_store %arg4[%c0_56, %c0_57, %c0_58], %87 {strides = array<i32>} : memref<1x8x8xf32, #tpu.memory_space<vmem>>, vector<1x8x8xf32>,
    %88 = arith.mulf %80, %80 : vector<288x8xf32>
    %cst_59 = arith.constant dense<0.000000e+00> : vector<8xf32>
    %89 = vector.multi_reduction <add>, %88, %cst_59 [0] : vector<288x8xf32> to vector<8xf32>
    %90 = vector.shape_cast %89 : vector<8xf32> to vector<1x8xf32>
    %91 = vector.shape_cast %90 : vector<1x8xf32> to vector<1x8xf32>
    %92 = vector.broadcast %91 : vector<1x8xf32> to vector<8x8xf32>
    %c0_60 = arith.constant 0 : index
    %c0_61 = arith.constant 0 : index
    %c0_62 = arith.constant 0 : index
    %93 = vector.load %arg5[%c0_60, %c0_61, %c0_62] : memref<1x8x8xf32, #tpu.memory_space<vmem>>, vector<1x8x8xf32>
    %94 = vector.shape_cast %93 : vector<1x8x8xf32> to vector<8x8xf32>
    %95 = vector.shape_cast %92 : vector<8x8xf32> to vector<1x8x8xf32>
    tpu.vector_store %arg5[%c0_60, %c0_61, %c0_62], %95 {strides = array<i32>} : memref<1x8x8xf32, #tpu.memory_space<vmem>>, vector<1x8x8xf32>,
    return
  }
  func.func @transform_0(%arg0: i32) -> (i32, i32, i32) {
    %c0_i32 = arith.constant 0 : i32
    %c0_i32_0 = arith.constant 0 : i32
    %c0_i32_1 = arith.constant 0 : i32
    return %arg0, %c0_i32, %c0_i32_0 : i32, i32, i32
  }
  func.func @transform_1(%arg0: i32) -> (i32, i32, i32) {
    %c0_i32 = arith.constant 0 : i32
    %c0_i32_0 = arith.constant 0 : i32
    %c0_i32_1 = arith.constant 0 : i32
    %c0_i32_2 = arith.constant 0 : i32
    return %c0_i32, %c0_i32_0, %c0_i32_1 : i32, i32, i32
  }
  func.func @transform_2(%arg0: i32) -> (i32, i32, i32) {
    %c0_i32 = arith.constant 0 : i32
    %c0_i32_0 = arith.constant 0 : i32
    %c0_i32_1 = arith.constant 0 : i32
    return %arg0, %c0_i32, %c0_i32_0 : i32, i32, i32
  }
  func.func @transform_3(%arg0: i32) -> (i32, i32, i32) {
    %c0_i32 = arith.constant 0 : i32
    %c0_i32_0 = arith.constant 0 : i32
    %c0_i32_1 = arith.constant 0 : i32
    return %arg0, %c0_i32, %c0_i32_0 : i32, i32, i32
  }
  func.func @transform_4(%arg0: i32) -> (i32, i32, i32) {
    %c0_i32 = arith.constant 0 : i32
    %c0_i32_0 = arith.constant 0 : i32
    %c0_i32_1 = arith.constant 0 : i32
    return %arg0, %c0_i32, %c0_i32_0 : i32, i32, i32
  }
}

</mosaic_0001>

<bundles_post_ra>
// kernel: tpu_custom_call.1
= control target key start
LH: loop header
LB: loop body
LE: loop exit
PB: predicated region body
PF: predicated region fallthrough
CT: control target
= control target key end

     0   :  { %10 = vsyncpa [#allocation3], 0  ;;  %s7209_s0 = inlined_call_operand.vmem [shape: f32[2,332,8], index: 0, kind: input, shape index: {}]   ;;  %s7210_s1 = inlined_call_operand.vmem [shape: f32[9,8,8], index: 1, kind: input, shape index: {}]   ;;  %s7211_s2 = inlined_call_operand.vmem [shape: f32[2,288,8], index: 2, kind: output, shape index: {0}]   ;;  %s7212_s3 = inlined_call_operand.hbm [shape: f32[2,8,8], index: 3, kind: output, shape index: {1}]   ;;  %s7213_s4 = inlined_call_operand.hbm [shape: f32[2,8,8], index: 4, kind: output, shape index: {2}]  }
   0x1   :  { %12 = vsyncpa [#allocation3 + $0x1], 0 }
   0x2   :  { %13 = vsyncpa [#allocation5], 0 }
   0x3   :  { %15 = vsyncpa [#allocation5 + $0x1], 0  ;;  %s5221_s15 = smov 0   ;;  %s5223_s16 = smov 0  }
   0x4   :  { %s5225_s17 = smov 0   ;;  %s5227_s18 = smov 0  }
   0x5 LB: > { %s5242_s19 = sadd.s32 4294967295, %s5193_s18   ;;  %s4703_s20 = sadd.s32 4294967294, %s5193_s18   ;;  %s5193_s18 = sphi %s5227_s18, %s7312_s18   ;;  %s5189_s17 = sphi %s5225_s17, %s7311_s17   ;;  %s5185_s16 = sphi %s5223_s16, %s7310_s16   ;;  %s5181_s15 = sphi %s5221_s15, %s7309_s15  }
   0x6   : > { %s5246_s21 = sadd.s32 1, %s5193_s18   ;;  %s101_s22 = sadd.s32 1, %s5189_s17 }
   0x7   : > { %s98_s23 = ssub.s32 %s5193_s18, %s5246_s21  ;;  %p111_p0 = scmp.ne.s32.totalorder %s5189_s17, %s5185_s16 }
   0x8   : > { %p99_p1 = scmp.eq.s32.totalorder %s98_s23, 0  ;;  %p112_p2 = scmp.eq.s32.totalorder %s5242_s19, 1 }
   0x9   : > { %p117_p3 = scmp.ne.s32.totalorder %s5185_s16, %s5181_s15  ;;  %p118_p4 = scmp.eq.s32.totalorder %s4703_s20, 1 }
   0xa   : > { %s5257_s24 = scalar_select %p99_p1, %s5189_s17, %s101_s22  }
   0xb   : > { %p5259_p5 = por %p112_p2, %p111_p0  ;;  %p5263_p6 = por %p118_p4, %p117_p3 }
   0xc   : > { %p4706_p7 = scmp.ge.s32.totalorder %s5193_s18, 1  ;;  %p173_p8 = scmp.lt.s32.totalorder %s5193_s18, 3 }
   0xe   : > { %p174_p9 = pnand %p4706_p7, %p173_p8 }
  0x10   : > { %177 = sbr.rel (%p174_p9) target bundleno = 866 (0x362), region = 28 }
  0x15   : > { %v4711_v0 = vld [vmem:[%s7210_s1 + $0x8] sm:$0xff]  ;;  %p209_p10 = scmp.lt.s32.totalorder %s5242_s19, 1  ;;  %v4784_v1 = vld [vmem:[%s7210_s1 + $0x10] sm:$0xff]  ;;  %v4821_v2 = vld [vmem:[%s7210_s1 + $0x18] sm:$0xff]  ;;  %vm294_vm0 = vcmask 64512   ;;  %s7150_s11 = sand.u32 1, %s5185_s16  }
  0x16   : > { %5049 = vmatpush.msra.mxu1 %v4711_v0  ;;  %5050 = vmatpush.msra.mxu2 %v4711_v0  ;;  %v255_v3 = vld [vmem:[%s7210_s1] sm:$0xff]  ;;  %v4932_v29 = vld [vmem:[%s7210_s1 + $0x30] sm:$0xff]  ;;  %v4969_v30 = vld [vmem:[%s7210_s1 + $0x38] sm:$0xff]  ;;  %s5045_s13 = sshll.u32 %s5242_s19, 3  ;;  %s4549_s8 = scalar_lea.sflag [#allocation3], %s7150_s11 }
  0x17   : > { %s5283_s9 = scalar_select %p209_p10, %s5242_s19, 1  ;;  %5051 = vmatpush.msra.mxu3 %v4711_v0  ;;  %v4858_v4 = vld [vmem:[%s7210_s1 + $0x20] sm:$0xff]  ;;  %418 = vmatpush.msra.mxu0 %v4711_v0  ;;  %v4895_v31 = vld [vmem:[%s7210_s1 + $0x28] sm:$0xff] }
  0x18   : > { %922 = vmatpush.msrb.mxu2 %v4784_v1  ;;  %651 = vmatpush.msrb.mxu1 %v255_v3  ;;  %v5006_v36 = vld [vmem:[%s7210_s1 + $0x40] sm:$0xff]  ;;  %s4567_s22 = scalar_lea.hbm %s7212_s3, %s5045_s13  ;;  %s4581_s28 = scalar_lea.hbm %s7213_s4, %s5045_s13 }
  0x19   : > { %1229 = vmatpush.msrb.mxu3 %v4821_v2  ;;  %s5052_s12 = smul.u32 336, %s5283_s9  ;;  %1536 = vmatpush.msrb.mxu0 %v4858_v4  ;;  %s4571_s5 = sshll.u32 %s4567_s22, 4  ;;  %s4572_s5 = int_to_ptr.hbm [resolvable:$true] %s4571_s5 }
  0x1a   : > { %s5053_s7 = smul.u32 288, %s5283_s9  ;;  %s5113_s9 = sshra.s32 %s4572_s5, 4  ;;  %s5114_s9 = int_to_ptr.hbm [resolvable:$true] %s5113_s9 }
  0x1b   : > { %s5292_s20 = scalar_lea.vmem %s7209_s0, %s5052_s12  ;;  %s4707_s12 = sshll.u32 %s7150_s11, 3 }
  0x1c   : > { %v265_v5 = vld [vmem:[%s5292_s20 + $0x49] sm:$0xff]  ;;  %v274_v6 = vld [vmem:[%s5292_s20 + $0x91] sm:$0xff]  ;;  %v283_v7 = vld [vmem:[%s5292_s20 + $0xd9] sm:$0xff]  ;;  %s6086_s10 = scalar_lea.vmem %s7211_s2, %s5053_s7  ;;  %s201_s29 = scalar_lea.vmem [#allocation2], %s4707_s12 }
  0x1d   : > { %4721 = vmatmul.msk.f32.vlgmr.msra.gmra.mxu1 %vm294_vm0, %v265_v5  ;;  %4730 = vmatmul.msk.f32.vlgmr.msra.gmra.mxu2 %vm294_vm0, %v274_v6  ;;  %v256_v8 = vld [vmem:[%s5292_s20 + $0x1] sm:$0xff]  ;;  %v266_v9 = vld [vmem:[%s5292_s20 + $0x51] sm:$0xff]  ;;  %v275_v10 = vld [vmem:[%s5292_s20 + $0x99] sm:$0xff]  ;;  %s4569_s30 = sshll.u32 %s201_s29, 4  ;;  %s208_s19 = scalar_lea.vmem [#allocation4], %s4707_s12  ;;  %s4570_s30 = int_to_ptr.vmem [resolvable:$true] %s4569_s30 }
  0x1e   : > { %4739 = vmatmul.msk.f32.vlgmr.msra.gmra.mxu3 %vm294_vm0, %v283_v7  ;;  %4712 = vmatmul.msk.f32.vlgmr.msra.gmra.mxu0 %vm294_vm0, %v256_v8  ;;  %v284_v11 = vld [vmem:[%s5292_s20 + $0xe1] sm:$0xff]  ;;  %v257_v12 = vld [vmem:[%s5292_s20 + $0x9] sm:$0xff]  ;;  %v267_v13 = vld [vmem:[%s5292_s20 + $0x59] sm:$0xff]  ;;  %s4583_s6 = sshll.u32 %s208_s19, 4  ;;  %s4585_s7 = sshll.u32 %s4581_s28, 4  ;;  %s7162_s6 = int_to_ptr.vmem [resolvable:$true] %s4583_s6  ;;  %s7164_s7 = int_to_ptr.hbm [resolvable:$true] %s4585_s7 }
  0x1f   : > { %v276_v14 = vld [vmem:[%s5292_s20 + $0xa1] sm:$0xff]  ;;  %v285_v15 = vld [vmem:[%s5292_s20 + $0xe9] sm:$0xff]  ;;  %v258_v16 = vld [vmem:[%s5292_s20 + $0x11] sm:$0xff]  ;;  %2150 = vmatpush.msra.mxu2 %v4932_v29  ;;  %2457 = vmatpush.msra.mxu3 %v4969_v30  ;;  %s5119_s14 = scalar_lea.hbm %s7212_s3, 16  ;;  %p5120_p0 = scmp.lt.s32.totalorder %s5114_s9, %s7212_s3 }
  0x20   : > { %v268_v17 = vld [vmem:[%s5292_s20 + $0x61] sm:$0xff]  ;;  %v277_v18 = vld [vmem:[%s5292_s20 + $0xa9] sm:$0xff]  ;;  %v286_v19 = vld [vmem:[%s5292_s20 + $0xf1] sm:$0xff]  ;;  %1843 = vmatpush.msra.mxu1 %v4895_v31  ;;  %2764 = vmatpush.msra.mxu0 %v5006_v36 }
  0x21   : > { %v259_v20 = vld [vmem:[%s5292_s20 + $0x19] sm:$0xff]  ;;  %v269_v21 = vld [vmem:[%s5292_s20 + $0x69] sm:$0xff]  ;;  %v278_v22 = vld [vmem:[%s5292_s20 + $0xb1] sm:$0xff] }
  0x22   : > { %v287_v23 = vld [vmem:[%s5292_s20 + $0xf9] sm:$0xff]  ;;  %v260_v24 = vld [vmem:[%s5292_s20 + $0x21] sm:$0xff]  ;;  %v270_v25 = vld [vmem:[%s5292_s20 + $0x71] sm:$0xff] }
  0x23   : > { %v279_v26 = vld [vmem:[%s5292_s20 + $0xb9] sm:$0xff]  ;;  %v288_v27 = vld [vmem:[%s5292_s20 + $0x101] sm:$0xff]  ;;  %v261_v28 = vld [vmem:[%s5292_s20 + $0x29] sm:$0xff] }
  0x24   : > { %v271_v32 = vld [vmem:[%s5292_s20 + $0x79] sm:$0xff]  ;;  %v280_v33 = vld [vmem:[%s5292_s20 + $0xc1] sm:$0xff]  ;;  %v289_v34 = vld [vmem:[%s5292_s20 + $0x109] sm:$0xff] }
  0x25   : > { %4722 = vmatmul.msk.f32.gmra.mxu1 %vm294_vm0, %v266_v9  ;;  %4731 = vmatmul.msk.f32.gmra.mxu2 %vm294_vm0, %v275_v10  ;;  %v262_v35 = vld [vmem:[%s5292_s20 + $0x31] sm:$0xff]  ;;  %v272_v37 = vld [vmem:[%s5292_s20 + $0x81] sm:$0xff]  ;;  %v281_v38 = vld [vmem:[%s5292_s20 + $0xc9] sm:$0xff] }
  0x26   : > { %4740 = vmatmul.msk.f32.gmra.mxu3 %vm294_vm0, %v284_v11  ;;  %4713 = vmatmul.msk.f32.gmra.mxu0 %vm294_vm0, %v257_v12  ;;  %v290_v39 = vld [vmem:[%s5292_s20 + $0x111] sm:$0xff]  ;;  %v263_v40 = vld [vmem:[%s5292_s20 + $0x39] sm:$0xff]  ;;  %v273_v41 = vld [vmem:[%s5292_s20 + $0x89] sm:$0xff] }
  0x27   : > { %v282_v42 = vld [vmem:[%s5292_s20 + $0xd1] sm:$0xff]  ;;  %v291_v43 = vld [vmem:[%s5292_s20 + $0x119] sm:$0xff]  ;;  %v264_v44 = vld [vmem:[%s5292_s20 + $0x41] sm:$0xff] }
  0x28   : > { %v219_v45 = vld [vmem:[%s5292_s20] sm:$0xff]  ;;  %v1068_v47 = vld [vmem:[%s5292_s20 + $0x12] sm:$0xff]  ;;  %v220_v49 = vld [vmem:[%s5292_s20 + $0x8] sm:$0xff] }
  0x29   : > { %v761_v46 = vld [vmem:[%s5292_s20 + $0x2] sm:$0xff]  ;;  %v1375_v48 = vld [vmem:[%s5292_s20 + $0x13] sm:$0xff]  ;;  %v762_v50 = vld [vmem:[%s5292_s20 + $0xa] sm:$0xff] }
  0x2a   : > { %v1069_v51 = vld [vmem:[%s5292_s20 + $0x1a] sm:$0xff]  ;;  %v221_v53 = vld [vmem:[%s5292_s20 + $0x10] sm:$0xff]  ;;  %v1070_v54 = vld [vmem:[%s5292_s20 + $0x22] sm:$0xff] }
  0x2b   : > { %v1376_v52 = vld [vmem:[%s5292_s20 + $0x1b] sm:$0xff]  ;;  %v1377_v55 = vld [vmem:[%s5292_s20 + $0x23] sm:$0xff]  ;;  %v1378_v58 = vld [vmem:[%s5292_s20 + $0x2b] sm:$0xff] }
  0x2c   : > { %v222_v56 = vld [vmem:[%s5292_s20 + $0x18] sm:$0xff]  ;;  %v1071_v57 = vld [vmem:[%s5292_s20 + $0x2a] sm:$0xff]  ;;  %v223_v59 = vld [vmem:[%s5292_s20 + $0x20] sm:$0xff] }
  0x2d   : > { %4723 = vmatmul.msk.f32.gmra.mxu1 %vm294_vm0, %v267_v13  ;;  %4732 = vmatmul.msk.f32.gmra.mxu2 %vm294_vm0, %v276_v14  ;;  %v1072_v60 = vld [vmem:[%s5292_s20 + $0x32] sm:$0xff]  ;;  %v224_v62 = vld [vmem:[%s5292_s20 + $0x28] sm:$0xff]  ;;  %v1073_v63 = vld [vmem:[%s5292_s20 + $0x3a] sm:$0xff] }
  0x2e   : > { %4741 = vmatmul.msk.f32.gmra.mxu3 %vm294_vm0, %v285_v15  ;;  %4714 = vmatmul.msk.f32.gmra.mxu0 %vm294_vm0, %v258_v16  ;;  %v1379_v61 = vld [vmem:[%s5292_s20 + $0x33] sm:$0xff]  ;;  %v1380_v0 = vld [vmem:[%s5292_s20 + $0x3b] sm:$0xff]  ;;  %v1381_v3 = vld [vmem:[%s5292_s20 + $0x43] sm:$0xff] }
  0x2f   : > { %v225_v1 = vld [vmem:[%s5292_s20 + $0x30] sm:$0xff]  ;;  %v1074_v2 = vld [vmem:[%s5292_s20 + $0x42] sm:$0xff]  ;;  %v226_v5 = vld [vmem:[%s5292_s20 + $0x38] sm:$0xff] }
  0x30   : > { %v1075_v6 = vld [vmem:[%s5292_s20 + $0x4a] sm:$0xff]  ;;  %v227_v12 = vld [vmem:[%s5292_s20 + $0x40] sm:$0xff]  ;;  %v1076_v13 = vld [vmem:[%s5292_s20 + $0x52] sm:$0xff] }
  0x31   : > { %v1382_v8 = vld [vmem:[%s5292_s20 + $0x4b] sm:$0xff]  ;;  %v1383_v15 = vld [vmem:[%s5292_s20 + $0x53] sm:$0xff]  ;;  %v1385_v29 = vld [vmem:[%s5292_s20 + $0x63] sm:$0xff] }
  0x32   : > { %v1386_v36 = vld [vmem:[%s5292_s20 + $0x6b] sm:$0xff] }
  0x35   : > { %4724 = vmatmul.msk.f32.gmra.mxu1 %vm294_vm0, %v268_v17  ;;  %4733 = vmatmul.msk.f32.gmra.mxu2 %vm294_vm0, %v277_v18 }
  0x36   : > { %4742 = vmatmul.msk.f32.gmra.mxu3 %vm294_vm0, %v286_v19  ;;  %4715 = vmatmul.msk.f32.gmra.mxu0 %vm294_vm0, %v259_v20  ;;  %v228_v19 = vld [vmem:[%s5292_s20 + $0x48] sm:$0xff]  ;;  %v1077_v20 = vld [vmem:[%s5292_s20 + $0x5a] sm:$0xff] }
  0x3d   : > { %4725 = vmatmul.msk.f32.gmra.mxu1 %vm294_vm0, %v269_v21  ;;  %4734 = vmatmul.msk.f32.gmra.mxu2 %vm294_vm0, %v278_v22  ;;  %v1384_v22 = vld [vmem:[%s5292_s20 + $0x5b] sm:$0xff] }
  0x3e   : > { %4743 = vmatmul.msk.f32.gmra.mxu3 %vm294_vm0, %v287_v23  ;;  %4716 = vmatmul.msk.f32.gmra.mxu0 %vm294_vm0, %v260_v24 }
  0x45   : > { %4726 = vmatmul.msk.f32.gmra.mxu1 %vm294_vm0, %v270_v25  ;;  %4735 = vmatmul.msk.f32.gmra.mxu2 %vm294_vm0, %v279_v26  ;;  %v229_v26 = vld [vmem:[%s5292_s20 + $0x50] sm:$0xff] }
  0x46   : > { %4744 = vmatmul.msk.f32.gmra.mxu3 %vm294_vm0, %v288_v27  ;;  %4717 = vmatmul.msk.f32.gmra.mxu0 %vm294_vm0, %v261_v28  ;;  %v1078_v27 = vld [vmem:[%s5292_s20 + $0x62] sm:$0xff] }
  0x4d   : > { %4727 = vmatmul.msk.f32.gmra.mxu1 %vm294_vm0, %v271_v32  ;;  %4736 = vmatmul.msk.f32.gmra.mxu2 %vm294_vm0, %v280_v33  ;;  %v230_v33 = vld [vmem:[%s5292_s20 + $0x58] sm:$0xff] }
  0x4e   : > { %4745 = vmatmul.msk.f32.gmra.mxu3 %vm294_vm0, %v289_v34  ;;  %4718 = vmatmul.msk.f32.gmra.mxu0 %vm294_vm0, %v262_v35  ;;  %v1079_v34 = vld [vmem:[%s5292_s20 + $0x6a] sm:$0xff] }
  0x55   : > { %4728 = vmatmul.msk.f32.gmra.mxu1 %vm294_vm0, %v272_v37  ;;  %4737 = vmatmul.msk.f32.gmra.mxu2 %vm294_vm0, %v281_v38 }
  0x56   : > { %4746 = vmatmul.msk.f32.gmra.mxu3 %vm294_vm0, %v290_v39  ;;  %4719 = vmatmul.msk.f32.gmra.mxu0 %vm294_vm0, %v263_v40  ;;  %v231_v40 = vld [vmem:[%s5292_s20 + $0x60] sm:$0xff] }
  0x5d   : > { %4729 = vmatmul.msk.f32.gmra.mxu1 %vm294_vm0, %v273_v41  ;;  %4738 = vmatmul.msk.f32.gmra.mxu2 %vm294_vm0, %v282_v42  ;;  %v1080_v41 = vld [vmem:[%s5292_s20 + $0x72] sm:$0xff] }
  0x5e   : > { %4747 = vmatmul.msk.f32.gmra.mxu3 %vm294_vm0, %v291_v43  ;;  %4720 = vmatmul.msk.f32.gmra.mxu0 %vm294_vm0, %v264_v44  ;;  %v1387_v43 = vld [vmem:[%s5292_s20 + $0x73] sm:$0xff] }
  0x65   : > { %4748 = vmatmul.msk.f32.vlgmr.msrb.gmra.mxu1 %vm294_vm0, %v219_v45  ;;  %4785 = vmatmul.msk.f32.vlgmr.msrb.gmra.mxu2 %vm294_vm0, %v761_v46 }
  0x66   : > { %4822 = vmatmul.msk.f32.vlgmr.msrb.gmra.mxu3 %vm294_vm0, %v1068_v47  ;;  %4859 = vmatmul.msk.f32.vlgmr.msrb.gmra.mxu0 %vm294_vm0, %v1375_v48  ;;  %v1081_v48 = vld [vmem:[%s5292_s20 + $0x7a] sm:$0xff] }
  0x6d   : > { %4749 = vmatmul.msk.f32.gmra.mxu1 %vm294_vm0, %v220_v49  ;;  %4786 = vmatmul.msk.f32.gmra.mxu2 %vm294_vm0, %v762_v50  ;;  %v1388_v50 = vld [vmem:[%s5292_s20 + $0x7b] sm:$0xff] }
  0x6e   : > { %4823 = vmatmul.msk.f32.gmra.mxu3 %vm294_vm0, %v1069_v51  ;;  %4860 = vmatmul.msk.f32.gmra.mxu0 %vm294_vm0, %v1376_v52 }
  0x75   : > { %4750 = vmatmul.msk.f32.gmra.mxu1 %vm294_vm0, %v221_v53  ;;  %4787 = vmatmul.msk.f32.gmra.mxu2 %vm294_vm0, %v1068_v47  ;;  %v232_v47 = vld [vmem:[%s5292_s20 + $0x68] sm:$0xff] }
  0x76   : > { %4824 = vmatmul.msk.f32.gmra.mxu3 %vm294_vm0, %v1070_v54  ;;  %4861 = vmatmul.msk.f32.gmra.mxu0 %vm294_vm0, %v1377_v55  ;;  %v1082_v55 = vld [vmem:[%s5292_s20 + $0x82] sm:$0xff] }
  0x7d   : > { %4751 = vmatmul.msk.f32.gmra.mxu1 %vm294_vm0, %v222_v56  ;;  %4788 = vmatmul.msk.f32.gmra.mxu2 %vm294_vm0, %v1069_v51 }
  0x7e   : > { %4825 = vmatmul.msk.f32.gmra.mxu3 %vm294_vm0, %v1071_v57  ;;  %4862 = vmatmul.msk.f32.gmra.mxu0 %vm294_vm0, %v1378_v58 }
  0x85   : > { %4752 = vmatmul.msk.f32.gmra.mxu1 %vm294_vm0, %v223_v59  ;;  %4789 = vmatmul.msk.f32.gmra.mxu2 %vm294_vm0, %v1070_v54  ;;  %v233_v54 = vld [vmem:[%s5292_s20 + $0x70] sm:$0xff] }
  0x86   : > { %4826 = vmatmul.msk.f32.gmra.mxu3 %vm294_vm0, %v1072_v60  ;;  %4863 = vmatmul.msk.f32.gmra.mxu0 %vm294_vm0, %v1379_v61  ;;  %v234_v61 = vld [vmem:[%s5292_s20 + $0x78] sm:$0xff] }
  0x8d   : > { %4753 = vmatmul.msk.f32.gmra.mxu1 %vm294_vm0, %v224_v62  ;;  %4790 = vmatmul.msk.f32.gmra.mxu2 %vm294_vm0, %v1071_v57  ;;  %v1389_v57 = vld [vmem:[%s5292_s20 + $0x83] sm:$0xff] }
  0x8e   : > { %4827 = vmatmul.msk.f32.gmra.mxu3 %vm294_vm0, %v1073_v63  ;;  %4864 = vmatmul.msk.f32.gmra.mxu0 %vm294_vm0, %v1380_v0  ;;  %v1083_v62 = vld [vmem:[%s5292_s20 + $0x8a] sm:$0xff] }
  0x8f   : > { %v1390_v0 = vld [vmem:[%s5292_s20 + $0x8b] sm:$0xff] }
  0x95   : > { %4754 = vmatmul.msk.f32.gmra.mxu1 %vm294_vm0, %v225_v1  ;;  %4791 = vmatmul.msk.f32.gmra.mxu2 %vm294_vm0, %v1072_v60 }
  0x96   : > { %4828 = vmatmul.msk.f32.gmra.mxu3 %vm294_vm0, %v1074_v2  ;;  %4865 = vmatmul.msk.f32.gmra.mxu0 %vm294_vm0, %v1381_v3 }
  0x9a   : > { %v5429_v4 = vpop.f32.mrf.mxu1 }
  0x9b   : > { %v5433_v7 = vpop.f32.mrf.mxu0 }
  0x9d   : > { %4755 = vmatmul.msk.f32.gmra.mxu1 %vm294_vm0, %v226_v5  ;;  %4792 = vmatmul.msk.f32.gmra.mxu2 %vm294_vm0, %v1073_v63  ;;  %v235_v5 = vld [vmem:[%s5292_s20 + $0x80] sm:$0xff] }
  0x9e   : > { %4829 = vmatmul.msk.f32.gmra.mxu3 %vm294_vm0, %v1075_v6  ;;  %4866 = vmatmul.msk.f32.gmra.mxu0 %vm294_vm0, %v1382_v8 }
  0xa0   : > { %v5440_v9 = vpop.f32.mrf.mxu2 }
  0xa1   : > { %v5442_v10 = vpop.f32.mrf.mxu3 }
  0xa2   : > { %v5444_v11 = vpop.f32.mrf.mxu1 }
  0xa3   : > { %v5448_v14 = vpop.f32.mrf.mxu0 }
  0xa5   : > { %4756 = vmatmul.msk.f32.gmra.mxu1 %vm294_vm0, %v227_v12  ;;  %4793 = vmatmul.msk.f32.gmra.mxu2 %vm294_vm0, %v1074_v2  ;;  %v1391_v12 = vld [vmem:[%s5292_s20 + $0x93] sm:$0xff] }
  0xa6   : > { %4830 = vmatmul.msk.f32.gmra.mxu3 %vm294_vm0, %v1076_v13  ;;  %4867 = vmatmul.msk.f32.gmra.mxu0 %vm294_vm0, %v1383_v15 }
  0xa8   : > { %v5455_v16 = vpop.f32.mrf.mxu2 }
  0xa9   : > { %v5457_v17 = vpop.f32.mrf.mxu3 }
  0xaa   : > { %v5459_v18 = vpop.f32.mrf.mxu1 }
  0xab   : > { %v5463_v21 = vpop.f32.mrf.mxu0 }
  0xad   : > { %4757 = vmatmul.msk.f32.gmra.mxu1 %vm294_vm0, %v228_v19  ;;  %4794 = vmatmul.msk.f32.gmra.mxu2 %vm294_vm0, %v1075_v6  ;;  %v1084_v6 = vld [vmem:[%s5292_s20 + $0x92] sm:$0xff] }
  0xae   : > { %4831 = vmatmul.msk.f32.gmra.mxu3 %vm294_vm0, %v1077_v20  ;;  %4868 = vmatmul.msk.f32.gmra.mxu0 %vm294_vm0, %v1384_v22 }
  0xb0   : > { %v5470_v23 = vpop.f32.mrf.mxu2 }
  0xb1   : > { %v5472_v24 = vpop.f32.mrf.mxu3 }
  0xb2   : > { %v5474_v25 = vpop.f32.mrf.mxu1 }
  0xb3   : > { %v5478_v28 = vpop.f32.mrf.mxu0 }
  0xb5   : > { %4758 = vmatmul.msk.f32.gmra.mxu1 %vm294_vm0, %v229_v26  ;;  %4795 = vmatmul.msk.f32.gmra.mxu2 %vm294_vm0, %v1076_v13  ;;  %v236_v26 = vld [vmem:[%s5292_s20 + $0x88] sm:$0xff] }
  0xb6   : > { %4832 = vmatmul.msk.f32.gmra.mxu3 %vm294_vm0, %v1078_v27  ;;  %4869 = vmatmul.msk.f32.gmra.mxu0 %vm294_vm0, %v1385_v29  ;;  %v1085_v29 = vld [vmem:[%s5292_s20 + $0x9a] sm:$0xff] }
  0xb8   : > { %v5485_v30 = vpop.f32.mrf.mxu2 }
  0xb9   : > { %v5487_v31 = vpop.f32.mrf.mxu3 }
  0xba   : > { %v5489_v32 = vpop.f32.mrf.mxu1 }
  0xbb   : > { %v5493_v35 = vpop.f32.mrf.mxu0 }
  0xbd   : > { %4759 = vmatmul.msk.f32.gmra.mxu1 %vm294_vm0, %v230_v33  ;;  %4796 = vmatmul.msk.f32.gmra.mxu2 %vm294_vm0, %v1077_v20 }
  0xbe   : > { %4833 = vmatmul.msk.f32.gmra.mxu3 %vm294_vm0, %v1079_v34  ;;  %4870 = vmatmul.msk.f32.gmra.mxu0 %vm294_vm0, %v1386_v36 }
  0xc0   : > { %v5500_v37 = vpop.f32.mrf.mxu2 }
  0xc1   : > { %v5502_v38 = vpop.f32.mrf.mxu3 }
  0xc2   : > { %v5504_v39 = vpop.f32.mrf.mxu1 }
  0xc3   : > { %v5508_v42 = vpop.f32.mrf.mxu0 }
  0xc5   : > { %4760 = vmatmul.msk.f32.gmra.mxu1 %vm294_vm0, %v231_v40  ;;  %4797 = vmatmul.msk.f32.gmra.mxu2 %vm294_vm0, %v1078_v27 }
  0xc6   : > { %4834 = vmatmul.msk.f32.gmra.mxu3 %vm294_vm0, %v1080_v41  ;;  %4871 = vmatmul.msk.f32.gmra.mxu0 %vm294_vm0, %v1387_v43 }
  0xc8   : > { %v5515_v44 = vpop.f32.mrf.mxu2 }
  0xc9   : > { %v5517_v45 = vpop.f32.mrf.mxu3 }
  0xca   : > { %v5519_v46 = vpop.f32.mrf.mxu1 }
  0xcb   : > { %v5523_v49 = vpop.f32.mrf.mxu0 }
  0xcd   : > { %4761 = vmatmul.msk.f32.gmra.mxu1 %vm294_vm0, %v232_v47  ;;  %4798 = vmatmul.msk.f32.gmra.mxu2 %vm294_vm0, %v1079_v34  ;;  %v1392_v34 = vld [vmem:[%s5292_s20 + $0x9b] sm:$0xff] }
  0xce   : > { %4835 = vmatmul.msk.f32.gmra.mxu3 %vm294_vm0, %v1081_v48  ;;  %4872 = vmatmul.msk.f32.gmra.mxu0 %vm294_vm0, %v1388_v50 }
  0xd0   : > { %v5530_v51 = vpop.f32.mrf.mxu2 }
  0xd1   : > { %v5532_v52 = vpop.f32.mrf.mxu3 }
  0xd2   : > { %v5534_v53 = vpop.f32.mrf.mxu1 }
  0xd3   : > { %v5538_v56 = vpop.f32.mrf.mxu0 }
  0xd5   : > { %4762 = vmatmul.msk.f32.gmra.mxu1 %vm294_vm0, %v233_v54  ;;  %4799 = vmatmul.msk.f32.gmra.mxu2 %vm294_vm0, %v1080_v41  ;;  %v1086_v54 = vld [vmem:[%s5292_s20 + $0xa2] sm:$0xff] }
  0xd6   : > { %4836 = vmatmul.msk.f32.gmra.mxu3 %vm294_vm0, %v1082_v55  ;;  %4873 = vmatmul.msk.f32.gmra.mxu0 %vm294_vm0, %v1389_v57  ;;  %v1393_v57 = vld [vmem:[%s5292_s20 + $0xa3] sm:$0xff] }
  0xd8   : > { %v5545_v58 = vpop.f32.mrf.mxu2 }
  0xd9   : > { %v5547_v59 = vpop.f32.mrf.mxu3 }
  0xda   : > { %v5549_v60 = vpop.f32.mrf.mxu1 }
  0xdb   : > { %v5553_v63 = vpop.f32.mrf.mxu0 }
  0xdd   : > { %4763 = vmatmul.msk.f32.gmra.mxu1 %vm294_vm0, %v234_v61  ;;  %4800 = vmatmul.msk.f32.gmra.mxu2 %vm294_vm0, %v1081_v48  ;;  %v237_v48 = vld [vmem:[%s5292_s20 + $0x90] sm:$0xff] }
  0xde   : > { %4837 = vmatmul.msk.f32.gmra.mxu3 %vm294_vm0, %v1083_v62  ;;  %4874 = vmatmul.msk.f32.gmra.mxu0 %vm294_vm0, %v1390_v0 }
  0xe0   : > { %v5560_v1 = vpop.f32.mrf.mxu2 }
  0xe1   : > { %v5562_v2 = vpop.f32.mrf.mxu3 }
  0xe2   : > { %v653_v3 = vpop.f32.mrf.mxu1 }
  0xe3   : > { %v1538_v8 = vpop.f32.mrf.mxu0  ;;  %v654_v13 = vadd.f32 %v653_v3, %v5433_v7 }
  0xe5   : > { %4764 = vmatmul.msk.f32.gmra.mxu1 %vm294_vm0, %v235_v5  ;;  %4801 = vmatmul.msk.f32.gmra.mxu2 %vm294_vm0, %v1082_v55 }
  0xe6   : > { %4838 = vmatmul.msk.f32.gmra.mxu3 %vm294_vm0, %v1084_v6  ;;  %4875 = vmatmul.msk.f32.gmra.mxu0 %vm294_vm0, %v1391_v12 }
  0xe8   : > { %v924_v15 = vpop.f32.mrf.mxu2 }
  0xe9   : > { %v1032_v19 = vadd.f32 %v924_v15, %v654_v13  ;;  %v1231_v20 = vpop.f32.mrf.mxu3  ;;  %v1087_v13 = vld [vmem:[%s5292_s20 + $0xaa] sm:$0xff] }
  0xea   : > { %v656_v22 = vpop.f32.mrf.mxu1 }
  0xeb   : > { %v1339_v27 = vadd.f32 %v1231_v20, %v1032_v19  ;;  %v1541_v33 = vpop.f32.mrf.mxu0  ;;  %v657_v7 = vadd.f32 %v656_v22, %v5448_v14  ;;  %v1394_v19 = vld [vmem:[%s5292_s20 + $0xab] sm:$0xff] }
  0xed   : > { %v5575_v36 = vadd.f32 %v1538_v8, %v1339_v27  ;;  %4765 = vmatmul.msk.f32.gmra.mxu1 %vm294_vm0, %v236_v26  ;;  %4802 = vmatmul.msk.f32.gmra.mxu2 %vm294_vm0, %v1083_v62  ;;  %v238_v8 = vld [vmem:[%s5292_s20 + $0x98] sm:$0xff] }
  0xee   : > { %4839 = vmatmul.msk.f32.gmra.mxu3 %vm294_vm0, %v1085_v29  ;;  %4876 = vmatmul.msk.f32.gmra.mxu0 %vm294_vm0, %v1392_v34 }
  0xf0   : > { %v927_v40 = vpop.f32.mrf.mxu2 }
  0xf1   : > { %v1033_v41 = vadd.f32 %v927_v40, %v657_v7  ;;  %v1234_v43 = vpop.f32.mrf.mxu3  ;;  %v1088_v7 = vld [vmem:[%s5292_s20 + $0xb2] sm:$0xff] }
  0xf2   : > { %v659_v47 = vpop.f32.mrf.mxu1 }
  0xf3   : > { %v1340_v50 = vadd.f32 %v1234_v43, %v1033_v41  ;;  %v1544_v55 = vpop.f32.mrf.mxu0  ;;  %v660_v14 = vadd.f32 %v659_v47, %v5463_v21  ;;  %v1395_v41 = vld [vmem:[%s5292_s20 + $0xb3] sm:$0xff] }
  0xf5   : > { %v5585_v61 = vadd.f32 %v1541_v33, %v1340_v50  ;;  %4766 = vmatmul.msk.f32.gmra.mxu1 %vm294_vm0, %v237_v48  ;;  %4803 = vmatmul.msk.f32.gmra.mxu2 %vm294_vm0, %v1084_v6  ;;  %v239_v33 = vld [vmem:[%s5292_s20 + $0xa0] sm:$0xff] }
  0xf6   : > { %4840 = vmatmul.msk.f32.gmra.mxu3 %vm294_vm0, %v1086_v54  ;;  %4877 = vmatmul.msk.f32.gmra.mxu0 %vm294_vm0, %v1393_v57 }
  0xf8   : > { %v930_v62 = vpop.f32.mrf.mxu2 }
  0xf9   : > { %v1034_v0 = vadd.f32 %v930_v62, %v660_v14  ;;  %v1237_v3 = vpop.f32.mrf.mxu3  ;;  %v1089_v14 = vld [vmem:[%s5292_s20 + $0xba] sm:$0xff] }
  0xfa   : > { %v662_v5 = vpop.f32.mrf.mxu1 }
  0xfb   : > { %v1341_v12 = vadd.f32 %v1237_v3, %v1034_v0  ;;  %v1547_v15 = vpop.f32.mrf.mxu0  ;;  %v663_v21 = vadd.f32 %v662_v5, %v5478_v28  ;;  %v1396_v0 = vld [vmem:[%s5292_s20 + $0xbb] sm:$0xff] }
  0xfd   : > { %v5595_v20 = vadd.f32 %v1544_v55, %v1341_v12  ;;  %4767 = vmatmul.msk.f32.gmra.mxu1 %vm294_vm0, %v238_v8  ;;  %4804 = vmatmul.msk.f32.gmra.mxu2 %vm294_vm0, %v1085_v29  ;;  %v240_v55 = vld [vmem:[%s5292_s20 + $0xa8] sm:$0xff] }
  0xfe   : > { %4841 = vmatmul.msk.f32.gmra.mxu3 %vm294_vm0, %v1087_v13  ;;  %4878 = vmatmul.msk.f32.gmra.mxu0 %vm294_vm0, %v1394_v19 }
 0x100   : > { %v933_v6 = vpop.f32.mrf.mxu2 }
 0x101   : > { %v1035_v22 = vadd.f32 %v933_v6, %v663_v21  ;;  %v1240_v26 = vpop.f32.mrf.mxu3  ;;  %v1090_v21 = vld [vmem:[%s5292_s20 + $0xc2] sm:$0xff] }
 0x102   : > { %v665_v27 = vpop.f32.mrf.mxu1 }
 0x103   : > { %v1342_v34 = vadd.f32 %v1240_v26, %v1035_v22  ;;  %v1550_v40 = vpop.f32.mrf.mxu0  ;;  %v666_v28 = vadd.f32 %v665_v27, %v5493_v35  ;;  %v1397_v22 = vld [vmem:[%s5292_s20 + $0xc3] sm:$0xff] }
 0x105   : > { %v5605_v43 = vadd.f32 %v1547_v15, %v1342_v34  ;;  %4768 = vmatmul.msk.f32.gmra.mxu1 %vm294_vm0, %v239_v33  ;;  %4805 = vmatmul.msk.f32.gmra.mxu2 %vm294_vm0, %v1086_v54  ;;  %v241_v15 = vld [vmem:[%s5292_s20 + $0xb0] sm:$0xff] }
 0x106   : > { %4842 = vmatmul.msk.f32.gmra.mxu3 %vm294_vm0, %v1088_v7  ;;  %4879 = vmatmul.msk.f32.gmra.mxu0 %vm294_vm0, %v1395_v41 }
 0x108   : > { %v936_v29 = vpop.f32.mrf.mxu2 }
 0x109   : > { %v1036_v47 = vadd.f32 %v936_v29, %v666_v28  ;;  %v1243_v48 = vpop.f32.mrf.mxu3  ;;  %v1091_v28 = vld [vmem:[%s5292_s20 + $0xca] sm:$0xff] }
 0x10a   : > { %v668_v50 = vpop.f32.mrf.mxu1 }
 0x10b   : > { %v1343_v57 = vadd.f32 %v1243_v48, %v1036_v47  ;;  %v1553_v62 = vpop.f32.mrf.mxu0  ;;  %v669_v35 = vadd.f32 %v668_v50, %v5508_v42  ;;  %v1398_v47 = vld [vmem:[%s5292_s20 + $0xcb] sm:$0xff] }
 0x10d   : > { %v5615_v3 = vadd.f32 %v1550_v40, %v1343_v57  ;;  %4769 = vmatmul.msk.f32.gmra.mxu1 %vm294_vm0, %v240_v55  ;;  %4806 = vmatmul.msk.f32.gmra.mxu2 %vm294_vm0, %v1087_v13  ;;  %v242_v40 = vld [vmem:[%s5292_s20 + $0xb8] sm:$0xff] }
 0x10e   : > { %4843 = vmatmul.msk.f32.gmra.mxu3 %vm294_vm0, %v1089_v14  ;;  %4880 = vmatmul.msk.f32.gmra.mxu0 %vm294_vm0, %v1396_v0 }
 0x110   : > { %v939_v54 = vpop.f32.mrf.mxu2 }
 0x111   : > { %v1037_v5 = vadd.f32 %v939_v54, %v669_v35  ;;  %v1246_v8 = vpop.f32.mrf.mxu3  ;;  %v1092_v35 = vld [vmem:[%s5292_s20 + $0xd2] sm:$0xff] }
 0x112   : > { %v671_v12 = vpop.f32.mrf.mxu1 }
 0x113   : > { %v1344_v19 = vadd.f32 %v1246_v8, %v1037_v5  ;;  %v1556_v6 = vpop.f32.mrf.mxu0  ;;  %v672_v42 = vadd.f32 %v671_v12, %v5523_v49  ;;  %v1399_v5 = vld [vmem:[%s5292_s20 + $0xd3] sm:$0xff] }
 0x115   : > { %v5625_v26 = vadd.f32 %v1553_v62, %v1344_v19  ;;  %4770 = vmatmul.msk.f32.gmra.mxu1 %vm294_vm0, %v241_v15  ;;  %4807 = vmatmul.msk.f32.gmra.mxu2 %vm294_vm0, %v1088_v7  ;;  %v243_v62 = vld [vmem:[%s5292_s20 + $0xc0] sm:$0xff] }
 0x116   : > { %4844 = vmatmul.msk.f32.gmra.mxu3 %vm294_vm0, %v1090_v21  ;;  %4881 = vmatmul.msk.f32.gmra.mxu0 %vm294_vm0, %v1397_v22 }
 0x118   : > { %v942_v13 = vpop.f32.mrf.mxu2 }
 0x119   : > { %v1038_v27 = vadd.f32 %v942_v13, %v672_v42  ;;  %v1249_v33 = vpop.f32.mrf.mxu3  ;;  %v1093_v42 = vld [vmem:[%s5292_s20 + $0xda] sm:$0xff] }
 0x11a   : > { %v674_v34 = vpop.f32.mrf.mxu1 }
 0x11b   : > { %v1345_v41 = vadd.f32 %v1249_v33, %v1038_v27  ;;  %v1559_v29 = vpop.f32.mrf.mxu0  ;;  %v675_v49 = vadd.f32 %v674_v34, %v5538_v56  ;;  %v1400_v27 = vld [vmem:[%s5292_s20 + $0xdb] sm:$0xff] }
 0x11d   : > { %v5635_v48 = vadd.f32 %v1556_v6, %v1345_v41  ;;  %4771 = vmatmul.msk.f32.gmra.mxu1 %vm294_vm0, %v242_v40  ;;  %4808 = vmatmul.msk.f32.gmra.mxu2 %vm294_vm0, %v1089_v14  ;;  %v244_v6 = vld [vmem:[%s5292_s20 + $0xc8] sm:$0xff] }
 0x11e   : > { %4845 = vmatmul.msk.f32.gmra.mxu3 %vm294_vm0, %v1091_v28  ;;  %4882 = vmatmul.msk.f32.gmra.mxu0 %vm294_vm0, %v1398_v47 }
 0x120   : > { %v945_v7 = vpop.f32.mrf.mxu2 }
 0x121   : > { %v1039_v50 = vadd.f32 %v945_v7, %v675_v49  ;;  %v1252_v55 = vpop.f32.mrf.mxu3  ;;  %v1094_v49 = vld [vmem:[%s5292_s20 + $0xe2] sm:$0xff] }
 0x122   : > { %v677_v57 = vpop.f32.mrf.mxu1 }
 0x123   : > { %v1346_v0 = vadd.f32 %v1252_v55, %v1039_v50  ;;  %v1562_v54 = vpop.f32.mrf.mxu0  ;;  %v678_v56 = vadd.f32 %v677_v57, %v5553_v63  ;;  %v1401_v50 = vld [vmem:[%s5292_s20 + $0xe3] sm:$0xff] }
 0x125   : > { %v5645_v8 = vadd.f32 %v1559_v29, %v1346_v0  ;;  %4772 = vmatmul.msk.f32.gmra.mxu1 %vm294_vm0, %v243_v62  ;;  %4809 = vmatmul.msk.f32.gmra.mxu2 %vm294_vm0, %v1090_v21  ;;  %v245_v29 = vld [vmem:[%s5292_s20 + $0xd0] sm:$0xff] }
 0x126   : > { %4846 = vmatmul.msk.f32.gmra.mxu3 %vm294_vm0, %v1092_v35  ;;  %4883 = vmatmul.msk.f32.gmra.mxu0 %vm294_vm0, %v1399_v5 }
 0x128   : > { %v948_v14 = vpop.f32.mrf.mxu2 }
 0x129   : > { %v1040_v12 = vadd.f32 %v948_v14, %v678_v56  ;;  %v1255_v15 = vpop.f32.mrf.mxu3  ;;  %v1095_v56 = vld [vmem:[%s5292_s20 + $0xea] sm:$0xff] }
 0x12a   : > { %v680_v19 = vpop.f32.mrf.mxu1 }
 0x12b   : > { %v1347_v22 = vadd.f32 %v1255_v15, %v1040_v12  ;;  %v1565_v13 = vpop.f32.mrf.mxu0  ;;  %v681_v63 = vadd.f32 %v680_v19, %v5429_v4  ;;  %v1402_v12 = vld [vmem:[%s5292_s20 + $0xeb] sm:$0xff] }
 0x12d   : > { %v5655_v33 = vadd.f32 %v1562_v54, %v1347_v22  ;;  %4773 = vmatmul.msk.f32.gmra.mxu1 %vm294_vm0, %v244_v6  ;;  %4810 = vmatmul.msk.f32.gmra.mxu2 %vm294_vm0, %v1091_v28  ;;  %v246_v54 = vld [vmem:[%s5292_s20 + $0xd8] sm:$0xff] }
 0x12e   : > { %4847 = vmatmul.msk.f32.gmra.mxu3 %vm294_vm0, %v1093_v42  ;;  %4884 = vmatmul.msk.f32.gmra.mxu0 %vm294_vm0, %v1400_v27 }
 0x130   : > { %v951_v21 = vpop.f32.mrf.mxu2 }
 0x131   : > { %v1041_v34 = vadd.f32 %v951_v21, %v681_v63  ;;  %v1258_v40 = vpop.f32.mrf.mxu3  ;;  %v1096_v63 = vld [vmem:[%s5292_s20 + $0xf2] sm:$0xff] }
 0x132   : > { %v683_v41 = vpop.f32.mrf.mxu1 }
 0x133   : > { %v1348_v47 = vadd.f32 %v1258_v40, %v1041_v34  ;;  %v1568_v7 = vpop.f32.mrf.mxu0  ;;  %v684_v4 = vadd.f32 %v683_v41, %v5444_v11  ;;  %v1403_v34 = vld [vmem:[%s5292_s20 + $0xf3] sm:$0xff] }
 0x135   : > { %v5665_v55 = vadd.f32 %v1565_v13, %v1348_v47  ;;  %4774 = vmatmul.msk.f32.gmra.mxu1 %vm294_vm0, %v245_v29  ;;  %4811 = vmatmul.msk.f32.gmra.mxu2 %vm294_vm0, %v1092_v35  ;;  %v247_v13 = vld [vmem:[%s5292_s20 + $0xe0] sm:$0xff] }
 0x136   : > { %4848 = vmatmul.msk.f32.gmra.mxu3 %vm294_vm0, %v1094_v49  ;;  %4885 = vmatmul.msk.f32.gmra.mxu0 %vm294_vm0, %v1401_v50 }
 0x138   : > { %v954_v28 = vpop.f32.mrf.mxu2 }
 0x139   : > { %v1042_v57 = vadd.f32 %v954_v28, %v684_v4  ;;  %v1261_v62 = vpop.f32.mrf.mxu3  ;;  %v1097_v4 = vld [vmem:[%s5292_s20 + $0xfa] sm:$0xff] }
 0x13a   : > { %v686_v0 = vpop.f32.mrf.mxu1 }
 0x13b   : > { %v1349_v5 = vadd.f32 %v1261_v62, %v1042_v57  ;;  %v1571_v14 = vpop.f32.mrf.mxu0  ;;  %v687_v11 = vadd.f32 %v686_v0, %v5459_v18  ;;  %v1404_v57 = vld [vmem:[%s5292_s20 + $0xfb] sm:$0xff] }
 0x13d   : > { %v5675_v15 = vadd.f32 %v1568_v7, %v1349_v5  ;;  %4775 = vmatmul.msk.f32.gmra.mxu1 %vm294_vm0, %v246_v54  ;;  %4812 = vmatmul.msk.f32.gmra.mxu2 %vm294_vm0, %v1093_v42  ;;  %v248_v7 = vld [vmem:[%s5292_s20 + $0xe8] sm:$0xff] }
 0x13e   : > { %4849 = vmatmul.msk.f32.gmra.mxu3 %vm294_vm0, %v1095_v56  ;;  %4886 = vmatmul.msk.f32.gmra.mxu0 %vm294_vm0, %v1402_v12 }
 0x140   : > { %v957_v35 = vpop.f32.mrf.mxu2 }
 0x141   : > { %v1043_v19 = vadd.f32 %v957_v35, %v687_v11  ;;  %v1264_v6 = vpop.f32.mrf.mxu3  ;;  %v1098_v11 = vld [vmem:[%s5292_s20 + $0x102] sm:$0xff] }
 0x142   : > { %v689_v22 = vpop.f32.mrf.mxu1 }
 0x143   : > { %v1350_v27 = vadd.f32 %v1264_v6, %v1043_v19  ;;  %v1574_v21 = vpop.f32.mrf.mxu0  ;;  %v690_v18 = vadd.f32 %v689_v22, %v5474_v25  ;;  %v1405_v19 = vld [vmem:[%s5292_s20 + $0x103] sm:$0xff] }
 0x145   : > { %v5685_v40 = vadd.f32 %v1571_v14, %v1350_v27  ;;  %4776 = vmatmul.msk.f32.gmra.mxu1 %vm294_vm0, %v247_v13  ;;  %4813 = vmatmul.msk.f32.gmra.mxu2 %vm294_vm0, %v1094_v49  ;;  %v249_v14 = vld [vmem:[%s5292_s20 + $0xf0] sm:$0xff] }
 0x146   : > { %4850 = vmatmul.msk.f32.gmra.mxu3 %vm294_vm0, %v1096_v63  ;;  %4887 = vmatmul.msk.f32.gmra.mxu0 %vm294_vm0, %v1403_v34 }
 0x148   : > { %v960_v42 = vpop.f32.mrf.mxu2 }
 0x149   : > { %v1044_v41 = vadd.f32 %v960_v42, %v690_v18  ;;  %v1267_v29 = vpop.f32.mrf.mxu3  ;;  %v1099_v18 = vld [vmem:[%s5292_s20 + $0x10a] sm:$0xff] }
 0x14a   : > { %v692_v47 = vpop.f32.mrf.mxu1 }
 0x14b   : > { %v1351_v50 = vadd.f32 %v1267_v29, %v1044_v41  ;;  %v1577_v28 = vpop.f32.mrf.mxu0  ;;  %v693_v25 = vadd.f32 %v692_v47, %v5489_v32  ;;  %v1406_v41 = vld [vmem:[%s5292_s20 + $0x10b] sm:$0xff] }
 0x14d   : > { %v5695_v62 = vadd.f32 %v1574_v21, %v1351_v50  ;;  %4777 = vmatmul.msk.f32.gmra.mxu1 %vm294_vm0, %v248_v7  ;;  %4814 = vmatmul.msk.f32.gmra.mxu2 %vm294_vm0, %v1095_v56  ;;  %v250_v21 = vld [vmem:[%s5292_s20 + $0xf8] sm:$0xff] }
 0x14e   : > { %4851 = vmatmul.msk.f32.gmra.mxu3 %vm294_vm0, %v1097_v4  ;;  %4888 = vmatmul.msk.f32.gmra.mxu0 %vm294_vm0, %v1404_v57 }
 0x150   : > { %v963_v49 = vpop.f32.mrf.mxu2 }
 0x151   : > { %v1045_v0 = vadd.f32 %v963_v49, %v693_v25  ;;  %v1270_v54 = vpop.f32.mrf.mxu3  ;;  %v1100_v25 = vld [vmem:[%s5292_s20 + $0x112] sm:$0xff] }
 0x152   : > { %v695_v5 = vpop.f32.mrf.mxu1 }
 0x153   : > { %v1352_v12 = vadd.f32 %v1270_v54, %v1045_v0  ;;  %v1580_v35 = vpop.f32.mrf.mxu0  ;;  %v696_v32 = vadd.f32 %v695_v5, %v5504_v39  ;;  %v1407_v0 = vld [vmem:[%s5292_s20 + $0x113] sm:$0xff] }
 0x155   : > { %v5705_v6 = vadd.f32 %v1577_v28, %v1352_v12  ;;  %4778 = vmatmul.msk.f32.gmra.mxu1 %vm294_vm0, %v249_v14  ;;  %4815 = vmatmul.msk.f32.gmra.mxu2 %vm294_vm0, %v1096_v63  ;;  %v251_v28 = vld [vmem:[%s5292_s20 + $0x100] sm:$0xff] }
 0x156   : > { %4852 = vmatmul.msk.f32.gmra.mxu3 %vm294_vm0, %v1098_v11  ;;  %4889 = vmatmul.msk.f32.gmra.mxu0 %vm294_vm0, %v1405_v19 }
 0x158   : > { %v966_v56 = vpop.f32.mrf.mxu2 }
 0x159   : > { %v1046_v22 = vadd.f32 %v966_v56, %v696_v32  ;;  %v1273_v13 = vpop.f32.mrf.mxu3  ;;  %v1101_v32 = vld [vmem:[%s5292_s20 + $0x11a] sm:$0xff] }
 0x15a   : > { %v698_v27 = vpop.f32.mrf.mxu1 }
 0x15b   : > { %v1353_v34 = vadd.f32 %v1273_v13, %v1046_v22  ;;  %v1583_v42 = vpop.f32.mrf.mxu0  ;;  %v699_v39 = vadd.f32 %v698_v27, %v5519_v46  ;;  %v1408_v22 = vld [vmem:[%s5292_s20 + $0x11b] sm:$0xff] }
 0x15d   : > { %v5715_v29 = vadd.f32 %v1580_v35, %v1353_v34  ;;  %4779 = vmatmul.msk.f32.gmra.mxu1 %vm294_vm0, %v250_v21  ;;  %4816 = vmatmul.msk.f32.gmra.mxu2 %vm294_vm0, %v1097_v4  ;;  %v252_v35 = vld [vmem:[%s5292_s20 + $0x108] sm:$0xff] }
 0x15e   : > { %4853 = vmatmul.msk.f32.gmra.mxu3 %vm294_vm0, %v1099_v18  ;;  %4890 = vmatmul.msk.f32.gmra.mxu0 %vm294_vm0, %v1406_v41 }
 0x160   : > { %v969_v63 = vpop.f32.mrf.mxu2 }
 0x161   : > { %v1047_v47 = vadd.f32 %v969_v63, %v699_v39  ;;  %v1276_v7 = vpop.f32.mrf.mxu3  ;;  %v1102_v39 = vld [vmem:[%s5292_s20 + $0x122] sm:$0xff] }
 0x162   : > { %v701_v50 = vpop.f32.mrf.mxu1 }
 0x163   : > { %v1354_v57 = vadd.f32 %v1276_v7, %v1047_v47  ;;  %v1586_v49 = vpop.f32.mrf.mxu0  ;;  %v702_v46 = vadd.f32 %v701_v50, %v5534_v53  ;;  %v1409_v47 = vld [vmem:[%s5292_s20 + $0x123] sm:$0xff] }
 0x165   : > { %v5725_v54 = vadd.f32 %v1583_v42, %v1354_v57  ;;  %4780 = vmatmul.msk.f32.gmra.mxu1 %vm294_vm0, %v251_v28  ;;  %4817 = vmatmul.msk.f32.gmra.mxu2 %vm294_vm0, %v1098_v11  ;;  %v253_v42 = vld [vmem:[%s5292_s20 + $0x110] sm:$0xff] }
 0x166   : > { %4854 = vmatmul.msk.f32.gmra.mxu3 %vm294_vm0, %v1100_v25  ;;  %4891 = vmatmul.msk.f32.gmra.mxu0 %vm294_vm0, %v1407_v0 }
 0x168   : > { %v972_v4 = vpop.f32.mrf.mxu2 }
 0x169   : > { %v1048_v5 = vadd.f32 %v972_v4, %v702_v46  ;;  %v1279_v14 = vpop.f32.mrf.mxu3  ;;  %v1103_v46 = vld [vmem:[%s5292_s20 + $0x12a] sm:$0xff] }
 0x16a   : > { %v704_v12 = vpop.f32.mrf.mxu1 }
 0x16b   : > { %v1355_v19 = vadd.f32 %v1279_v14, %v1048_v5  ;;  %v1589_v56 = vpop.f32.mrf.mxu0  ;;  %v705_v53 = vadd.f32 %v704_v12, %v5549_v60  ;;  %v1410_v5 = vld [vmem:[%s5292_s20 + $0x12b] sm:$0xff] }
 0x16d   : > { %v5735_v13 = vadd.f32 %v1586_v49, %v1355_v19  ;;  %4781 = vmatmul.msk.f32.gmra.mxu1 %vm294_vm0, %v252_v35  ;;  %4818 = vmatmul.msk.f32.gmra.mxu2 %vm294_vm0, %v1099_v18  ;;  %v254_v49 = vld [vmem:[%s5292_s20 + $0x118] sm:$0xff] }
 0x16e   : > { %4855 = vmatmul.msk.f32.gmra.mxu3 %vm294_vm0, %v1101_v32  ;;  %4892 = vmatmul.msk.f32.gmra.mxu0 %vm294_vm0, %v1408_v22  ;;  %v1989_v22 = vld [vmem:[%s5292_s20 + $0x24] sm:$0xff] }
 0x170   : > { %v975_v11 = vpop.f32.mrf.mxu2 }
 0x171   : > { %v1049_v27 = vadd.f32 %v975_v11, %v705_v53  ;;  %v1282_v21 = vpop.f32.mrf.mxu3  ;;  %v2296_v11 = vld [vmem:[%s5292_s20 + $0x25] sm:$0xff] }
 0x172   : > { %v707_v34 = vpop.f32.mrf.mxu1 }
 0x173   : > { %v1356_v41 = vadd.f32 %v1282_v21, %v1049_v27  ;;  %v1592_v63 = vpop.f32.mrf.mxu0  ;;  %v708_v60 = vadd.f32 %v707_v34, %v5440_v9  ;;  %v2603_v21 = vld [vmem:[%s5292_s20 + $0x26] sm:$0xff] }
 0x175   : > { %v5745_v7 = vadd.f32 %v1589_v56, %v1356_v41  ;;  %4782 = vmatmul.msk.f32.gmra.mxu1 %vm294_vm0, %v253_v42  ;;  %4819 = vmatmul.msk.f32.gmra.mxu2 %vm294_vm0, %v1100_v25  ;;  %v1682_v56 = vld [vmem:[%s5292_s20 + $0x14] sm:$0xff] }
 0x176   : > { %4856 = vmatmul.msk.f32.gmra.mxu3 %vm294_vm0, %v1102_v39  ;;  %4893 = vmatmul.msk.f32.gmra.mxu0 %vm294_vm0, %v1409_v47  ;;  %v1990_v47 = vld [vmem:[%s5292_s20 + $0x2c] sm:$0xff] }
 0x178   : > { %v978_v18 = vpop.f32.mrf.mxu2 }
 0x179   : > { %v1050_v50 = vadd.f32 %v978_v18, %v708_v60  ;;  %v1285_v28 = vpop.f32.mrf.mxu3  ;;  %v2297_v18 = vld [vmem:[%s5292_s20 + $0x2d] sm:$0xff] }
 0x17a   : > { %v710_v57 = vpop.f32.mrf.mxu1 }
 0x17b   : > { %v1357_v0 = vadd.f32 %v1285_v28, %v1050_v50  ;;  %v1595_v4 = vpop.f32.mrf.mxu0  ;;  %v711_v9 = vadd.f32 %v710_v57, %v5455_v16  ;;  %v2604_v28 = vld [vmem:[%s5292_s20 + $0x2e] sm:$0xff] }
 0x17d   : > { %v5755_v25 = vadd.f32 %v1592_v63, %v1357_v0  ;;  %4783 = vmatmul.msk.f32.gmra.mxu1 %vm294_vm0, %v254_v49  ;;  %4820 = vmatmul.msk.f32.gmra.mxu2 %vm294_vm0, %v1101_v32  ;;  %v1683_v63 = vld [vmem:[%s5292_s20 + $0x1c] sm:$0xff] }
 0x17e   : > { %4857 = vmatmul.msk.f32.gmra.mxu3 %vm294_vm0, %v1103_v46  ;;  %4894 = vmatmul.msk.f32.gmra.mxu0 %vm294_vm0, %v1410_v5  ;;  %v1991_v5 = vld [vmem:[%s5292_s20 + $0x34] sm:$0xff] }
 0x180   : > { %v981_v14 = vpop.f32.mrf.mxu2 }
 0x181   : > { %v1051_v12 = vadd.f32 %v981_v14, %v711_v9  ;;  %v1288_v35 = vpop.f32.mrf.mxu3  ;;  %v2298_v14 = vld [vmem:[%s5292_s20 + $0x35] sm:$0xff] }
 0x182   : > { %v713_v19 = vpop.f32.mrf.mxu1 }
 0x183   : > { %v1358_v53 = vadd.f32 %v1288_v35, %v1051_v12  ;;  %v1598_v27 = vpop.f32.mrf.mxu0  ;;  %v714_v16 = vadd.f32 %v713_v19, %v5470_v23  ;;  %v2605_v35 = vld [vmem:[%s5292_s20 + $0x36] sm:$0xff] }
 0x185   : > { %v5766_v32 = vadd.f32 %v1595_v4, %v1358_v53  ;;  %4896 = vmatmul.msk.f32.vlgmr.msra.gmra.mxu1 %vm294_vm0, %v1682_v56  ;;  %4933 = vmatmul.msk.f32.vlgmr.msra.gmra.mxu2 %vm294_vm0, %v1989_v22 }
 0x186   : > { %4970 = vmatmul.msk.f32.vlgmr.msra.gmra.mxu3 %vm294_vm0, %v2296_v11  ;;  %5007 = vmatmul.msk.f32.vlgmr.msra.gmra.mxu0 %vm294_vm0, %v2603_v21  ;;  %v1992_v21 = vld [vmem:[%s5292_s20 + $0x3c] sm:$0xff] }
 0x188   : > { %v984_v34 = vpop.f32.mrf.mxu2 }
 0x189   : > { %v1052_v42 = vadd.f32 %v984_v34, %v714_v16  ;;  %v1291_v41 = vpop.f32.mrf.mxu3  ;;  %v2299_v34 = vld [vmem:[%s5292_s20 + $0x3d] sm:$0xff] }
 0x18a   : > { %v716_v39 = vpop.f32.mrf.mxu1 }
 0x18b   : > { %v1359_v60 = vadd.f32 %v1291_v41, %v1052_v42  ;;  %v1601_v50 = vpop.f32.mrf.mxu0  ;;  %v717_v23 = vadd.f32 %v716_v39, %v5485_v30 }
 0x18d   : > { %v5777_v57 = vadd.f32 %v1598_v27, %v1359_v60  ;;  %4897 = vmatmul.msk.f32.gmra.mxu1 %vm294_vm0, %v1683_v63  ;;  %4934 = vmatmul.msk.f32.gmra.mxu2 %vm294_vm0, %v1990_v47 }
 0x18e   : > { %4971 = vmatmul.msk.f32.gmra.mxu3 %vm294_vm0, %v2297_v18  ;;  %5008 = vmatmul.msk.f32.gmra.mxu0 %vm294_vm0, %v2604_v28 }
 0x190   : > { %v987_v49 = vpop.f32.mrf.mxu2 }
 0x191   : > { %v1053_v0 = vadd.f32 %v987_v49, %v717_v23  ;;  %v1294_v46 = vpop.f32.mrf.mxu3  ;;  %v2300_v23 = vld [vmem:[%s5292_s20 + $0x45] sm:$0xff] }
 0x192   : > { %v719_v4 = vpop.f32.mrf.mxu1 }
 0x193   : > { %v1360_v9 = vadd.f32 %v1294_v46, %v1053_v0  ;;  %v1604_v12 = vpop.f32.mrf.mxu0  ;;  %v720_v30 = vadd.f32 %v719_v4, %v5500_v37 }
 0x195   : > { %v5787_v19 = vadd.f32 %v1601_v50, %v1360_v9  ;;  %4898 = vmatmul.msk.f32.gmra.mxu1 %vm294_vm0, %v1989_v22  ;;  %4935 = vmatmul.msk.f32.gmra.mxu2 %vm294_vm0, %v1991_v5  ;;  %v2606_v22 = vld [vmem:[%s5292_s20 + $0x3e] sm:$0xff] }
 0x196   : > { %4972 = vmatmul.msk.f32.gmra.mxu3 %vm294_vm0, %v2298_v14  ;;  %5009 = vmatmul.msk.f32.gmra.mxu0 %vm294_vm0, %v2605_v35  ;;  %v1993_v50 = vld [vmem:[%s5292_s20 + $0x44] sm:$0xff] }
 0x198   : > { %v990_v56 = vpop.f32.mrf.mxu2 }
 0x199   : > { %v1054_v53 = vadd.f32 %v990_v56, %v720_v30  ;;  %v1297_v11 = vpop.f32.mrf.mxu3  ;;  %v2301_v30 = vld [vmem:[%s5292_s20 + $0x4d] sm:$0xff] }
 0x19a   : > { %v722_v27 = vpop.f32.mrf.mxu1 }
 0x19b   : > { %v1361_v16 = vadd.f32 %v1297_v11, %v1054_v53  ;;  %v1607_v42 = vpop.f32.mrf.mxu0  ;;  %v723_v37 = vadd.f32 %v722_v27, %v5515_v44 }
 0x19d   : > { %v5797_v41 = vadd.f32 %v1604_v12, %v1361_v16  ;;  %4899 = vmatmul.msk.f32.gmra.mxu1 %vm294_vm0, %v1990_v47  ;;  %4936 = vmatmul.msk.f32.gmra.mxu2 %vm294_vm0, %v1992_v21  ;;  %v2607_v47 = vld [vmem:[%s5292_s20 + $0x46] sm:$0xff] }
 0x19e   : > { %4973 = vmatmul.msk.f32.gmra.mxu3 %vm294_vm0, %v2299_v34  ;;  %5010 = vmatmul.msk.f32.gmra.mxu0 %vm294_vm0, %v2606_v22  ;;  %v1994_v12 = vld [vmem:[%s5292_s20 + $0x4c] sm:$0xff] }
 0x1a0   : > { %v993_v39 = vpop.f32.mrf.mxu2 }
 0x1a1   : > { %v1055_v63 = vadd.f32 %v993_v39, %v723_v37  ;;  %v1300_v60 = vpop.f32.mrf.mxu3  ;;  %v2302_v37 = vld [vmem:[%s5292_s20 + $0x55] sm:$0xff] }
 0x1a2   : > { %v725_v18 = vpop.f32.mrf.mxu1 }
 0x1a3   : > { %v1362_v28 = vadd.f32 %v1300_v60, %v1055_v63  ;;  %v1610_v49 = vpop.f32.mrf.mxu0  ;;  %v726_v44 = vadd.f32 %v725_v18, %v5530_v51 }
 0x1a5   : > { %v5807_v0 = vadd.f32 %v1607_v42, %v1362_v28  ;;  %4900 = vmatmul.msk.f32.gmra.mxu1 %vm294_vm0, %v1991_v5  ;;  %4937 = vmatmul.msk.f32.gmra.mxu2 %vm294_vm0, %v1993_v50  ;;  %v2608_v5 = vld [vmem:[%s5292_s20 + $0x4e] sm:$0xff] }
 0x1a6   : > { %4974 = vmatmul.msk.f32.gmra.mxu3 %vm294_vm0, %v2300_v23  ;;  %5011 = vmatmul.msk.f32.gmra.mxu0 %vm294_vm0, %v2607_v47  ;;  %v1995_v42 = vld [vmem:[%s5292_s20 + $0x54] sm:$0xff] }
 0x1a7   : > { %7218 = vst [vmem:[#allocation8_spill] sm:$0xff] %v5807_v0  ;;  %v2622_v0 = vld [vmem:[%s5292_s20 + $0xbe] sm:$0xff] }
 0x1a8   : > { %v996_v46 = vpop.f32.mrf.mxu2 }
 0x1a9   : > { %v1056_v4 = vadd.f32 %v996_v46, %v726_v44  ;;  %v1303_v9 = vpop.f32.mrf.mxu3  ;;  %v2303_v44 = vld [vmem:[%s5292_s20 + $0x5d] sm:$0xff] }
 0x1aa   : > { %v728_v14 = vpop.f32.mrf.mxu1 }
 0x1ab   : > { %v1363_v35 = vadd.f32 %v1303_v9, %v1056_v4  ;;  %v1613_v56 = vpop.f32.mrf.mxu0  ;;  %v729_v51 = vadd.f32 %v728_v14, %v5545_v58 }
 0x1ad   : > { %v5817_v53 = vadd.f32 %v1610_v49, %v1363_v35  ;;  %4901 = vmatmul.msk.f32.gmra.mxu1 %vm294_vm0, %v1992_v21  ;;  %4938 = vmatmul.msk.f32.gmra.mxu2 %vm294_vm0, %v1994_v12  ;;  %v2609_v21 = vld [vmem:[%s5292_s20 + $0x56] sm:$0xff] }
 0x1ae   : > { %4975 = vmatmul.msk.f32.gmra.mxu3 %vm294_vm0, %v2301_v30  ;;  %5012 = vmatmul.msk.f32.gmra.mxu0 %vm294_vm0, %v2608_v5  ;;  %v1996_v49 = vld [vmem:[%s5292_s20 + $0x5c] sm:$0xff] }
 0x1af   : > { %7219 = vst [vmem:[#allocation9_spill] sm:$0xff] %v5817_v53  ;;  %v2315_v53 = vld [vmem:[%s5292_s20 + $0xbd] sm:$0xff] }
 0x1b0   : > { %v999_v11 = vpop.f32.mrf.mxu2 }
 0x1b1   : > { %v1057_v27 = vadd.f32 %v999_v11, %v729_v51  ;;  %v1306_v16 = vpop.f32.mrf.mxu3  ;;  %v2304_v51 = vld [vmem:[%s5292_s20 + $0x65] sm:$0xff] }
 0x1b2   : > { %v731_v34 = vpop.f32.mrf.mxu1 }
 0x1b3   : > { %v1364_v22 = vadd.f32 %v1306_v16, %v1057_v27  ;;  %v1616_v39 = vpop.f32.mrf.mxu0  ;;  %v732_v58 = vadd.f32 %v731_v34, %v5560_v1 }
 0x1b5   : > { %v5827_v63 = vadd.f32 %v1613_v56, %v1364_v22  ;;  %4902 = vmatmul.msk.f32.gmra.mxu1 %vm294_vm0, %v1993_v50  ;;  %4939 = vmatmul.msk.f32.gmra.mxu2 %vm294_vm0, %v1995_v42  ;;  %v2610_v50 = vld [vmem:[%s5292_s20 + $0x5e] sm:$0xff] }
 0x1b6   : > { %4976 = vmatmul.msk.f32.gmra.mxu3 %vm294_vm0, %v2302_v37  ;;  %5013 = vmatmul.msk.f32.gmra.mxu0 %vm294_vm0, %v2609_v21  ;;  %v1997_v56 = vld [vmem:[%s5292_s20 + $0x64] sm:$0xff] }
 0x1b7   : > { %7220 = vst [vmem:[#allocation10_spill] sm:$0xff] %v5827_v63 }
 0x1b8   : > { %v1002_v60 = vpop.f32.mrf.mxu2 }
 0x1b9   : > { %v1058_v18 = vadd.f32 %v1002_v60, %v732_v58  ;;  %v1309_v28 = vpop.f32.mrf.mxu3  ;;  %v2305_v58 = vld [vmem:[%s5292_s20 + $0x6d] sm:$0xff] }
 0x1ba   : > { %v734_v23 = vpop.f32.mrf.mxu1 }
 0x1bb   : > { %v1365_v47 = vadd.f32 %v1309_v28, %v1058_v18  ;;  %v1619_v46 = vpop.f32.mrf.mxu0  ;;  %v735_v1 = vadd.f32 %v734_v23, %v5442_v10  ;;  %v2612_v18 = vld [vmem:[%s5292_s20 + $0x6e] sm:$0xff] }
 0x1bd   : > { %v5837_v4 = vadd.f32 %v1616_v39, %v1365_v47  ;;  %4903 = vmatmul.msk.f32.gmra.mxu1 %vm294_vm0, %v1994_v12  ;;  %4940 = vmatmul.msk.f32.gmra.mxu2 %vm294_vm0, %v1996_v49  ;;  %v2611_v12 = vld [vmem:[%s5292_s20 + $0x66] sm:$0xff] }
 0x1be   : > { %4977 = vmatmul.msk.f32.gmra.mxu3 %vm294_vm0, %v2303_v44  ;;  %5014 = vmatmul.msk.f32.gmra.mxu0 %vm294_vm0, %v2610_v50  ;;  %v1998_v39 = vld [vmem:[%s5292_s20 + $0x6c] sm:$0xff]  ;;  %v2946_v44 = vlaneseq  ;;  %v5865_v50 = vld [vmem:[%s5292_s20 + $0x74] sm:$0xff] }
 0x1bf   : > { %7221 = vst [vmem:[#allocation11_spill] sm:$0xff] %v5837_v4 }
 0x1c0   : > { %v1005_v9 = vpop.f32.mrf.mxu2 }
 0x1c1   : > { %v1059_v14 = vadd.f32 %v1005_v9, %v735_v1  ;;  %v1312_v35 = vpop.f32.mrf.mxu3  ;;  %v2306_v9 = vld [vmem:[%s5292_s20 + $0x75] sm:$0xff] }
 0x1c2   : > { %v737_v30 = vpop.f32.mrf.mxu1 }
 0x1c3   : > { %v1366_v5 = vadd.f32 %v1312_v35, %v1059_v14  ;;  %v1622_v11 = vpop.f32.mrf.mxu0  ;;  %v738_v10 = vadd.f32 %v737_v30, %v5457_v17  ;;  %v2613_v35 = vld [vmem:[%s5292_s20 + $0x76] sm:$0xff] }
 0x1c5   : > { %v5847_v27 = vadd.f32 %v1619_v46, %v1366_v5  ;;  %4904 = vmatmul.msk.f32.gmra.mxu1 %vm294_vm0, %v1995_v42  ;;  %4941 = vmatmul.msk.f32.gmra.mxu2 %vm294_vm0, %v1997_v56 }
 0x1c6   : > { %4978 = vmatmul.msk.f32.gmra.mxu3 %vm294_vm0, %v2304_v51  ;;  %5015 = vmatmul.msk.f32.gmra.mxu0 %vm294_vm0, %v2611_v12 }
 0x1c7   : > { %7222 = vst [vmem:[#allocation12_spill] sm:$0xff] %v5847_v27 }
 0x1c8   : > { %v1008_v16 = vpop.f32.mrf.mxu2 }
 0x1c9   : > { %v1060_v34 = vadd.f32 %v1008_v16, %v738_v10  ;;  %v1315_v22 = vpop.f32.mrf.mxu3 }
 0x1ca   : > { %v740_v37 = vpop.f32.mrf.mxu1 }
 0x1cb   : > { %v1367_v21 = vadd.f32 %v1315_v22, %v1060_v34  ;;  %v1625_v60 = vpop.f32.mrf.mxu0  ;;  %v741_v17 = vadd.f32 %v740_v37, %v5472_v24 }
 0x1cd   : > { %v5857_v42 = vadd.f32 %v1622_v11, %v1367_v21  ;;  %4905 = vmatmul.msk.f32.gmra.mxu1 %vm294_vm0, %v1996_v49  ;;  %4942 = vmatmul.msk.f32.gmra.mxu2 %vm294_vm0, %v1998_v39  ;;  %v5869_v49 = vshrl.u32 %v2946_v44, 7  ;;  %v5882_v21 = vld [vmem:[%s5292_s20 + $0x7c] sm:$0xff] }
 0x1ce   : > { %4979 = vmatmul.msk.f32.gmra.mxu3 %vm294_vm0, %v2305_v58  ;;  %5016 = vmatmul.msk.f32.gmra.mxu0 %vm294_vm0, %v2612_v18 }
 0x1cf   : > { %7223 = vst [vmem:[#allocation13_spill] sm:$0xff] %v5857_v42  ;;  %v2986_v24 = vand.u32 65535, %v5869_v49  ;;  %v2987_v51 = vshrl.u32 %v5869_v49, 16 }
 0x1d0   : > { %v1011_v28 = vpop.f32.mrf.mxu2 }
 0x1d1   : > { %v1061_v23 = vadd.f32 %v1011_v28, %v741_v17  ;;  %v1318_v47 = vpop.f32.mrf.mxu3  ;;  %v2990_v11 = vmul.u32 58254, %v2986_v24  ;;  %v2991_v34 = vmul.u32 14564, %v2987_v51  ;;  %v2614_v17 = vld [vmem:[%s5292_s20 + $0x7e] sm:$0xff]  ;;  %v2992_v28 = vmul.u32 58254, %v2987_v51 }
 0x1d2   : > { %v743_v46 = vpop.f32.mrf.mxu1 }
 0x1d3   : > { %v1368_v1 = vadd.f32 %v1318_v47, %v1061_v23  ;;  %v1628_v14 = vpop.f32.mrf.mxu0  ;;  %v744_v5 = vadd.f32 %v743_v46, %v5487_v31  ;;  %v2993_v22 = vshll.u32 %v2990_v11, 16  ;;  %v2995_v23 = vshll.u32 %v2991_v34, 16 }
 0x1d4   : > { %v5887_v47 = vadd.s32 8, %v5869_v49  ;;  %v7214_v46 = vmov 0  }
 0x1d5   : > { %v5871_v30 = vadd.f32 %v1625_v60, %v1368_v1  ;;  %4906 = vmatmul.msk.f32.gmra.mxu1 %vm294_vm0, %v1997_v56  ;;  %4943 = vmatmul.msk.f32.gmra.mxu2 %vm294_vm0, %v5865_v50  ;;  %v2989_v56 = vmul.u32 14564, %v2986_v24  ;;  %v2307_v60 = vld [vmem:[%s5292_s20 + $0x7d] sm:$0xff]  ;;  %v2994_v24 = vshrl.u32 %v2990_v11, 16 }
 0x1d6   : > { %4980 = vmatmul.msk.f32.gmra.mxu3 %vm294_vm0, %v2306_v9  ;;  %5017 = vmatmul.msk.f32.gmra.mxu0 %vm294_vm0, %v2613_v35  ;;  %v3015_v35 = vand.u32 65535, %v5887_v47 }
 0x1d7   : > { %7224 = vst [vmem:[#allocation14_spill] sm:$0xff] %v5871_v30  ;;  %vm2997_vm1 = vc.u32 %v2989_v56, %v2993_v22  ;;  %v2999_v31 = vadd.s32 %v2993_v22, %v2989_v56 }
 0x1d8   : > { %v1014_v12 = vpop.f32.mrf.mxu2  ;;  %v2998_v1 = vsel %vm2997_vm1, 1, %v7214_v46  ;;  %v3018_v22 = vmul.u32 14564, %v3015_v35 }
 0x1d9   : > { %v1062_v10 = vadd.f32 %v1014_v12, %v744_v5  ;;  %v1321_v16 = vpop.f32.mrf.mxu3  ;;  %v3000_v9 = vadd.s32 %v2998_v1, %v2992_v28  ;;  %vm3001_vm2 = vc.u32 %v2999_v31, %v2995_v23  ;;  %v3016_v5 = vshrl.u32 %v5887_v47, 16  ;;  %v2615_v1 = vld [vmem:[%s5292_s20 + $0x86] sm:$0xff] }
 0x1da   : > { %v746_v37 = vpop.f32.mrf.mxu1  ;;  %v2996_v28 = vshrl.u32 %v2991_v34, 16  ;;  %v7227_v34 = vmov 0  }
 0x1db   : > { %v1369_v58 = vadd.f32 %v1321_v16, %v1062_v10  ;;  %v1631_v18 = vpop.f32.mrf.mxu0  ;;  %v3019_v10 = vmul.u32 58254, %v3015_v35 }
 0x1dd   : > { %v5889_v44 = vadd.f32 %v1628_v14, %v1369_v58  ;;  %4907 = vmatmul.msk.f32.gmra.mxu1 %vm294_vm0, %v1998_v39  ;;  %4944 = vmatmul.msk.f32.gmra.mxu2 %vm294_vm0, %v5882_v21  ;;  %v747_v14 = vadd.f32 %v746_v37, %v5502_v38  ;;  %v3002_v39 = vsel %vm3001_vm2, 1, %v7214_v46  ;;  %v3020_v58 = vmul.u32 14564, %v3016_v5  ;;  %v2308_v37 = vld [vmem:[%s5292_s20 + $0x85] sm:$0xff] }
 0x1de   : > { %4981 = vmatmul.msk.f32.gmra.mxu3 %vm294_vm0, %v2307_v60  ;;  %5018 = vmatmul.msk.f32.gmra.mxu0 %vm294_vm0, %v2614_v17  ;;  %v3004_v12 = vadd.s32 %v3002_v39, %v3000_v9  ;;  %v5902_v17 = vld [vmem:[%s5292_s20 + $0x84] sm:$0xff]  ;;  %v3022_v38 = vshll.u32 %v3019_v10, 16  ;;  %v3021_v46 = vmul.u32 58254, %v3016_v5  ;;  %v5907_v9 = vadd.s32 16, %v5869_v49 }
 0x1df   : > { %7225 = vst [vmem:[#allocation15_spill] sm:$0xff] %v5889_v44  ;;  %v3024_v44 = vshll.u32 %v3020_v58, 16 }
 0x1e0   : > { %v1017_v51 = vpop.f32.mrf.mxu2  ;;  %v3005_v23 = vadd.s32 %v3004_v12, %v2994_v24  ;;  %vm3026_vm3 = vc.u32 %v3018_v22, %v3022_v38  ;;  %v3028_v30 = vadd.s32 %v3022_v38, %v3018_v22  ;;  %v3044_v5 = vand.u32 65535, %v5907_v9 }
 0x1e1   : > { %v1063_v16 = vadd.f32 %v1017_v51, %v747_v14  ;;  %v1324_v56 = vpop.f32.mrf.mxu3  ;;  %v3027_v35 = vsel %vm3026_vm3, 1, %v7227_v34  ;;  %v3023_v51 = vshrl.u32 %v3019_v10, 16  ;;  %v3045_v12 = vshrl.u32 %v5907_v9, 16 }
 0x1e2   : > { %v749_v60 = vpop.f32.mrf.mxu1  ;;  %v3006_v24 = vadd.s32 %v3005_v23, %v2996_v28  ;;  %v3029_v39 = vadd.s32 %v3027_v35, %v3021_v46  ;;  %vm3030_vm4 = vc.u32 %v3028_v30, %v3024_v44  ;;  %v3048_v22 = vmul.u32 58254, %v3044_v5  ;;  %v5923_v44 = vld [vmem:[%s5292_s20 + $0x8c] sm:$0xff] }
 0x1e3   : > { %v1370_v11 = vadd.f32 %v1324_v56, %v1063_v16  ;;  %v1634_v31 = vpop.f32.mrf.mxu0  ;;  %v3025_v28 = vshrl.u32 %v3020_v58, 16  ;;  %v3047_v46 = vmul.u32 14564, %v3044_v5  ;;  %v3049_v23 = vmul.u32 14564, %v3045_v12 }
 0x1e4   : > { %v3051_v10 = vshll.u32 %v3048_v22, 16  ;;  %v3050_v42 = vmul.u32 58254, %v3045_v12 }
 0x1e5   : > { %v5909_v14 = vadd.f32 %v1631_v18, %v1370_v11  ;;  %4908 = vmatmul.msk.f32.gmra.mxu1 %vm294_vm0, %v5865_v50  ;;  %4945 = vmatmul.msk.f32.gmra.mxu2 %vm294_vm0, %v5902_v17  ;;  %v750_v18 = vadd.f32 %v749_v60, %v5517_v45  ;;  %v3031_v50 = vsel %vm3030_vm4, 1, %v7227_v34  ;;  %v3053_v27 = vshll.u32 %v3049_v23, 16 }
 0x1e6   : > { %4982 = vmatmul.msk.f32.gmra.mxu3 %vm294_vm0, %v2308_v37  ;;  %5019 = vmatmul.msk.f32.gmra.mxu0 %vm294_vm0, %v2615_v1  ;;  %v3033_v56 = vadd.s32 %v3031_v50, %v3029_v39  ;;  %v3007_v37 = vshrl.u32 %v3006_v24, 4  ;;  %v2309_v1 = vld [vmem:[%s5292_s20 + $0x8d] sm:$0xff]  ;;  %vm3055_vm5 = vc.u32 %v3047_v46, %v3051_v10  ;;  %v3057_v58 = vadd.s32 %v3051_v10, %v3047_v46 }
 0x1e7   : > { %7226 = vst [vmem:[#allocation16_spill] sm:$0xff] %v5909_v14  ;;  %v2616_v14 = vld [vmem:[%s5292_s20 + $0x8e] sm:$0xff]  ;;  %v5934_v24 = vadd.s32 24, %v5869_v49 }
 0x1e8   : > { %v1020_v16 = vpop.f32.mrf.mxu2  ;;  %v3034_v45 = vadd.s32 %v3033_v56, %v3023_v51  ;;  %vm3059_vm6 = vc.u32 %v3057_v58, %v3053_v27 }
 0x1e9   : > { %v1064_v38 = vadd.f32 %v1020_v16, %v750_v18  ;;  %v1327_v11 = vpop.f32.mrf.mxu3  ;;  %v3056_v18 = vsel %vm3055_vm5, 1, %v7227_v34  ;;  %v3060_v16 = vsel %vm3059_vm6, 1, %v7227_v34  ;;  %v3073_v56 = vand.u32 65535, %v5934_v24 }
 0x1ea   : > { %v752_v30 = vpop.f32.mrf.mxu1  ;;  %v3035_v4 = vadd.s32 %v3034_v45, %v3025_v28  ;;  %v3058_v50 = vadd.s32 %v3056_v18, %v3050_v42  ;;  %v2310_v45 = vld [vmem:[%s5292_s20 + $0x95] sm:$0xff] }
 0x1eb   : > { %v1371_v60 = vadd.f32 %v1327_v11, %v1064_v38  ;;  %v1637_v35 = vpop.f32.mrf.mxu0  ;;  %v753_v5 = vadd.f32 %v752_v30, %v5532_v52  ;;  %v3074_v52 = vshrl.u32 %v5934_v24, 16  ;;  %v5944_v30 = vld [vmem:[%s5292_s20 + $0x94] sm:$0xff]  ;;  %v3076_v27 = vmul.u32 14564, %v3073_v56 }
 0x1ec   : > { %v3036_v51 = vshrl.u32 %v3035_v4, 4  ;;  %v3062_v28 = vadd.s32 %v3060_v16, %v3058_v50  ;;  %v3077_v42 = vmul.u32 58254, %v3073_v56  ;;  %v5958_v50 = vadd.s32 32, %v5869_v49 }
 0x1ed   : > { %v5927_v39 = vadd.f32 %v1634_v31, %v1371_v60  ;;  %4909 = vmatmul.msk.f32.gmra.mxu1 %vm294_vm0, %v5882_v21  ;;  %4946 = vmatmul.msk.f32.gmra.mxu2 %vm294_vm0, %v5923_v44  ;;  %v3008_v31 = vmul.u32 18, %v3007_v37  ;;  %v3052_v21 = vshrl.u32 %v3048_v22, 16  ;;  %v3078_v22 = vmul.u32 14564, %v3074_v52  ;;  %v2617_v60 = vld [vmem:[%s5292_s20 + $0x96] sm:$0xff] }
 0x1ee   : > { %4983 = vmatmul.msk.f32.gmra.mxu3 %vm294_vm0, %v2309_v1  ;;  %5020 = vmatmul.msk.f32.gmra.mxu0 %vm294_vm0, %v2616_v14  ;;  %v3054_v14 = vshrl.u32 %v3049_v23, 16  ;;  %v3037_v1 = vmul.u32 18, %v3036_v51  ;;  %v3079_v18 = vmul.u32 58254, %v3074_v52 }
 0x1ef   : > { %7228 = vst [vmem:[#allocation17_spill] sm:$0xff] %v5927_v39  ;;  %v5947_v4 = vsub.s32 %v5869_v49, %v3008_v31  ;;  %v3063_v58 = vadd.s32 %v3062_v28, %v3052_v21  ;;  %v3082_v31 = vshll.u32 %v3078_v22, 16  ;;  %v3081_v21 = vshrl.u32 %v3077_v42, 16 }
 0x1f0   : > { %v1023_v12 = vpop.f32.mrf.mxu2 }
 0x1f1   : > { %v1065_v38 = vadd.f32 %v1023_v12, %v753_v5  ;;  %v1330_v11 = vpop.f32.mrf.mxu3  ;;  %v3080_v5 = vshll.u32 %v3077_v42, 16  ;;  %v3064_v23 = vadd.s32 %v3063_v58, %v3054_v14  ;;  %vm4027_vm7 = vcmp.ne.s32.totalorder %v5947_v4, 0 }
 0x1f2   : > { %v755_v46 = vpop.f32.mrf.mxu1  ;;  %vm4063_vm10 = vcmp.lt.s32.totalorder %v5947_v4, 0 }
 0x1f3   : > { %v1372_v37 = vadd.f32 %v1330_v11, %v1065_v38  ;;  %v1640_v10 = vpop.f32.mrf.mxu0  ;;  %vm3084_vm8 = vc.u32 %v3076_v27, %v3080_v5  ;;  %v756_v51 = vadd.f32 %v755_v46, %v5547_v59  ;;  %v3102_v38 = vand.u32 65535, %v5958_v50  ;;  %v5972_v46 = vld [vmem:[%s5292_s20 + $0x9c] sm:$0xff]  ;;  %vm6007_vm14 = vmand %vm4063_vm10, %vm4027_vm7 }
 0x1f4   : > { %v3085_v16 = vsel %vm3084_vm8, 1, %v7227_v34  ;;  %v3103_v11 = vshrl.u32 %v5958_v50, 16 }
 0x1f5   : > { %v5951_v12 = vadd.f32 %v1637_v35, %v1372_v37  ;;  %4910 = vmatmul.msk.f32.gmra.mxu1 %vm294_vm0, %v5902_v17  ;;  %4947 = vmatmul.msk.f32.gmra.mxu2 %vm294_vm0, %v5944_v30  ;;  %v3086_v35 = vadd.s32 %v3080_v5, %v3076_v27  ;;  %v5965_v17 = vsub.s32 %v5887_v47, %v3037_v1  ;;  %v3065_v27 = vshrl.u32 %v3064_v23, 4 }
 0x1f6   : > { %4984 = vmatmul.msk.f32.gmra.mxu3 %vm294_vm0, %v2310_v45  ;;  %5021 = vmatmul.msk.f32.gmra.mxu0 %vm294_vm0, %v2617_v60  ;;  %v3087_v52 = vadd.s32 %v3085_v16, %v3079_v18  ;;  %v3083_v37 = vshrl.u32 %v3078_v22, 16  ;;  %v3105_v45 = vmul.u32 14564, %v3102_v38  ;;  %v3106_v60 = vmul.u32 58254, %v3102_v38  ;;  %v2311_v18 = vld [vmem:[%s5292_s20 + $0x9d] sm:$0xff] }
 0x1f7   : > { %7229 = vst [vmem:[#allocation18_spill] sm:$0xff] %v5951_v12  ;;  %vm3088_vm9 = vc.u32 %v3086_v35, %v3082_v31  ;;  %v5974_v1 = vmul.u32 14564, %v3103_v11  ;;  %v2618_v31 = vld [vmem:[%s5292_s20 + $0x9e] sm:$0xff]  ;;  %v5980_v35 = vadd.s32 18, %v5947_v4  ;;  %v3108_v22 = vmul.u32 58254, %v3103_v11  ;;  %v2619_v12 = vld [vmem:[%s5292_s20 + $0xa6] sm:$0xff] }
 0x1f8   : > { %v1026_v56 = vpop.f32.mrf.mxu2  ;;  %v3089_v59 = vsel %vm3088_vm9, 1, %v7227_v34  ;;  %vm4028_vm11 = vcmp.ne.s32.totalorder %v5965_v17, 0  ;;  %vm4064_vm12 = vcmp.lt.s32.totalorder %v5965_v17, 0  ;;  %v3066_v38 = vmul.u32 18, %v3065_v27 }
 0x1f9   : > { %v1066_v14 = vadd.f32 %v1026_v56, %v756_v51  ;;  %v1333_v28 = vpop.f32.mrf.mxu3  ;;  %v3091_v42 = vadd.s32 %v3089_v59, %v3087_v52  ;;  %v3109_v51 = vshll.u32 %v3106_v60, 16  ;;  %v3111_v16 = vshll.u32 %v5974_v1, 16  ;;  %vm6015_vm1 = vmand %vm4064_vm12, %vm4028_vm11 }
 0x1fa   : > { %v758_v47 = vpop.f32.mrf.mxu1  ;;  %v5984_v56 = vadd.s32 40, %v5869_v49 }
 0x1fb   : > { %v1373_v58 = vadd.f32 %v1333_v28, %v1066_v14  ;;  %v1643_v5 = vpop.f32.mrf.mxu0  ;;  %v3092_v23 = vadd.s32 %v3091_v42, %v3081_v21  ;;  %vm3113_vm13 = vc.u32 %v3105_v45, %v3109_v51  ;;  %v3115_v11 = vadd.s32 %v3109_v51, %v3105_v45  ;;  %v6025_v51 = vld [vmem:[%s5292_s20 + $0xa4] sm:$0xff] }
 0x1fc   : > { %v759_v14 = vadd.f32 %v758_v47, %v5562_v2  ;;  %v3114_v28 = vsel %vm3113_vm13, 1, %v7227_v34  ;;  %v3132_v59 = vshrl.u32 %v5984_v56, 16  ;;  %v3110_v45 = vshrl.u32 %v3106_v60, 16 }
 0x1fd   : > { %v5986_v52 = vadd.f32 %v1640_v10, %v1373_v58  ;;  %4911 = vmatmul.msk.f32.gmra.mxu1 %vm294_vm0, %v5923_v44  ;;  %4948 = vmatmul.msk.f32.gmra.mxu2 %vm294_vm0, %v5972_v46  ;;  %v3093_v21 = vadd.s32 %v3092_v23, %v3083_v37  ;;  %v3131_v10 = vand.u32 65535, %v5984_v56  ;;  %v5999_v44 = vadd.s32 18, %v5965_v17 }
 0x1fe   : > { %4985 = vmatmul.msk.f32.gmra.mxu3 %vm294_vm0, %v2311_v18  ;;  %5022 = vmatmul.msk.f32.gmra.mxu0 %vm294_vm0, %v2618_v31  ;;  %v3116_v2 = vadd.s32 %v3114_v28, %v3108_v22  ;;  %vm3117_vm15 = vc.u32 %v3115_v11, %v3111_v16  ;;  %v6020_v31 = vsub.s32 %v5907_v9, %v3066_v38  ;;  %v3112_v23 = vshrl.u32 %v5974_v1, 16 }
 0x1ff   : > { %7230 = vst [vmem:[#allocation19_spill] sm:$0xff] %v5986_v52  ;;  %v3094_v42 = vshrl.u32 %v3093_v21, 4  ;;  %v3118_v60 = vsel %vm3117_vm15, 1, %v7227_v34  ;;  %v6027_v11 = vmul.u32 58254, %v3131_v10  ;;  %v3134_v39 = vmul.u32 14564, %v3131_v10 }
 0x200   : > { %v1029_v27 = vpop.f32.mrf.mxu2  ;;  %v3120_v21 = vadd.s32 %v3118_v60, %v3116_v2  ;;  %v6034_v9 = vadd.s32 48, %v5869_v49  ;;  %v4171_v1 = vsel %vm6007_vm14, %v5980_v35, %v5947_v4  ;;  %v4172_v38 = vsel %vm6015_vm1, %v5999_v44, %v5965_v17  ;;  %v6072_v60 = vld [vmem:[%s5292_s20 + $0xac] sm:$0xff] }
 0x201   : > { %v1067_v47 = vadd.f32 %v1029_v27, %v759_v14  ;;  %v1336_v58 = vpop.f32.mrf.mxu3  ;;  %v3095_v16 = vmul.u32 18, %v3094_v42  ;;  %v6029_v14 = vmul.u32 14564, %v3132_v59  ;;  %v2312_v27 = vld [vmem:[%s5292_s20 + $0xa5] sm:$0xff]  ;;  %v3138_v2 = vshll.u32 %v6027_v11, 16 }
 0x202   : > { %v1845_v22 = vpop.f32.mrf.mxu1  ;;  %v3121_v42 = vadd.s32 %v3120_v21, %v3110_v45  ;;  %v3137_v4 = vmul.u32 58254, %v3132_v59  ;;  %v3160_v35 = vand.u32 65535, %v6034_v9  ;;  %vm4029_vm2 = vcmp.ne.s32.totalorder %v6020_v31, 0 }
 0x203   : > { %v1374_v28 = vadd.f32 %v1336_v58, %v1067_v47  ;;  %v2766_v52 = vpop.f32.mrf.mxu0  ;;  %v6052_v10 = vsub.s32 %v5934_v24, %v3095_v16  ;;  %vm4065_vm3 = vcmp.lt.s32.totalorder %v6020_v31, 0  ;;  %vm3142_vm4 = vc.u32 %v3134_v39, %v3138_v2 }
 0x204   : > { %v3122_v17 = vadd.s32 %v3121_v42, %v3112_v23  ;;  %v3144_v24 = vadd.s32 %v3138_v2, %v3134_v39  ;;  %v3161_v44 = vshrl.u32 %v6034_v9, 16  ;;  %v6064_v37 = vadd.s32 18, %v6020_v31  ;;  %v2620_v2 = vld [vmem:[%s5292_s20 + $0xae] sm:$0xff]  ;;  %vm6092_vm8 = vmand %vm4065_vm3, %vm4029_vm2 }
 0x205   : > { %v6045_v47 = vadd.f32 %v1643_v5, %v1374_v28  ;;  %4912 = vmatmul.msk.f32.gmra.mxu1 %vm294_vm0, %v5944_v30  ;;  %4949 = vmatmul.msk.f32.gmra.mxu2 %vm294_vm0, %v6025_v51  ;;  %v3140_v30 = vshll.u32 %v6029_v14, 16  ;;  %v1953_v5 = vadd.f32 %v1845_v22, %v5575_v36  ;;  %v3143_v45 = vsel %vm3142_vm4, 1, %v7227_v34 }
 0x206   : > { %4986 = vmatmul.msk.f32.gmra.mxu3 %vm294_vm0, %v2312_v27  ;;  %5023 = vmatmul.msk.f32.gmra.mxu0 %vm294_vm0, %v2619_v12  ;;  %v3123_v12 = vshrl.u32 %v3122_v17, 4  ;;  %v6067_v58 = vmul.u32 58254, %v3160_v35  ;;  %vm4030_vm5 = vcmp.ne.s32.totalorder %v6052_v10, 0  ;;  %vm4066_vm6 = vcmp.lt.s32.totalorder %v6052_v10, 0  ;;  %v2313_v27 = vld [vmem:[%s5292_s20 + $0xad] sm:$0xff] }
 0x207   : > { %7235 = vst [vmem:[#allocation20_spill] sm:$0xff] %v6045_v47  ;;  %v3145_v36 = vadd.s32 %v3143_v45, %v3137_v4  ;;  %v3139_v16 = vshrl.u32 %v6027_v11, 16  ;;  %vm3146_vm7 = vc.u32 %v3144_v24, %v3140_v30  ;;  %v6075_v21 = vmul.u32 14564, %v3161_v44  ;;  %vm6113_vm10 = vmand %vm4066_vm6, %vm4030_vm5 }
 0x208   : > { %v2152_v59 = vpop.f32.mrf.mxu2  ;;  %v3124_v22 = vmul.u32 18, %v3123_v12  ;;  %v6080_v17 = vadd.s32 18, %v6052_v10  ;;  %v3141_v30 = vshrl.u32 %v6029_v14, 16  ;;  %v3167_v24 = vshll.u32 %v6067_v58, 16 }
 0x209   : > { %v2260_v18 = vadd.f32 %v2152_v59, %v1953_v5  ;;  %v2459_v23 = vpop.f32.mrf.mxu3  ;;  %v3147_v5 = vsel %vm3146_vm7, 1, %v7227_v34  ;;  %v3163_v59 = vmul.u32 14564, %v3160_v35  ;;  %vm6101_vm9 = vcmp.lt.s32.totalorder %v4171_v1, 16 }
 0x20a   : > { %v1848_v39 = vpop.f32.mrf.mxu1  ;;  %v6097_v4 = vsub.s32 %v5958_v50, %v3124_v22  ;;  %v3149_v35 = vadd.s32 %v3147_v5, %v3145_v36  ;;  %vm6118_vm11 = vcmp.lt.s32.totalorder %v4172_v38, 16  ;;  %v3166_v14 = vmul.u32 58254, %v3161_v44 }
 0x20b   : > { %v2567_v28 = vadd.f32 %v2459_v23, %v2260_v18  ;;  %v2769_v42 = vpop.f32.mrf.mxu0  ;;  %v3169_v1 = vshll.u32 %v6075_v21, 16  ;;  %v1954_v18 = vadd.f32 %v1848_v39, %v5585_v61  ;;  %vm3171_vm12 = vc.u32 %v3163_v59, %v3167_v24 }
 0x20c   : > { %v3173_v23 = vadd.s32 %v3167_v24, %v3163_v59  ;;  %v6128_v36 = vadd.s32 56, %v5869_v49  ;;  %v4173_v22 = vsel %vm6092_vm8, %v6064_v37, %v6020_v31  ;;  %vm4031_vm13 = vcmp.ne.s32.totalorder %v6097_v4, 0  ;;  %v6144_v37 = vld [vmem:[%s5292_s20 + $0xb4] sm:$0xff] }
 0x20d   : > { %v2874_v12 = vadd.f32 %v2766_v52, %v2567_v28  ;;  %4913 = vmatmul.msk.f32.gmra.mxu1 %vm294_vm0, %v5972_v46  ;;  %4950 = vmatmul.msk.f32.gmra.mxu2 %vm294_vm0, %v6072_v60  ;;  %v3150_v46 = vadd.s32 %v3149_v35, %v3139_v16  ;;  %vm4067_vm14 = vcmp.lt.s32.totalorder %v6097_v4, 0  ;;  %v3168_v5 = vshrl.u32 %v6067_v58, 16  ;;  %v2314_v35 = vld [vmem:[%s5292_s20 + $0xb5] sm:$0xff] }
 0x20e   : > { %4987 = vmatmul.msk.f32.gmra.mxu3 %vm294_vm0, %v2313_v27  ;;  %5024 = vmatmul.msk.f32.gmra.mxu0 %vm294_vm0, %v2620_v2  ;;  %v3172_v27 = vsel %vm3171_vm12, 1, %v7227_v34  ;;  %vm3175_vm15 = vc.u32 %v3173_v23, %v3169_v1  ;;  %v2621_v24 = vld [vmem:[%s5292_s20 + $0xb6] sm:$0xff]  ;;  %vm6154_vm1 = vcmp.lt.s32.totalorder %v4173_v22, 16  ;;  %vm6168_vm2 = vmand %vm4067_vm14, %vm4031_vm13 }
 0x20f   : > { %2910 = vst.msk [vmem:[%s6086_s10] sm:$0xff] %vm294_vm0, %v2874_v12  ;;  %v3151_v44 = vadd.s32 %v3150_v46, %v3141_v30  ;;  %v4315_v39 = vsel %vm6101_vm9, %v2874_v12, 0.0  ;;  %v3174_v59 = vadd.s32 %v3172_v27, %v3166_v14  ;;  %v6150_v12 = vadd.s32 18, %v6097_v4 }
 0x210   : > { %v2155_v38 = vpop.f32.mrf.mxu2  ;;  %v3176_v45 = vsel %vm3175_vm15, 1, %v7227_v34  ;;  %v3189_v46 = vand.u32 65535, %v6128_v36  ;;  %v3190_v14 = vshrl.u32 %v6128_v36, 16  ;;  %v4351_v1 = vsel %vm294_vm0, %v4315_v39, 0.0 }
 0x211   : > { %v2261_v16 = vadd.f32 %v2155_v38, %v1954_v18  ;;  %v2462_v28 = vpop.f32.mrf.mxu3  ;;  %v3152_v2 = vshrl.u32 %v3151_v44, 4  ;;  %v4429_v18 = vmul.f32 %v4315_v39, %v4315_v39  ;;  %v3178_v58 = vadd.s32 %v3176_v45, %v3174_v59 }
 0x212   : > { %v1851_v31 = vpop.f32.mrf.mxu1  ;;  %v6177_v39 = vmul.u32 14564, %v3190_v14  ;;  %v6180_v27 = vadd.s32 64, %v5869_v49 }
 0x213   : > { %v2568_v11 = vadd.f32 %v2462_v28, %v2261_v16  ;;  %v2772_v30 = vpop.f32.mrf.mxu0  ;;  %v3153_v44 = vmul.u32 18, %v3152_v2  ;;  %v3170_v16 = vshrl.u32 %v6075_v21, 16  ;;  %v6173_v28 = vmul.u32 58254, %v3189_v46 }
 0x214   : > { %v1955_v2 = vadd.f32 %v1851_v31, %v5595_v20  ;;  %v3218_v61 = vand.u32 65535, %v6180_v27  ;;  %v3219_v50 = vshrl.u32 %v6180_v27, 16 }
 0x215   : > { %v2875_v23 = vadd.f32 %v2769_v42, %v2568_v11  ;;  %4914 = vmatmul.msk.f32.gmra.mxu1 %vm294_vm0, %v6025_v51  ;;  %4951 = vmatmul.msk.f32.gmra.mxu2 %vm294_vm0, %v6144_v37  ;;  %v3179_v51 = vadd.s32 %v3178_v58, %v3168_v5  ;;  %v3192_v42 = vmul.u32 14564, %v3189_v46  ;;  %v6188_v59 = vsub.s32 %v5984_v56, %v3153_v44 }
 0x216   : > { %4988 = vmatmul.msk.f32.gmra.mxu3 %vm294_vm0, %v2314_v35  ;;  %5025 = vmatmul.msk.f32.gmra.mxu0 %vm294_vm0, %v2621_v24  ;;  %v3196_v11 = vshll.u32 %v6173_v28, 16  ;;  %v4465_v5 = vsel %vm294_vm0, %v4429_v18, 0.0  ;;  %v3195_v44 = vmul.u32 58254, %v3190_v14  ;;  %v6199_v18 = vld [vmem:[%s5292_s20 + $0xbc] sm:$0xff]  ;;  %v7248_v14 = vsel %vm6113_vm10, %v6080_v17, %v6052_v10 }
 0x217   : > { %2911 = vst.msk [vmem:[%s6086_s10 + $0x8] sm:$0xff] %vm294_vm0, %v2875_v23  ;;  %v4316_v21 = vsel %vm6118_vm11, %v2875_v23, 0.0  ;;  %v3180_v56 = vadd.s32 %v3179_v51, %v3170_v16  ;;  %vm4032_vm4 = vcmp.ne.s32.totalorder %v6188_v59, 0  ;;  %vm6212_vm5 = vcmp.lt.s32.totalorder %v7248_v14, 16  ;;  %v6254_v14 = vld [vmem:[%s5292_s20 + $0xc4] sm:$0xff] }
 0x218   : > { %v4352_v35 = vsel %vm294_vm0, %v4316_v21, 0.0  ;;  %v4430_v24 = vmul.f32 %v4316_v21, %v4316_v21  ;;  %v2158_v45 = vpop.f32.mrf.mxu2  ;;  %v3198_v21 = vshll.u32 %v6177_v39, 16  ;;  %vm3200_vm3 = vc.u32 %v3192_v42, %v3196_v11 }
 0x219   : > { %v4353_v52 = vadd.f32 %v4352_v35, %v4351_v1  ;;  %v2262_v31 = vadd.f32 %v2158_v45, %v1955_v2  ;;  %v2465_v46 = vpop.f32.mrf.mxu3  ;;  %v3197_v1 = vshrl.u32 %v6173_v28, 16  ;;  %vm4068_vm6 = vcmp.lt.s32.totalorder %v6188_v59, 0 }
 0x21a   : > { %v4466_v58 = vsel %vm294_vm0, %v4430_v24, 0.0  ;;  %v1854_v23 = vpop.f32.mrf.mxu1  ;;  %v3181_v51 = vshrl.u32 %v3180_v56, 4  ;;  %v3201_v2 = vsel %vm3200_vm3, 1, %v7227_v34  ;;  %v6223_v10 = vadd.s32 18, %v6188_v59  ;;  %vm6239_vm8 = vmand %vm4068_vm6, %vm4032_vm4 }
 0x21b   : > { %v4467_v47 = vadd.f32 %v4466_v58, %v4465_v5  ;;  %v2569_v63 = vadd.f32 %v2465_v46, %v2262_v31  ;;  %v2775_v20 = vpop.f32.mrf.mxu0  ;;  %v3202_v5 = vadd.s32 %v3196_v11, %v3192_v42  ;;  %v3203_v17 = vadd.s32 %v3201_v2, %v3195_v44 }
 0x21c   : > { %v1956_v28 = vadd.f32 %v1854_v23, %v5605_v43  ;;  %v3182_v42 = vmul.u32 18, %v3181_v51  ;;  %v3199_v58 = vshrl.u32 %v6177_v39, 16  ;;  %v3224_v51 = vmul.u32 58254, %v3219_v50 }
 0x21d   : > { %v2876_v35 = vadd.f32 %v2772_v30, %v2569_v63  ;;  %4915 = vmatmul.msk.f32.gmra.mxu1 %vm294_vm0, %v6072_v60  ;;  %4952 = vmatmul.msk.f32.gmra.mxu2 %vm294_vm0, %v6199_v18  ;;  %vm3204_vm7 = vc.u32 %v3202_v5, %v3198_v21  ;;  %v6229_v63 = vmul.u32 58254, %v3218_v61  ;;  %v6261_v2 = vadd.s32 72, %v5869_v49 }
 0x21e   : > { %4989 = vmatmul.msk.f32.gmra.mxu3 %vm294_vm0, %v2315_v53  ;;  %5026 = vmatmul.msk.f32.gmra.mxu0 %vm294_vm0, %v2622_v0  ;;  %v3205_v43 = vsel %vm3204_vm7, 1, %v7227_v34  ;;  %v3221_v0 = vmul.u32 14564, %v3218_v61  ;;  %v6244_v53 = vmul.u32 14564, %v3219_v50  ;;  %v6248_v38 = vsub.s32 %v6034_v9, %v3182_v42 }
 0x21f   : > { %2912 = vst.msk [vmem:[%s6086_s10 + $0x10] sm:$0xff] %vm294_vm0, %v2876_v35  ;;  %v4317_v60 = vsel %vm6154_vm1, %v2876_v35, 0.0  ;;  %v3207_v31 = vadd.s32 %v3205_v43, %v3203_v17  ;;  %v3225_v23 = vshll.u32 %v6229_v63, 16  ;;  %v4176_v9 = vsel %vm6239_vm8, %v6223_v10, %v6188_v59  ;;  %v2316_v35 = vld [vmem:[%s5292_s20 + $0xc5] sm:$0xff] }
 0x220   : > { %v4354_v11 = vsel %vm294_vm0, %v4317_v60, 0.0  ;;  %v4431_v24 = vmul.f32 %v4317_v60, %v4317_v60  ;;  %v2161_v45 = vpop.f32.mrf.mxu2  ;;  %v2623_v17 = vld [vmem:[%s5292_s20 + $0xc6] sm:$0xff]  ;;  %v3226_v42 = vshrl.u32 %v6229_v63, 16  ;;  %vm4033_vm9 = vcmp.ne.s32.totalorder %v6248_v38, 0 }
 0x221   : > { %v4355_v46 = vadd.f32 %v4354_v11, %v4353_v52  ;;  %v2263_v56 = vadd.f32 %v2161_v45, %v1956_v28  ;;  %v2468_v44 = vpop.f32.mrf.mxu3  ;;  %v3208_v28 = vadd.s32 %v3207_v31, %v3197_v1  ;;  %vm4069_vm10 = vcmp.lt.s32.totalorder %v6248_v38, 0 }
 0x222   : > { %v4468_v61 = vsel %vm294_vm0, %v4431_v24, 0.0  ;;  %v1857_v21 = vpop.f32.mrf.mxu1  ;;  %v3227_v60 = vshll.u32 %v6244_v53, 16  ;;  %vm3229_vm11 = vc.u32 %v3221_v0, %v3225_v23  ;;  %v3231_v50 = vadd.s32 %v3225_v23, %v3221_v0  ;;  %vm6292_vm13 = vmand %vm4069_vm10, %vm4033_vm9 }
 0x223   : > { %v4469_v52 = vadd.f32 %v4468_v61, %v4467_v47  ;;  %v2570_v5 = vadd.f32 %v2468_v44, %v2263_v56  ;;  %v2778_v39 = vpop.f32.mrf.mxu0  ;;  %v6274_v47 = vadd.s32 18, %v6248_v38  ;;  %v3209_v1 = vadd.s32 %v3208_v28, %v3199_v58 }
 0x224   : > { %v3230_v10 = vsel %vm3229_vm11, 1, %v7227_v34  ;;  %v3248_v30 = vshrl.u32 %v6261_v2, 16  ;;  %v3228_v24 = vshrl.u32 %v6244_v53, 16  ;;  %vm3233_vm12 = vc.u32 %v3231_v50, %v3227_v60  ;;  %v2624_v50 = vld [vmem:[%s5292_s20 + $0xce] sm:$0xff] }
 0x225   : > { %v2877_v59 = vadd.f32 %v2775_v20, %v2570_v5  ;;  %4916 = vmatmul.msk.f32.gmra.mxu1 %vm294_vm0, %v6144_v37  ;;  %4953 = vmatmul.msk.f32.gmra.mxu2 %vm294_vm0, %v6254_v14  ;;  %v3232_v63 = vadd.s32 %v3230_v10, %v3224_v51  ;;  %v3247_v20 = vand.u32 65535, %v6261_v2  ;;  %v1957_v37 = vadd.f32 %v1857_v21, %v5615_v3  ;;  %v6299_v51 = vld [vmem:[%s5292_s20 + $0xcc] sm:$0xff] }
 0x226   : > { %4990 = vmatmul.msk.f32.gmra.mxu3 %vm294_vm0, %v2316_v35  ;;  %5027 = vmatmul.msk.f32.gmra.mxu0 %vm294_vm0, %v2623_v17  ;;  %v3210_v11 = vshrl.u32 %v3209_v1, 4  ;;  %v3234_v23 = vsel %vm3233_vm12, 1, %v7227_v34  ;;  %v6303_v35 = vmul.u32 14564, %v3248_v30  ;;  %v7255_v60 = vsel %vm6168_vm2, %v6150_v12, %v6097_v4  ;;  %v2317_v1 = vld [vmem:[%s5292_s20 + $0xcd] sm:$0xff] }
 0x227   : > { %2913 = vst.msk [vmem:[%s6086_s10 + $0x18] sm:$0xff] %vm294_vm0, %v2877_v59  ;;  %v4318_v43 = vsel %vm6212_vm5, %v2877_v59, 0.0  ;;  %v3250_v56 = vmul.u32 14564, %v3247_v20  ;;  %v6301_v5 = vmul.u32 58254, %v3247_v20  ;;  %vm6310_vm14 = vcmp.lt.s32.totalorder %v7255_v60, 16  ;;  %v2625_v59 = vld [vmem:[%s5292_s20 + $0xd6] sm:$0xff] }
 0x228   : > { %v4356_v45 = vsel %vm294_vm0, %v4318_v43, 0.0  ;;  %v4432_v31 = vmul.f32 %v4318_v43, %v4318_v43  ;;  %v2164_v0 = vpop.f32.mrf.mxu2  ;;  %v3211_v53 = vmul.u32 18, %v3210_v11  ;;  %vm6319_vm15 = vcmp.lt.s32.totalorder %v4176_v9, 16 }
 0x229   : > { %v4357_v44 = vadd.f32 %v4356_v45, %v4355_v46  ;;  %v2264_v58 = vadd.f32 %v2164_v0, %v1957_v37  ;;  %v2471_v3 = vpop.f32.mrf.mxu3  ;;  %v3236_v46 = vadd.s32 %v3234_v23, %v3232_v63  ;;  %v4177_v22 = vsel %vm6292_vm13, %v6274_v47, %v6248_v38  ;;  %v6353_v23 = vld [vmem:[%s5292_s20 + $0xd4] sm:$0xff] }
 0x22a   : > { %v4470_v61 = vsel %vm294_vm0, %v4432_v31, 0.0  ;;  %v1860_v21 = vpop.f32.mrf.mxu1  ;;  %v6317_v63 = vsub.s32 %v6128_v36, %v3211_v53  ;;  %v3254_v12 = vshll.u32 %v6301_v5, 16  ;;  %v3253_v9 = vmul.u32 58254, %v3248_v30 }
 0x22b   : > { %v4471_v17 = vadd.f32 %v4470_v61, %v4469_v52  ;;  %v2571_v28 = vadd.f32 %v2471_v3, %v2264_v58  ;;  %v2781_v10 = vpop.f32.mrf.mxu0  ;;  %v3237_v4 = vadd.s32 %v3236_v46, %v3226_v42  ;;  %v6329_v52 = vadd.s32 80, %v5869_v49 }
 0x22c   : > { %v1958_v37 = vadd.f32 %v1860_v21, %v5625_v26  ;;  %v3255_v43 = vshrl.u32 %v6301_v5, 16  ;;  %vm4034_vm1 = vcmp.ne.s32.totalorder %v6317_v63, 0  ;;  %v3256_v42 = vshll.u32 %v6303_v35, 16 }
 0x22d   : > { %v2878_v36 = vadd.f32 %v2778_v39, %v2571_v28  ;;  %4917 = vmatmul.msk.f32.gmra.mxu1 %vm294_vm0, %v6199_v18  ;;  %4954 = vmatmul.msk.f32.gmra.mxu2 %vm294_vm0, %v6299_v51  ;;  %v3238_v38 = vadd.s32 %v3237_v4, %v3228_v24  ;;  %vm3258_vm2 = vc.u32 %v3250_v56, %v3254_v12  ;;  %vm4070_vm3 = vcmp.lt.s32.totalorder %v6317_v63, 0  ;;  %v2318_v28 = vld [vmem:[%s5292_s20 + $0xd5] sm:$0xff] }
 0x22e   : > { %4991 = vmatmul.msk.f32.gmra.mxu3 %vm294_vm0, %v2317_v1  ;;  %5028 = vmatmul.msk.f32.gmra.mxu0 %vm294_vm0, %v2624_v50  ;;  %v3259_v18 = vsel %vm3258_vm2, 1, %v7227_v34  ;;  %v3260_v39 = vadd.s32 %v3254_v12, %v3250_v56  ;;  %v6349_v24 = vadd.s32 18, %v6317_v63  ;;  %vm6359_vm5 = vmand %vm4070_vm3, %vm4034_vm1  ;;  %v3276_v21 = vand.u32 65535, %v6329_v52 }
 0x22f   : > { %2914 = vst.msk [vmem:[%s6086_s10 + $0x20] sm:$0xff] %vm294_vm0, %v2878_v36  ;;  %v4319_v26 = vsel %vm6310_vm14, %v2878_v36, 0.0  ;;  %v3239_v45 = vshrl.u32 %v3238_v38, 4  ;;  %v3261_v3 = vadd.s32 %v3259_v18, %v3253_v9  ;;  %v3257_v1 = vshrl.u32 %v6303_v35, 16 }
 0x230   : > { %v4358_v47 = vsel %vm294_vm0, %v4319_v26, 0.0  ;;  %v4433_v30 = vmul.f32 %v4319_v26, %v4319_v26  ;;  %v2167_v11 = vpop.f32.mrf.mxu2  ;;  %vm3262_vm4 = vc.u32 %v3260_v39, %v3256_v42  ;;  %vm6368_vm6 = vcmp.lt.s32.totalorder %v4177_v22, 16 }
 0x231   : > { %v4359_v31 = vadd.f32 %v4358_v47, %v4357_v44  ;;  %v2265_v0 = vadd.f32 %v2167_v11, %v1958_v37  ;;  %v2474_v58 = vpop.f32.mrf.mxu3  ;;  %v3240_v61 = vmul.u32 18, %v3239_v45  ;;  %v3263_v44 = vsel %vm3262_vm4, 1, %v7227_v34 }
 0x232   : > { %v4472_v16 = vsel %vm294_vm0, %v4433_v30, 0.0  ;;  %v1863_v53 = vpop.f32.mrf.mxu1  ;;  %v3265_v50 = vadd.s32 %v3263_v44, %v3261_v3  ;;  %v3277_v37 = vshrl.u32 %v6329_v52, 16  ;;  %v6376_v36 = vmul.u32 58254, %v3276_v21  ;;  %v6414_v3 = vld [vmem:[%s5292_s20 + $0xdc] sm:$0xff] }
 0x233   : > { %v4473_v46 = vadd.f32 %v4472_v16, %v4471_v17  ;;  %v2572_v5 = vadd.f32 %v2474_v58, %v2265_v0  ;;  %v2784_v60 = vpop.f32.mrf.mxu0  ;;  %v6373_v12 = vsub.s32 %v6180_v27, %v3240_v61  ;;  %v4178_v35 = vsel %vm6359_vm5, %v6349_v24, %v6317_v63 }
 0x234   : > { %v3266_v22 = vadd.s32 %v3265_v50, %v3255_v43  ;;  %v3279_v27 = vmul.u32 14564, %v3276_v21  ;;  %v1959_v9 = vadd.f32 %v1863_v53, %v5635_v48  ;;  %v3283_v42 = vshll.u32 %v6376_v36, 16  ;;  %v2626_v21 = vld [vmem:[%s5292_s20 + $0xde] sm:$0xff] }
 0x235   : > { %v2879_v17 = vadd.f32 %v2781_v10, %v2572_v5  ;;  %4918 = vmatmul.msk.f32.gmra.mxu1 %vm294_vm0, %v6254_v14  ;;  %4955 = vmatmul.msk.f32.gmra.mxu2 %vm294_vm0, %v6353_v23  ;;  %vm4035_vm7 = vcmp.ne.s32.totalorder %v6373_v12, 0  ;;  %vm4071_vm8 = vcmp.lt.s32.totalorder %v6373_v12, 0  ;;  %v6391_v14 = vadd.s32 18, %v6373_v12 }
 0x236   : > { %4992 = vmatmul.msk.f32.gmra.mxu3 %vm294_vm0, %v2318_v28  ;;  %5029 = vmatmul.msk.f32.gmra.mxu0 %vm294_vm0, %v2625_v59  ;;  %v6393_v10 = vmul.u32 14564, %v3277_v37  ;;  %vm6400_vm9 = vmand %vm4071_vm8, %vm4035_vm7  ;;  %v3267_v38 = vadd.s32 %v3266_v22, %v3257_v1  ;;  %v6407_v48 = vadd.s32 88, %v5869_v49  ;;  %v6410_v47 = vadd.s32 96, %v5869_v49 }
 0x237   : > { %2915 = vst.msk [vmem:[%s6086_s10 + $0x28] sm:$0xff] %vm294_vm0, %v2879_v17  ;;  %v4320_v63 = vsel %vm6319_vm15, %v2879_v17, 0.0  ;;  %v3282_v45 = vmul.u32 58254, %v3277_v37  ;;  %v4179_v16 = vsel %vm6400_vm9, %v6391_v14, %v6373_v12  ;;  %vm3287_vm10 = vc.u32 %v3279_v27, %v3283_v42 }
 0x238   : > { %v4360_v26 = vsel %vm294_vm0, %v4320_v63, 0.0  ;;  %v4434_v18 = vmul.f32 %v4320_v63, %v4320_v63  ;;  %v2170_v39 = vpop.f32.mrf.mxu2  ;;  %v3268_v24 = vshrl.u32 %v3267_v38, 4  ;;  %v3285_v53 = vshll.u32 %v6393_v10, 16 }
 0x239   : > { %v4361_v20 = vadd.f32 %v4360_v26, %v4359_v31  ;;  %v2266_v30 = vadd.f32 %v2170_v39, %v1959_v9  ;;  %v2477_v11 = vpop.f32.mrf.mxu3  ;;  %v2319_v31 = vld [vmem:[%s5292_s20 + $0xdd] sm:$0xff]  ;;  %v3284_v28 = vshrl.u32 %v6376_v36, 16  ;;  %vm6424_vm11 = vcmp.lt.s32.totalorder %v4178_v35, 16 }
 0x23a   : > { %v4474_v0 = vsel %vm294_vm0, %v4434_v18, 0.0  ;;  %v1866_v58 = vpop.f32.mrf.mxu1  ;;  %v3269_v5 = vmul.u32 18, %v3268_v24  ;;  %v3288_v1 = vsel %vm3287_vm10, 1, %v7227_v34  ;;  %v3289_v50 = vadd.s32 %v3283_v42, %v3279_v27 }
 0x23b   : > { %v4475_v56 = vadd.f32 %v4474_v0, %v4473_v46  ;;  %v2573_v61 = vadd.f32 %v2477_v11, %v2266_v30  ;;  %v2787_v44 = vpop.f32.mrf.mxu0  ;;  %v3305_v12 = vand.u32 65535, %v6407_v48  ;;  %v3306_v37 = vshrl.u32 %v6407_v48, 16  ;;  %v6464_v11 = vld [vmem:[%s5292_s20 + $0xe4] sm:$0xff] }
 0x23c   : > { %v6436_v36 = vsub.s32 %v6261_v2, %v3269_v5  ;;  %v3286_v17 = vshrl.u32 %v6393_v10, 16  ;;  %v3290_v35 = vadd.s32 %v3288_v1, %v3282_v45  ;;  %v1960_v22 = vadd.f32 %v1866_v58, %v5645_v8 }
 0x23d   : > { %v2880_v46 = vadd.f32 %v2784_v60, %v2573_v61  ;;  %4919 = vmatmul.msk.f32.gmra.mxu1 %vm294_vm0, %v6299_v51  ;;  %4956 = vmatmul.msk.f32.gmra.mxu2 %vm294_vm0, %v6414_v3  ;;  %vm3291_vm12 = vc.u32 %v3289_v50, %v3285_v53  ;;  %v3308_v60 = vmul.u32 14564, %v3305_v12  ;;  %v6442_v27 = vmul.u32 58254, %v3305_v12  ;;  %v2320_v53 = vld [vmem:[%s5292_s20 + $0xe5] sm:$0xff] }
 0x23e   : > { %4993 = vmatmul.msk.f32.gmra.mxu3 %vm294_vm0, %v2319_v31  ;;  %5030 = vmatmul.msk.f32.gmra.mxu0 %vm294_vm0, %v2626_v21  ;;  %vm4036_vm13 = vcmp.ne.s32.totalorder %v6436_v36, 0  ;;  %vm4072_vm14 = vcmp.lt.s32.totalorder %v6436_v36, 0  ;;  %v6451_v8 = vadd.s32 18, %v6436_v36  ;;  %v3292_v4 = vsel %vm3291_vm12, 1, %v7227_v34  ;;  %v2627_v31 = vld [vmem:[%s5292_s20 + $0xe6] sm:$0xff] }
 0x23f   : > { %2916 = vst.msk [vmem:[%s6086_s10 + $0x30] sm:$0xff] %vm294_vm0, %v2880_v46  ;;  %v4321_v51 = vsel %vm6368_vm6, %v2880_v46, 0.0  ;;  %vm6454_vm15 = vmand %vm4072_vm14, %vm4036_vm13  ;;  %v6459_v63 = vmul.u32 14564, %v3306_v37  ;;  %v3294_v26 = vadd.s32 %v3292_v4, %v3290_v35  ;;  %v3334_v18 = vand.u32 65535, %v6410_v47 }
 0x240   : > { %v4362_v2 = vsel %vm294_vm0, %v4321_v51, 0.0  ;;  %v4435_v14 = vmul.f32 %v4321_v51, %v4321_v51  ;;  %v2173_v10 = vpop.f32.mrf.mxu2  ;;  %v4180_v24 = vsel %vm6454_vm15, %v6451_v8, %v6436_v36  ;;  %v3311_v45 = vmul.u32 58254, %v3306_v37 }
 0x241   : > { %v4363_v43 = vadd.f32 %v4362_v2, %v4361_v20  ;;  %v2267_v38 = vadd.f32 %v2173_v10, %v1960_v22  ;;  %v2480_v42 = vpop.f32.mrf.mxu3  ;;  %v3312_v0 = vshll.u32 %v6442_v27, 16  ;;  %v3295_v21 = vadd.s32 %v3294_v26, %v3284_v28 }
 0x242   : > { %v4476_v39 = vsel %vm294_vm0, %v4435_v14, 0.0  ;;  %v1869_v30 = vpop.f32.mrf.mxu1  ;;  %v3313_v5 = vshrl.u32 %v6442_v27, 16  ;;  %vm6475_vm1 = vcmp.lt.s32.totalorder %v4179_v16, 16  ;;  %v3314_v12 = vshll.u32 %v6459_v63, 16 }
 0x243   : > { %v4477_v58 = vadd.f32 %v4476_v39, %v4475_v56  ;;  %v2574_v20 = vadd.f32 %v2480_v42, %v2267_v38  ;;  %v2790_v61 = vpop.f32.mrf.mxu0  ;;  %v1961_v1 = vadd.f32 %v1869_v30, %v5655_v33  ;;  %vm3316_vm2 = vc.u32 %v3308_v60, %v3312_v0  ;;  %v6502_v30 = vld [vmem:[%s5292_s20 + $0xec] sm:$0xff] }
 0x244   : > { %v3318_v37 = vadd.s32 %v3312_v0, %v3308_v60  ;;  %v3296_v56 = vadd.s32 %v3295_v21, %v3286_v17  ;;  %v3317_v28 = vsel %vm3316_vm2, 1, %v7227_v34  ;;  %v3335_v33 = vshrl.u32 %v6410_v47, 16  ;;  %v2321_v21 = vld [vmem:[%s5292_s20 + $0xed] sm:$0xff] }
 0x245   : > { %v2881_v46 = vadd.f32 %v2787_v44, %v2574_v20  ;;  %4920 = vmatmul.msk.f32.gmra.mxu1 %vm294_vm0, %v6353_v23  ;;  %4957 = vmatmul.msk.f32.gmra.mxu2 %vm294_vm0, %v6464_v11  ;;  %v3315_v16 = vshrl.u32 %v6459_v63, 16  ;;  %v3319_v35 = vadd.s32 %v3317_v28, %v3311_v45  ;;  %v6489_v44 = vmul.u32 58254, %v3334_v18 }
 0x246   : > { %4994 = vmatmul.msk.f32.gmra.mxu3 %vm294_vm0, %v2320_v53  ;;  %5031 = vmatmul.msk.f32.gmra.mxu0 %vm294_vm0, %v2627_v31  ;;  %vm3320_vm3 = vc.u32 %v3318_v37, %v3314_v12  ;;  %v3297_v17 = vshrl.u32 %v3296_v56, 4  ;;  %v6496_v60 = vmul.u32 14564, %v3335_v33  ;;  %v3337_v10 = vmul.u32 14564, %v3334_v18  ;;  %v2628_v12 = vld [vmem:[%s5292_s20 + $0xee] sm:$0xff] }
 0x247   : > { %2917 = vst.msk [vmem:[%s6086_s10 + $0x38] sm:$0xff] %vm294_vm0, %v2881_v46  ;;  %v4322_v23 = vsel %vm6424_vm11, %v2881_v46, 0.0  ;;  %v3321_v22 = vsel %vm3320_vm3, 1, %v7227_v34  ;;  %v3341_v59 = vshll.u32 %v6489_v44, 16  ;;  %v3340_v0 = vmul.u32 58254, %v3335_v33 }
 0x248   : > { %v4364_v27 = vsel %vm294_vm0, %v4322_v23, 0.0  ;;  %v4436_v51 = vmul.f32 %v4322_v23, %v4322_v23  ;;  %v2176_v2 = vpop.f32.mrf.mxu2  ;;  %v3323_v14 = vadd.s32 %v3321_v22, %v3319_v35  ;;  %v3298_v42 = vmul.u32 18, %v3297_v17 }
 0x249   : > { %v4365_v4 = vadd.f32 %v4364_v27, %v4363_v43  ;;  %v2268_v63 = vadd.f32 %v2176_v2, %v1961_v1  ;;  %v2483_v38 = vpop.f32.mrf.mxu3  ;;  %v3343_v20 = vshll.u32 %v6496_v60, 16  ;;  %v3342_v1 = vshrl.u32 %v6489_v44, 16 }
 0x24a   : > { %v4478_v26 = vsel %vm294_vm0, %v4436_v51, 0.0  ;;  %v1872_v39 = vpop.f32.mrf.mxu1  ;;  %v3324_v45 = vadd.s32 %v3323_v14, %v3313_v5  ;;  %v3299_v43 = vsub.s32 %v6329_v52, %v3298_v42  ;;  %vm3345_vm4 = vc.u32 %v3337_v10, %v3341_v59  ;;  %v6545_v42 = vld [vmem:[%s5292_s20 + $0xf4] sm:$0xff] }
 0x24b   : > { %v4479_v53 = vadd.f32 %v4478_v26, %v4477_v58  ;;  %v2575_v31 = vadd.f32 %v2483_v38, %v2268_v63  ;;  %v2793_v18 = vpop.f32.mrf.mxu0  ;;  %v1962_v37 = vadd.f32 %v1872_v39, %v5665_v55  ;;  %v3347_v56 = vadd.s32 %v3341_v59, %v3337_v10 }
 0x24c   : > { %v3325_v46 = vadd.s32 %v3324_v45, %v3315_v16  ;;  %vm4037_vm5 = vcmp.ne.s32.totalorder %v3299_v43, 0  ;;  %vm4073_vm6 = vcmp.lt.s32.totalorder %v3299_v43, 0  ;;  %v4145_v58 = vadd.s32 18, %v3299_v43  ;;  %v2322_v45 = vld [vmem:[%s5292_s20 + $0xf5] sm:$0xff] }
 0x24d   : > { %v2882_v28 = vadd.f32 %v2790_v61, %v2575_v31  ;;  %4921 = vmatmul.msk.f32.gmra.mxu1 %vm294_vm0, %v6414_v3  ;;  %4958 = vmatmul.msk.f32.gmra.mxu2 %vm294_vm0, %v6502_v30  ;;  %vm6516_vm7 = vmand %vm4073_vm6, %vm4037_vm5  ;;  %v3346_v61 = vsel %vm3345_vm4, 1, %v7227_v34  ;;  %vm3349_vm8 = vc.u32 %v3347_v56, %v3343_v20  ;;  %v6522_v3 = vadd.s32 104, %v5869_v49  ;;  %v2629_v20 = vld [vmem:[%s5292_s20 + $0xf6] sm:$0xff] }
 0x24e   : > { %4995 = vmatmul.msk.f32.gmra.mxu3 %vm294_vm0, %v2321_v21  ;;  %5032 = vmatmul.msk.f32.gmra.mxu0 %vm294_vm0, %v2628_v12  ;;  %v3326_v52 = vshrl.u32 %v3325_v46, 4  ;;  %v3344_v33 = vshrl.u32 %v6496_v60, 16  ;;  %v3348_v16 = vadd.s32 %v3346_v61, %v3340_v0  ;;  %v3350_v35 = vsel %vm3349_vm8, 1, %v7227_v34 }
 0x24f   : > { %2918 = vst.msk [vmem:[%s6086_s10 + $0x40] sm:$0xff] %vm294_vm0, %v2882_v28  ;;  %v4323_v5 = vsel %vm6475_vm1, %v2882_v28, 0.0  ;;  %v4181_v22 = vsel %vm6516_vm7, %v4145_v58, %v3299_v43  ;;  %v3363_v60 = vand.u32 65535, %v6522_v3  ;;  %vm6540_vm9 = vcmp.lt.s32.totalorder %v4180_v24, 16 }
 0x250   : > { %v4366_v44 = vsel %vm294_vm0, %v4323_v5, 0.0  ;;  %v4437_v23 = vmul.f32 %v4323_v5, %v4323_v5  ;;  %v2179_v17 = vpop.f32.mrf.mxu2  ;;  %v3327_v27 = vmul.u32 18, %v3326_v52  ;;  %v3352_v14 = vadd.s32 %v3350_v35, %v3348_v16 }
 0x251   : > { %v4367_v51 = vadd.f32 %v4366_v44, %v4365_v4  ;;  %v2269_v2 = vadd.f32 %v2179_v17, %v1962_v37  ;;  %v2486_v50 = vpop.f32.mrf.mxu3  ;;  %v3364_v59 = vshrl.u32 %v6522_v3, 16  ;;  %v6552_v9 = vadd.s32 112, %v5869_v49 }
 0x252   : > { %v4480_v10 = vsel %vm294_vm0, %v4437_v23, 0.0  ;;  %v1875_v63 = vpop.f32.mrf.mxu1  ;;  %v3328_v4 = vsub.s32 %v6407_v48, %v3327_v27  ;;  %v3353_v31 = vadd.s32 %v3352_v14, %v3342_v1  ;;  %vm6554_vm10 = vcmp.lt.s32.totalorder %v4181_v22, 16  ;;  %v6587_v22 = vld [vmem:[%s5292_s20 + $0xfc] sm:$0xff] }
 0x253   : > { %v4481_v26 = vadd.f32 %v4480_v10, %v4479_v53  ;;  %v2576_v39 = vadd.f32 %v2486_v50, %v2269_v2  ;;  %v2796_v0 = vpop.f32.mrf.mxu0  ;;  %v6566_v21 = vmul.u32 58254, %v3363_v60  ;;  %v6568_v12 = vmul.u32 14564, %v3364_v59 }
 0x254   : > { %vm4038_vm11 = vcmp.ne.s32.totalorder %v3328_v4, 0  ;;  %vm4074_vm12 = vcmp.lt.s32.totalorder %v3328_v4, 0  ;;  %v4146_v8 = vadd.s32 18, %v3328_v4  ;;  %v3354_v53 = vadd.s32 %v3353_v31, %v3344_v33 }
 0x255   : > { %v2883_v48 = vadd.f32 %v2793_v18, %v2576_v39  ;;  %4922 = vmatmul.msk.f32.gmra.mxu1 %vm294_vm0, %v6464_v11  ;;  %4959 = vmatmul.msk.f32.gmra.mxu2 %vm294_vm0, %v6545_v42  ;;  %vm6562_vm13 = vmand %vm4074_vm12, %vm4038_vm11  ;;  %v1963_v43 = vadd.f32 %v1875_v63, %v5675_v15  ;;  %v3366_v18 = vmul.u32 14564, %v3363_v60  ;;  %v3369_v1 = vmul.u32 58254, %v3364_v59  ;;  %v2323_v60 = vld [vmem:[%s5292_s20 + $0xfd] sm:$0xff] }
 0x256   : > { %4996 = vmatmul.msk.f32.gmra.mxu3 %vm294_vm0, %v2322_v45  ;;  %5033 = vmatmul.msk.f32.gmra.mxu0 %vm294_vm0, %v2629_v20  ;;  %v4182_v11 = vsel %vm6562_vm13, %v4146_v8, %v3328_v4  ;;  %v3355_v46 = vshrl.u32 %v3354_v53, 4  ;;  %v3370_v56 = vshll.u32 %v6566_v21, 16  ;;  %v3392_v15 = vand.u32 65535, %v6552_v9  ;;  %v2630_v63 = vld [vmem:[%s5292_s20 + $0xfe] sm:$0xff] }
 0x257   : > { %2919 = vst.msk [vmem:[%s6086_s10 + $0x48] sm:$0xff] %vm294_vm0, %v2883_v48  ;;  %v4324_v37 = vsel %vm6540_vm9, %v2883_v48, 0.0  ;;  %v3372_v52 = vshll.u32 %v6568_v12, 16  ;;  %v3393_v61 = vshrl.u32 %v6552_v9, 16  ;;  %v3371_v44 = vshrl.u32 %v6566_v21, 16 }
 0x258   : > { %v4368_v28 = vsel %vm294_vm0, %v4324_v37, 0.0  ;;  %v4438_v58 = vmul.f32 %v4324_v37, %v4324_v37  ;;  %v2182_v55 = vpop.f32.mrf.mxu2  ;;  %v3356_v35 = vmul.u32 18, %v3355_v46  ;;  %v3373_v27 = vshrl.u32 %v6568_v12, 16 }
 0x259   : > { %v4369_v5 = vadd.f32 %v4368_v28, %v4367_v51  ;;  %v2270_v33 = vadd.f32 %v2182_v55, %v1963_v43  ;;  %v2489_v16 = vpop.f32.mrf.mxu3  ;;  %vm3374_vm14 = vc.u32 %v3366_v18, %v3370_v56  ;;  %v3376_v2 = vadd.s32 %v3370_v56, %v3366_v18  ;;  %v6627_v28 = vld [vmem:[%s5292_s20 + $0x104] sm:$0xff] }
 0x25a   : > { %v4482_v23 = vsel %vm294_vm0, %v4438_v58, 0.0  ;;  %v1878_v17 = vpop.f32.mrf.mxu1  ;;  %v3357_v51 = vsub.s32 %v6410_v47, %v3356_v35  ;;  %v3395_v38 = vmul.u32 14564, %v3392_v15  ;;  %vm6593_vm15 = vcmp.lt.s32.totalorder %v4182_v11, 16 }
 0x25b   : > { %v4483_v50 = vadd.f32 %v4482_v23, %v4481_v26  ;;  %v2577_v14 = vadd.f32 %v2489_v16, %v2270_v33  ;;  %v2799_v10 = vpop.f32.mrf.mxu0  ;;  %v3375_v59 = vsel %vm3374_vm14, 1, %v7227_v34  ;;  %vm3378_vm1 = vc.u32 %v3376_v2, %v3372_v52  ;;  %v2631_v23 = vld [vmem:[%s5292_s20 + $0x106] sm:$0xff] }
 0x25c   : > { %v6598_v39 = vmul.u32 58254, %v3392_v15  ;;  %v6600_v45 = vmul.u32 14564, %v3393_v61  ;;  %vm4039_vm2 = vcmp.ne.s32.totalorder %v3357_v51, 0  ;;  %vm4075_vm3 = vcmp.lt.s32.totalorder %v3357_v51, 0 }
 0x25d   : > { %v2884_v26 = vadd.f32 %v2796_v0, %v2577_v14  ;;  %4923 = vmatmul.msk.f32.gmra.mxu1 %vm294_vm0, %v6502_v30  ;;  %4960 = vmatmul.msk.f32.gmra.mxu2 %vm294_vm0, %v6587_v22  ;;  %v4147_v47 = vadd.s32 18, %v3357_v51  ;;  %v1964_v20 = vadd.f32 %v1878_v17, %v5685_v40  ;;  %vm6609_vm4 = vmand %vm4075_vm3, %vm4039_vm2  ;;  %v3377_v0 = vadd.s32 %v3375_v59, %v3369_v1 }
 0x25e   : > { %4997 = vmatmul.msk.f32.gmra.mxu3 %vm294_vm0, %v2323_v60  ;;  %5034 = vmatmul.msk.f32.gmra.mxu0 %vm294_vm0, %v2630_v63  ;;  %v3379_v8 = vsel %vm3378_vm1, 1, %v7227_v34  ;;  %v3399_v30 = vshll.u32 %v6598_v39, 16  ;;  %v3398_v24 = vmul.u32 58254, %v3393_v61  ;;  %v3400_v53 = vshrl.u32 %v6598_v39, 16 }
 0x25f   : > { %2920 = vst.msk [vmem:[%s6086_s10 + $0x50] sm:$0xff] %vm294_vm0, %v2884_v26  ;;  %v4325_v48 = vsel %vm6554_vm10, %v2884_v26, 0.0  ;;  %v4183_v40 = vsel %vm6609_vm4, %v4147_v47, %v3357_v51  ;;  %v3381_v11 = vadd.s32 %v3379_v8, %v3377_v0  ;;  %v3401_v18 = vshll.u32 %v6600_v45, 16 }
 0x260   : > { %v4370_v21 = vsel %vm294_vm0, %v4325_v48, 0.0  ;;  %v4439_v12 = vmul.f32 %v4325_v48, %v4325_v48  ;;  %v2185_v43 = vpop.f32.mrf.mxu2  ;;  %v3402_v46 = vshrl.u32 %v6600_v45, 16  ;;  %vm3403_vm5 = vc.u32 %v3395_v38, %v3399_v30 }
 0x261   : > { %v4371_v1 = vadd.f32 %v4370_v21, %v4369_v5  ;;  %v2271_v37 = vadd.f32 %v2185_v43, %v1964_v20  ;;  %v2492_v36 = vpop.f32.mrf.mxu3  ;;  %v3382_v58 = vadd.s32 %v3381_v11, %v3371_v44  ;;  %v3404_v55 = vsel %vm3403_vm5, 1, %v7227_v34  ;;  %v2324_v5 = vld [vmem:[%s5292_s20 + $0x105] sm:$0xff] }
 0x262   : > { %v4484_v56 = vsel %vm294_vm0, %v4439_v12, 0.0  ;;  %v1881_v15 = vpop.f32.mrf.mxu1  ;;  %v3405_v52 = vadd.s32 %v3399_v30, %v3395_v38  ;;  %v3406_v17 = vadd.s32 %v3404_v55, %v3398_v24  ;;  %vm6633_vm6 = vcmp.lt.s32.totalorder %v4183_v40, 16  ;;  %v6670_v43 = vld [vmem:[%s5292_s20 + $0x10c] sm:$0xff] }
 0x263   : > { %v4485_v61 = vadd.f32 %v4484_v56, %v4483_v50  ;;  %v1965_v33 = vadd.f32 %v1881_v15, %v5695_v62  ;;  %v2578_v16 = vadd.f32 %v2492_v36, %v2271_v37  ;;  %v2802_v35 = vpop.f32.mrf.mxu0  ;;  %v3383_v14 = vadd.s32 %v3382_v58, %v3373_v27  ;;  %v2325_v56 = vld [vmem:[%s5292_s20 + $0x10d] sm:$0xff] }
 0x264   : > { %vm3407_vm7 = vc.u32 %v3405_v52, %v3401_v18  ;;  %v6638_v44 = vadd.s32 120, %v5869_v49  ;;  %v6641_v60 = vadd.s32 128, %v5869_v49  ;;  %v6649_v63 = vadd.s32 136, %v5869_v49  ;;  %v2632_v58 = vld [vmem:[%s5292_s20 + $0x10e] sm:$0xff] }
 0x265   : > { %v2885_v50 = vadd.f32 %v2799_v10, %v2578_v16  ;;  %4924 = vmatmul.msk.f32.gmra.mxu1 %vm294_vm0, %v6545_v42  ;;  %4961 = vmatmul.msk.f32.gmra.mxu2 %vm294_vm0, %v6627_v28  ;;  %v3408_v62 = vsel %vm3407_vm7, 1, %v7227_v34  ;;  %v6652_v27 = vadd.s32 144, %v5869_v49  ;;  %v3384_v51 = vshrl.u32 %v3383_v14, 4 }
 0x266   : > { %4998 = vmatmul.msk.f32.gmra.mxu3 %vm294_vm0, %v2324_v5  ;;  %5035 = vmatmul.msk.f32.gmra.mxu0 %vm294_vm0, %v2631_v23  ;;  %v3410_v10 = vadd.s32 %v3408_v62, %v3406_v17  ;;  %v3421_v38 = vand.u32 65535, %v6638_v44  ;;  %v3422_v42 = vshrl.u32 %v6638_v44, 16  ;;  %v3450_v39 = vand.u32 65535, %v6641_v60 }
 0x267   : > { %2921 = vst.msk [vmem:[%s6086_s10 + $0x58] sm:$0xff] %vm294_vm0, %v2885_v50  ;;  %v4326_v59 = vsel %vm6593_vm15, %v2885_v50, 0.0  ;;  %v3451_v45 = vshrl.u32 %v6641_v60, 16  ;;  %v3479_v26 = vand.u32 65535, %v6649_v63  ;;  %v3385_v0 = vmul.u32 18, %v3384_v51 }
 0x268   : > { %v4372_v47 = vsel %vm294_vm0, %v4326_v59, 0.0  ;;  %v4440_v20 = vmul.f32 %v4326_v59, %v4326_v59  ;;  %v2188_v31 = vpop.f32.mrf.mxu2  ;;  %v3411_v8 = vadd.s32 %v3410_v10, %v3400_v53  ;;  %v3424_v4 = vmul.u32 14564, %v3421_v38 }
 0x269   : > { %v4373_v30 = vadd.f32 %v4372_v47, %v4371_v1  ;;  %v2272_v48 = vadd.f32 %v2188_v31, %v1965_v33  ;;  %v2495_v40 = vpop.f32.mrf.mxu3  ;;  %v6666_v24 = vmul.u32 58254, %v3421_v38  ;;  %v3386_v11 = vsub.s32 %v6522_v3, %v3385_v0  ;;  %v6703_v0 = vld [vmem:[%s5292_s20 + $0x114] sm:$0xff] }
 0x26a   : > { %v4486_v21 = vsel %vm294_vm0, %v4440_v20, 0.0  ;;  %v1884_v12 = vpop.f32.mrf.mxu1  ;;  %v3412_v18 = vadd.s32 %v3411_v8, %v3402_v46  ;;  %v6673_v37 = vmul.u32 14564, %v3422_v42  ;;  %v3427_v55 = vmul.u32 58254, %v3422_v42 }
 0x26b   : > { %v4487_v36 = vadd.f32 %v4486_v21, %v4485_v61  ;;  %v1966_v53 = vadd.f32 %v1884_v12, %v5705_v6  ;;  %v2579_v1 = vadd.f32 %v2495_v40, %v2272_v48  ;;  %v2805_v15 = vpop.f32.mrf.mxu0  ;;  %vm4040_vm8 = vcmp.ne.s32.totalorder %v3386_v11, 0 }
 0x26c   : > { %vm4076_vm9 = vcmp.lt.s32.totalorder %v3386_v11, 0  ;;  %v4148_v52 = vadd.s32 18, %v3386_v11  ;;  %v3413_v33 = vshrl.u32 %v3412_v18, 4  ;;  %v3428_v6 = vshll.u32 %v6666_v24, 16 }
 0x26d   : > { %v2886_v16 = vadd.f32 %v2802_v35, %v2579_v1  ;;  %4925 = vmatmul.msk.f32.gmra.mxu1 %vm294_vm0, %v6587_v22  ;;  %4962 = vmatmul.msk.f32.gmra.mxu2 %vm294_vm0, %v6670_v43  ;;  %vm4112_vm10 = vmand %vm4076_vm9, %vm4040_vm8  ;;  %v3429_v3 = vshrl.u32 %v6666_v24, 16  ;;  %v3430_v46 = vshll.u32 %v6673_v37, 16  ;;  %v3431_v35 = vshrl.u32 %v6673_v37, 16 }
 0x26e   : > { %4999 = vmatmul.msk.f32.gmra.mxu3 %vm294_vm0, %v2325_v56  ;;  %v4184_v61 = vsel %vm4112_vm10, %v4148_v52, %v3386_v11  ;;  %5036 = vmatmul.msk.f32.gmra.mxu0 %vm294_vm0, %v2632_v58  ;;  %v3414_v5 = vmul.u32 18, %v3413_v33  ;;  %v3453_v22 = vmul.u32 14564, %v3450_v39  ;;  %vm3432_vm12 = vc.u32 %v3424_v4, %v3428_v6 }
 0x26f   : > { %2922 = vst.msk [vmem:[%s6086_s10 + $0x60] sm:$0xff] %vm294_vm0, %v2886_v16  ;;  %v4327_v23 = vsel %vm6633_vm6, %v2886_v16, 0.0  ;;  %vm6694_vm11 = vcmp.lt.s32.totalorder %v4184_v61, 16  ;;  %v3434_v14 = vadd.s32 %v3428_v6, %v3424_v4  ;;  %v3433_v38 = vsel %vm3432_vm12, 1, %v7227_v34  ;;  %v2326_v4 = vld [vmem:[%s5292_s20 + $0x115] sm:$0xff] }
 0x270   : > { %v4374_v50 = vsel %vm294_vm0, %v4327_v23, 0.0  ;;  %v4441_v62 = vmul.f32 %v4327_v23, %v4327_v23  ;;  %v2191_v51 = vpop.f32.mrf.mxu2  ;;  %v3415_v10 = vsub.s32 %v6552_v9, %v3414_v5  ;;  %v3435_v47 = vadd.s32 %v3433_v38, %v3427_v55 }
 0x271   : > { %v4375_v42 = vadd.f32 %v4374_v50, %v4373_v30  ;;  %v2273_v59 = vadd.f32 %v2191_v51, %v1966_v53  ;;  %v2498_v2 = vpop.f32.mrf.mxu3  ;;  %vm3436_vm13 = vc.u32 %v3434_v14, %v3430_v46  ;;  %v2633_v30 = vld [vmem:[%s5292_s20 + $0x116] sm:$0xff]  ;;  %v3454_v18 = vmul.u32 58254, %v3450_v39 }
 0x272   : > { %v4488_v20 = vsel %vm294_vm0, %v4441_v62, 0.0  ;;  %v1887_v31 = vpop.f32.mrf.mxu1  ;;  %vm4041_vm14 = vcmp.ne.s32.totalorder %v3415_v10, 0  ;;  %vm4077_vm15 = vcmp.lt.s32.totalorder %v3415_v10, 0  ;;  %v4149_v8 = vadd.s32 18, %v3415_v10  ;;  %v6744_v62 = vld [vmem:[%s5292_s20 + $0x11c] sm:$0xff] }
 0x273   : > { %v4489_v48 = vadd.f32 %v4488_v20, %v4487_v36  ;;  %v1967_v9 = vadd.f32 %v1887_v31, %v5715_v29  ;;  %v2580_v40 = vadd.f32 %v2498_v2, %v2273_v59  ;;  %v2808_v24 = vpop.f32.mrf.mxu0  ;;  %vm4113_vm1 = vmand %vm4077_vm15, %vm4041_vm14  ;;  %v3437_v21 = vsel %vm3436_vm13, 1, %v7227_v34 }
 0x274   : > { %v4185_v12 = vsel %vm4113_vm1, %v4149_v8, %v3415_v10  ;;  %v3439_v11 = vadd.s32 %v3437_v21, %v3435_v47  ;;  %v6713_v37 = vmul.u32 14564, %v3451_v45  ;;  %v3456_v53 = vmul.u32 58254, %v3451_v45  ;;  %v2634_v47 = vld [vmem:[%s5292_s20 + $0x11e] sm:$0xff] }
 0x275   : > { %v2887_v36 = vadd.f32 %v2805_v15, %v2580_v40  ;;  %4926 = vmatmul.msk.f32.gmra.mxu1 %vm294_vm0, %v6627_v28  ;;  %4963 = vmatmul.msk.f32.gmra.mxu2 %vm294_vm0, %v6703_v0  ;;  %vm6719_vm2 = vcmp.lt.s32.totalorder %v4185_v12, 16  ;;  %v3480_v39 = vshrl.u32 %v6649_v63, 16  ;;  %v3457_v56 = vshll.u32 %v3454_v18, 16 }
 0x276   : > { %5000 = vmatmul.msk.f32.gmra.mxu3 %vm294_vm0, %v2326_v4  ;;  %5037 = vmatmul.msk.f32.gmra.mxu0 %vm294_vm0, %v2633_v30  ;;  %v3440_v1 = vadd.s32 %v3439_v11, %v3429_v3  ;;  %v3458_v15 = vshrl.u32 %v3454_v18, 16  ;;  %v3459_v28 = vshll.u32 %v6713_v37, 16  ;;  %v3460_v55 = vshrl.u32 %v6713_v37, 16 }
 0x277   : > { %2923 = vst.msk [vmem:[%s6086_s10 + $0x68] sm:$0xff] %vm294_vm0, %v2887_v36  ;;  %v4328_v58 = vsel %vm6694_vm11, %v2887_v36, 0.0  ;;  %v3482_v45 = vmul.u32 14564, %v3479_v26  ;;  %v6738_v52 = vmul.u32 58254, %v3479_v26  ;;  %vm3461_vm3 = vc.u32 %v3453_v22, %v3457_v56 }
 0x278   : > { %v4376_v33 = vsel %vm294_vm0, %v4328_v58, 0.0  ;;  %v4442_v16 = vmul.f32 %v4328_v58, %v4328_v58  ;;  %v2194_v6 = vpop.f32.mrf.mxu2  ;;  %v3441_v3 = vadd.s32 %v3440_v1, %v3431_v35  ;;  %v3462_v23 = vsel %vm3461_vm3, 1, %v7227_v34  ;;  %v6776_v58 = vld [vmem:[%s5292_s20 + $0x124] sm:$0xff] }
 0x279   : > { %v4377_v46 = vadd.f32 %v4376_v33, %v4375_v42  ;;  %v2274_v61 = vadd.f32 %v2194_v6, %v1967_v9  ;;  %v2501_v5 = vpop.f32.mrf.mxu3  ;;  %v3463_v17 = vadd.s32 %v3457_v56, %v3453_v22  ;;  %v3464_v51 = vadd.s32 %v3462_v23, %v3456_v53  ;;  %v2327_v42 = vld [vmem:[%s5292_s20 + $0x11d] sm:$0xff] }
 0x27a   : > { %v4490_v14 = vsel %vm294_vm0, %v4442_v16, 0.0  ;;  %v1890_v50 = vpop.f32.mrf.mxu1  ;;  %v3442_v26 = vshrl.u32 %v3441_v3, 4  ;;  %v6746_v10 = vmul.u32 14564, %v3480_v39  ;;  %v3485_v31 = vmul.u32 58254, %v3480_v39 }
 0x27b   : > { %v4491_v38 = vadd.f32 %v4490_v14, %v4489_v48  ;;  %v1968_v35 = vadd.f32 %v1890_v50, %v5725_v54  ;;  %v2581_v59 = vadd.f32 %v2501_v5, %v2274_v61  ;;  %v2811_v2 = vpop.f32.mrf.mxu0  ;;  %vm3465_vm4 = vc.u32 %v3463_v17, %v3459_v28  ;;  %v2635_v5 = vld [vmem:[%s5292_s20 + $0x126] sm:$0xff] }
 0x27c   : > { %v3443_v20 = vmul.u32 18, %v3442_v26  ;;  %v3466_v22 = vsel %vm3465_vm4, 1, %v7227_v34  ;;  %v3486_v8 = vshll.u32 %v6738_v52, 16  ;;  %v3487_v48 = vshrl.u32 %v6738_v52, 16 }
 0x27d   : > { %v2888_v9 = vadd.f32 %v2808_v24, %v2581_v59  ;;  %4927 = vmatmul.msk.f32.gmra.mxu1 %vm294_vm0, %v6670_v43  ;;  %4964 = vmatmul.msk.f32.gmra.mxu2 %vm294_vm0, %v6744_v62  ;;  %v3468_v54 = vadd.s32 %v3466_v22, %v3464_v51  ;;  %v3488_v40 = vshll.u32 %v6746_v10, 16  ;;  %v3489_v30 = vshrl.u32 %v6746_v10, 16 }
 0x27e   : > { %5001 = vmatmul.msk.f32.gmra.mxu3 %vm294_vm0, %v2327_v42  ;;  %v3444_v4 = vsub.s32 %v6638_v44, %v3443_v20  ;;  %5038 = vmatmul.msk.f32.gmra.mxu0 %vm294_vm0, %v2634_v47  ;;  %vm3490_vm5 = vc.u32 %v3482_v45, %v3486_v8  ;;  %v3492_v24 = vadd.s32 %v3486_v8, %v3482_v45  ;;  %v3508_v11 = vand.u32 65535, %v6652_v27 }
 0x27f   : > { %2924 = vst.msk [vmem:[%s6086_s10 + $0x70] sm:$0xff] %vm294_vm0, %v2888_v9  ;;  %v4329_v43 = vsel %vm6719_vm2, %v2888_v9, 0.0  ;;  %v3469_v21 = vadd.s32 %v3468_v54, %v3458_v15  ;;  %v3491_v12 = vsel %vm3490_vm5, 1, %v7227_v34  ;;  %v3509_v52 = vshrl.u32 %v6652_v27, 16 }
 0x280   : > { %v4378_v18 = vsel %vm294_vm0, %v4329_v43, 0.0  ;;  %v4443_v44 = vmul.f32 %v4329_v43, %v4329_v43  ;;  %v2197_v37 = vpop.f32.mrf.mxu2  ;;  %vm4042_vm6 = vcmp.ne.s32.totalorder %v3444_v4, 0  ;;  %vm4078_vm7 = vcmp.lt.s32.totalorder %v3444_v4, 0 }
 0x281   : > { %v4379_v36 = vadd.f32 %v4378_v18, %v4377_v46  ;;  %v2275_v53 = vadd.f32 %v2197_v37, %v1968_v35  ;;  %v2504_v39 = vpop.f32.mrf.mxu3  ;;  %vm6770_vm8 = vmand %vm4078_vm7, %vm4042_vm6  ;;  %v4150_v1 = vadd.s32 18, %v3444_v4  ;;  %v3470_v56 = vadd.s32 %v3469_v21, %v3460_v55  ;;  %v2328_v46 = vld [vmem:[%s5292_s20 + $0x125] sm:$0xff]  ;;  %v2329_v37 = vld [vmem:[%s5292_s20 + $0x12d] sm:$0xff] }
 0x282   : > { %v4492_v15 = vsel %vm294_vm0, %v4443_v44, 0.0  ;;  %v1893_v28 = vpop.f32.mrf.mxu1  ;;  %v3493_v45 = vadd.s32 %v3491_v12, %v3485_v31  ;;  %vm3494_vm9 = vc.u32 %v3492_v24, %v3488_v40  ;;  %v3511_v14 = vmul.u32 14564, %v3508_v11 }
 0x283   : > { %v4493_v33 = vadd.f32 %v4492_v15, %v4491_v38  ;;  %v1969_v16 = vadd.f32 %v1893_v28, %v5735_v13  ;;  %v2582_v6 = vadd.f32 %v2504_v39, %v2275_v53  ;;  %v4186_v3 = vsel %vm6770_vm8, %v4150_v1, %v3444_v4  ;;  %v2814_v61 = vpop.f32.mrf.mxu0  ;;  %v2636_v39 = vld [vmem:[%s5292_s20 + $0x12e] sm:$0xff] }
 0x284   : > { %vm6784_vm10 = vcmp.lt.s32.totalorder %v4186_v3, 16  ;;  %v3471_v23 = vshrl.u32 %v3470_v56, 4  ;;  %v3495_v17 = vsel %vm3494_vm9, 1, %v7227_v34  ;;  %v6793_v26 = vmul.u32 58254, %v3508_v11  ;;  %v6817_v11 = vld [vmem:[%s5292_s20 + $0x12c] sm:$0xff] }
 0x285   : > { %v2889_v50 = vadd.f32 %v2811_v2, %v2582_v6  ;;  %4928 = vmatmul.msk.f32.gmra.mxu1 %vm294_vm0, %v6703_v0  ;;  %4965 = vmatmul.msk.f32.gmra.mxu2 %vm294_vm0, %v6776_v58  ;;  %v3497_v13 = vadd.s32 %v3495_v17, %v3493_v45  ;;  %v6795_v51 = vmul.u32 14564, %v3509_v52  ;;  %v3514_v38 = vmul.u32 58254, %v3509_v52 }
 0x286   : > { %5002 = vmatmul.msk.f32.gmra.mxu3 %vm294_vm0, %v2328_v46  ;;  %v3472_v10 = vmul.u32 18, %v3471_v23  ;;  %5039 = vmatmul.msk.f32.gmra.mxu0 %vm294_vm0, %v2635_v5  ;;  %v6800_v35 = vadd.s32 152, %v5869_v49  ;;  %v6803_v59 = vadd.s32 160, %v5869_v49  ;;  %v3515_v2 = vshll.u32 %v6793_v26, 16 }
 0x287   : > { %2925 = vst.msk [vmem:[%s6086_s10 + $0x78] sm:$0xff] %vm294_vm0, %v2889_v50  ;;  %v4330_v0 = vsel %vm6784_vm10, %v2889_v50, 0.0  ;;  %v3498_v42 = vadd.s32 %v3497_v13, %v3487_v48  ;;  %v3516_v47 = vshrl.u32 %v6793_v26, 16  ;;  %v3517_v9 = vshll.u32 %v6795_v51, 16 }
 0x288   : > { %v4380_v20 = vsel %vm294_vm0, %v4330_v0, 0.0  ;;  %v4444_v22 = vmul.f32 %v4330_v0, %v4330_v0  ;;  %v2200_v31 = vpop.f32.mrf.mxu2  ;;  %v3473_v8 = vsub.s32 %v6641_v60, %v3472_v10  ;;  %v3518_v48 = vshrl.u32 %v6795_v51, 16  ;;  %v2023_v51 = vld [vmem:[%s5292_s20 + $0x134] sm:$0xff] }
 0x289   : > { %v4381_v54 = vadd.f32 %v4380_v20, %v4379_v36  ;;  %v2276_v40 = vadd.f32 %v2200_v31, %v1969_v16  ;;  %v2507_v4 = vpop.f32.mrf.mxu3  ;;  %v3499_v24 = vadd.s32 %v3498_v42, %v3489_v30  ;;  %vm3519_vm14 = vc.u32 %v3511_v14, %v3515_v2  ;;  %v2330_v20 = vld [vmem:[%s5292_s20 + $0x135] sm:$0xff] }
 0x28a   : > { %v4494_v43 = vsel %vm294_vm0, %v4444_v22, 0.0  ;;  %v1896_v21 = vpop.f32.mrf.mxu1  ;;  %vm4043_vm11 = vcmp.ne.s32.totalorder %v3473_v8, 0  ;;  %vm4079_vm12 = vcmp.lt.s32.totalorder %v3473_v8, 0  ;;  %v4151_v12 = vadd.s32 18, %v3473_v8  ;;  %v2637_v31 = vld [vmem:[%s5292_s20 + $0x136] sm:$0xff] }
 0x28b   : > { %v4495_v18 = vadd.f32 %v4494_v43, %v4493_v33  ;;  %v1970_v60 = vadd.f32 %v1896_v21, %v5745_v7  ;;  %v2583_v44 = vadd.f32 %v2507_v4, %v2276_v40  ;;  %vm4115_vm13 = vmand %vm4079_vm12, %vm4043_vm11  ;;  %v2817_v36 = vpop.f32.mrf.mxu0  ;;  %v3500_v53 = vshrl.u32 %v3499_v24, 4 }
 0x28c   : > { %v4187_v30 = vsel %vm4115_vm13, %v4151_v12, %v3473_v8  ;;  %v3521_v29 = vadd.s32 %v3515_v2, %v3511_v14  ;;  %v3537_v1 = vand.u32 65535, %v6800_v35  ;;  %v3520_v15 = vsel %vm3519_vm14, 1, %v7227_v34 }
 0x28d   : > { %v2890_v56 = vadd.f32 %v2814_v61, %v2583_v44  ;;  %vm4223_vm15 = vcmp.lt.s32.totalorder %v4187_v30, 16  ;;  %4929 = vmatmul.msk.f32.gmra.mxu1 %vm294_vm0, %v6744_v62  ;;  %4966 = vmatmul.msk.f32.gmra.mxu2 %vm294_vm0, %v6817_v11  ;;  %v3501_v7 = vmul.u32 18, %v3500_v53  ;;  %v3522_v28 = vadd.s32 %v3520_v15, %v3514_v38 }
 0x28e   : > { %5003 = vmatmul.msk.f32.gmra.mxu3 %vm294_vm0, %v2329_v37  ;;  %5040 = vmatmul.msk.f32.gmra.mxu0 %vm294_vm0, %v2636_v39  ;;  %vm3523_vm1 = vc.u32 %v3521_v29, %v3517_v9  ;;  %v3538_v45 = vshrl.u32 %v6800_v35, 16  ;;  %v3540_v52 = vmul.u32 14564, %v3537_v1  ;;  %v6835_v6 = vmul.u32 58254, %v3537_v1 }
 0x28f   : > { %2926 = vst.msk [vmem:[%s6086_s10 + $0x80] sm:$0xff] %vm294_vm0, %v2890_v56  ;;  %v4331_v33 = vsel %vm4223_vm15, %v2890_v56, 0.0  ;;  %v3502_v62 = vsub.s32 %v6649_v63, %v3501_v7  ;;  %v3524_v16 = vsel %vm3523_vm1, 1, %v7227_v34  ;;  %v3566_v21 = vand.u32 65535, %v6803_v59 }
 0x290   : > { %v4382_v3 = vsel %vm294_vm0, %v4331_v33, 0.0  ;;  %v4445_v46 = vmul.f32 %v4331_v33, %v4331_v33  ;;  %v2203_v61 = vpop.f32.mrf.mxu2  ;;  %v3526_v5 = vadd.s32 %v3524_v16, %v3522_v28  ;;  %v6838_v55 = vmul.u32 14564, %v3538_v45 }
 0x291   : > { %v4383_v23 = vadd.f32 %v4382_v3, %v4381_v54  ;;  %v2277_v17 = vadd.f32 %v2203_v61, %v1970_v60  ;;  %v2510_v14 = vpop.f32.mrf.mxu3  ;;  %vm4044_vm2 = vcmp.ne.s32.totalorder %v3502_v62, 0  ;;  %vm4080_vm3 = vcmp.lt.s32.totalorder %v3502_v62, 0  ;;  %v2331_v3 = vld [vmem:[%s5292_s20 + $0x13d] sm:$0xff] }
 0x292   : > { %v4496_v63 = vsel %vm294_vm0, %v4445_v46, 0.0  ;;  %v1899_v50 = vpop.f32.mrf.mxu1  ;;  %vm6841_vm4 = vmand %vm4080_vm3, %vm4044_vm2  ;;  %v4152_v26 = vadd.s32 18, %v3502_v62  ;;  %v3527_v10 = vadd.s32 %v3526_v5, %v3516_v47  ;;  %v3543_v38 = vmul.u32 58254, %v3538_v45  ;;  %v2024_v45 = vld [vmem:[%s5292_s20 + $0x13c] sm:$0xff] }
 0x293   : > { %v4497_v0 = vadd.f32 %v4496_v63, %v4495_v18  ;;  %v1971_v42 = vadd.f32 %v1899_v50, %v5755_v25  ;;  %v2584_v2 = vadd.f32 %v2510_v14, %v2277_v17  ;;  %v2820_v22 = vpop.f32.mrf.mxu0  ;;  %v3544_v8 = vshll.u32 %v6835_v6, 16  ;;  %v2638_v61 = vld [vmem:[%s5292_s20 + $0x13e] sm:$0xff] }
 0x294   : > { %v4188_v9 = vsel %vm6841_vm4, %v4152_v26, %v3502_v62  ;;  %v3528_v54 = vadd.s32 %v3527_v10, %v3518_v48  ;;  %v3545_v40 = vshrl.u32 %v6835_v6, 16  ;;  %v3546_v4 = vshll.u32 %v6838_v55, 16 }
 0x295   : > { %v2891_v47 = vadd.f32 %v2817_v36, %v2584_v2  ;;  %vm4224_vm5 = vcmp.lt.s32.totalorder %v4188_v9, 16  ;;  %4930 = vmatmul.msk.f32.gmra.mxu1 %vm294_vm0, %v6776_v58  ;;  %4967 = vmatmul.msk.f32.gmra.mxu2 %vm294_vm0, %v2023_v51  ;;  %v3547_v25 = vshrl.u32 %v6838_v55, 16  ;;  %vm3548_vm6 = vc.u32 %v3540_v52, %v3544_v8 }
 0x296   : > { %5004 = vmatmul.msk.f32.gmra.mxu3 %vm294_vm0, %v2330_v20  ;;  %v3529_v24 = vshrl.u32 %v3528_v54, 4  ;;  %5041 = vmatmul.msk.f32.gmra.mxu0 %vm294_vm0, %v2637_v31  ;;  %v3549_v48 = vsel %vm3548_vm6, 1, %v7227_v34  ;;  %v3550_v43 = vadd.s32 %v3544_v8, %v3540_v52  ;;  %v3567_v58 = vshrl.u32 %v6803_v59, 16 }
 0x297   : > { %2927 = vst.msk [vmem:[%s6086_s10 + $0x88] sm:$0xff] %vm294_vm0, %v2891_v47  ;;  %v4332_v12 = vsel %vm4224_vm5, %v2891_v47, 0.0  ;;  %v3551_v18 = vadd.s32 %v3549_v48, %v3543_v38  ;;  %v6866_v60 = vadd.s32 168, %v5869_v49  ;;  %v3569_v56 = vmul.u32 14564, %v3566_v21 }
 0x298   : > { %v4384_v44 = vsel %vm294_vm0, %v4332_v12, 0.0  ;;  %v4446_v37 = vmul.f32 %v4332_v12, %v4332_v12  ;;  %v2206_v36 = vpop.f32.mrf.mxu2  ;;  %v3530_v53 = vmul.u32 18, %v3529_v24  ;;  %vm3552_vm7 = vc.u32 %v3550_v43, %v3546_v4 }
 0x299   : > { %v4385_v39 = vadd.f32 %v4384_v44, %v4383_v23  ;;  %v2278_v30 = vadd.f32 %v2206_v36, %v1971_v42  ;;  %v2513_v29 = vpop.f32.mrf.mxu3  ;;  %v3553_v1 = vsel %vm3552_vm7, 1, %v7227_v34  ;;  %v3570_v33 = vmul.u32 58254, %v3566_v21 }
 0x29a   : > { %v4498_v7 = vsel %vm294_vm0, %v4446_v37, 0.0  ;;  %v1902_v15 = vpop.f32.mrf.mxu1  ;;  %v3531_v28 = vsub.s32 %v6652_v27, %v3530_v53  ;;  %v3555_v52 = vadd.s32 %v3553_v1, %v3551_v18  ;;  %v6876_v5 = vmul.u32 14564, %v3567_v58 }
 0x29b   : > { %v4499_v62 = vadd.f32 %v4498_v7, %v4497_v0  ;;  %v1972_v16 = vadd.f32 %v1902_v15, %v5766_v32  ;;  %v2585_v6 = vadd.f32 %v2513_v29, %v2278_v30  ;;  %v2823_v46 = vpop.f32.mrf.mxu0  ;;  %v3572_v27 = vmul.u32 58254, %v3567_v58 }
 0x29c   : > { %vm4045_vm8 = vcmp.ne.s32.totalorder %v3531_v28, 0  ;;  %vm4081_vm9 = vcmp.lt.s32.totalorder %v3531_v28, 0  ;;  %v4153_v55 = vadd.s32 18, %v3531_v28  ;;  %v3556_v23 = vadd.s32 %v3555_v52, %v3545_v40 }
 0x29d   : > { %v2892_v17 = vadd.f32 %v2820_v22, %v2585_v6  ;;  %vm4117_vm10 = vmand %vm4081_vm9, %vm4045_vm8  ;;  %4931 = vmatmul.msk.f32.gmra.mxu1 %vm294_vm0, %v6817_v11  ;;  %4968 = vmatmul.msk.f32.gmra.mxu2 %vm294_vm0, %v2024_v45  ;;  %v3573_v32 = vshll.u32 %v3570_v33, 16  ;;  %v3574_v14 = vshrl.u32 %v3570_v33, 16  ;;  %v3575_v13 = vshll.u32 %v6876_v5, 16 }
 0x29e   : > { %v4189_v63 = vsel %vm4117_vm10, %v4153_v55, %v3531_v28  ;;  %5005 = vmatmul.msk.f32.gmra.mxu3 %vm294_vm0, %v2331_v3  ;;  %v3557_v50 = vadd.s32 %v3556_v23, %v3547_v25  ;;  %5042 = vmatmul.msk.f32.gmra.mxu0 %vm294_vm0, %v2638_v61  ;;  %v3576_v26 = vshrl.u32 %v6876_v5, 16  ;;  %v3595_v51 = vand.u32 65535, %v6866_v60 }
 0x29f   : > { %2928 = vst.msk [vmem:[%s6086_s10 + $0x90] sm:$0xff] %vm294_vm0, %v2892_v17  ;;  %vm4225_vm11 = vcmp.lt.s32.totalorder %v4189_v63, 16  ;;  %vm3577_vm12 = vc.u32 %v3569_v56, %v3573_v32  ;;  %v3579_v11 = vadd.s32 %v3573_v32, %v3569_v56  ;;  %v3596_v2 = vshrl.u32 %v6866_v60, 16 }
 0x2a0   : > { %v4333_v10 = vsel %vm4225_vm11, %v2892_v17, 0.0  ;;  %v2209_v38 = vpop.f32.mrf.mxu2  ;;  %v3558_v0 = vshrl.u32 %v3557_v50, 4  ;;  %v3578_v42 = vsel %vm3577_vm12, 1, %v7227_v34  ;;  %v3598_v47 = vmul.u32 14564, %v3595_v51 }
 0x2a1   : > { %v4386_v20 = vsel %vm294_vm0, %v4333_v10, 0.0  ;;  %v4447_v22 = vmul.f32 %v4333_v10, %v4333_v10  ;;  %v2279_v31 = vadd.f32 %v2209_v38, %v1972_v16  ;;  %v2516_v8 = vpop.f32.mrf.mxu3  ;;  %v3580_v9 = vadd.s32 %v3578_v42, %v3572_v27 }
 0x2a2   : > { %v4387_v54 = vadd.f32 %v4386_v20, %v4385_v39  ;;  %v1905_v40 = vpop.f32.mrf.mxu1  ;;  %v3559_v4 = vmul.u32 18, %v3558_v0  ;;  %vm3581_vm13 = vc.u32 %v3579_v11, %v3575_v13  ;;  %v3599_v44 = vmul.u32 58254, %v3595_v51 }
 0x2a3   : > { %v4500_v25 = vsel %vm294_vm0, %v4447_v22, 0.0  ;;  %v1973_v24 = vadd.f32 %v1905_v40, %v5777_v57  ;;  %v2586_v48 = vadd.f32 %v2516_v8, %v2279_v31  ;;  %v2826_v43 = vpop.f32.mrf.mxu0  ;;  %v3582_v21 = vsel %vm3581_vm13, 1, %v7227_v34 }
 0x2a4   : > { %v4501_v12 = vadd.f32 %v4500_v25, %v4499_v62  ;;  %v3560_v18 = vsub.s32 %v6800_v35, %v3559_v4  ;;  %v3584_v58 = vadd.s32 %v3582_v21, %v3580_v9  ;;  %v6895_v36 = vmul.u32 14564, %v3596_v2 }
 0x2a5   : > { %v2893_v37 = vadd.f32 %v2823_v46, %v2586_v48  ;;  %v3601_v53 = vmul.u32 58254, %v3596_v2  ;;  %v6898_v39 = vadd.s32 176, %v5869_v49  ;;  %v3602_v29 = vshll.u32 %v3599_v44, 16 }
 0x2a6   : > { %vm4046_vm14 = vcmp.ne.s32.totalorder %v3560_v18, 0  ;;  %vm4082_vm15 = vcmp.lt.s32.totalorder %v3560_v18, 0  ;;  %v4154_v57 = vadd.s32 18, %v3560_v18  ;;  %v3585_v30 = vadd.s32 %v3584_v58, %v3574_v14 }
 0x2a7   : > { %2929 = vst.msk [vmem:[%s6086_s10 + $0x98] sm:$0xff] %vm294_vm0, %v2893_v37  ;;  %vm4118_vm1 = vmand %vm4082_vm15, %vm4046_vm14  ;;  %v3603_v1 = vshrl.u32 %v3599_v44, 16  ;;  %v3604_v35 = vshll.u32 %v6895_v36, 16  ;;  %v3605_v56 = vshrl.u32 %v6895_v36, 16  ;;  %v3624_v45 = vand.u32 65535, %v6898_v39 }
 0x2a8   : > { %v4190_v7 = vsel %vm4118_vm1, %v4154_v57, %v3560_v18  ;;  %v2212_v15 = vpop.f32.mrf.mxu2  ;;  %v3586_v28 = vadd.s32 %v3585_v30, %v3576_v26  ;;  %v3625_v52 = vshrl.u32 %v6898_v39, 16  ;;  %vm3606_vm3 = vc.u32 %v3598_v47, %v3602_v29 }
 0x2a9   : > { %vm4226_vm2 = vcmp.lt.s32.totalorder %v4190_v7, 16  ;;  %v2280_v33 = vadd.f32 %v2212_v15, %v1973_v24  ;;  %v2519_v62 = vpop.f32.mrf.mxu3  ;;  %v3608_v16 = vadd.s32 %v3602_v29, %v3598_v47  ;;  %v3607_v61 = vsel %vm3606_vm3, 1, %v7227_v34 }
 0x2aa   : > { %v4334_v6 = vsel %vm4226_vm2, %v2893_v37, 0.0  ;;  %v1908_v3 = vpop.f32.mrf.mxu1  ;;  %v3587_v46 = vshrl.u32 %v3586_v28, 4  ;;  %v3627_v5 = vmul.u32 14564, %v3624_v45  ;;  %v3609_v50 = vadd.s32 %v3607_v61, %v3601_v53 }
 0x2ab   : > { %v4388_v55 = vsel %vm294_vm0, %v4334_v6, 0.0  ;;  %v4448_v23 = vmul.f32 %v4334_v6, %v4334_v6  ;;  %v1974_v17 = vadd.f32 %v1908_v3, %v5787_v19  ;;  %v2587_v27 = vadd.f32 %v2519_v62, %v2280_v33  ;;  %v2829_v32 = vpop.f32.mrf.mxu0 }
 0x2ac   : > { %v4389_v14 = vadd.f32 %v4388_v55, %v4387_v54  ;;  %v3588_v63 = vmul.u32 18, %v3587_v46  ;;  %vm3610_vm4 = vc.u32 %v3608_v16, %v3604_v35  ;;  %v3628_v51 = vmul.u32 58254, %v3624_v45 }
 0x2ad   : > { %v4502_v13 = vsel %vm294_vm0, %v4448_v23, 0.0  ;;  %v2894_v26 = vadd.f32 %v2826_v43, %v2587_v27  ;;  %v3611_v11 = vsel %vm3610_vm4, 1, %v7227_v34  ;;  %v3629_v42 = vmul.u32 14564, %v3625_v52 }
 0x2ae   : > { %v4503_v10 = vadd.f32 %v4502_v13, %v4501_v12  ;;  %v3589_v38 = vsub.s32 %v6803_v59, %v3588_v63  ;;  %v3613_v0 = vadd.s32 %v3611_v11, %v3609_v50  ;;  %v3630_v19 = vmul.u32 58254, %v3625_v52 }
 0x2af   : > { %2930 = vst.msk [vmem:[%s6086_s10 + $0xa0] sm:$0xff] %vm294_vm0, %v2894_v26  ;;  %v3631_v2 = vshll.u32 %v3628_v51, 16  ;;  %v3632_v20 = vshrl.u32 %v3628_v51, 16  ;;  %v6915_v22 = vadd.s32 184, %v5869_v49  ;;  %v3633_v4 = vshll.u32 %v3629_v42, 16 }
 0x2b0   : > { %vm4047_vm5 = vcmp.ne.s32.totalorder %v3589_v38, 0  ;;  %vm4083_vm6 = vcmp.lt.s32.totalorder %v3589_v38, 0  ;;  %v4155_v31 = vadd.s32 18, %v3589_v38  ;;  %v2215_v8 = vpop.f32.mrf.mxu2  ;;  %v3614_v9 = vadd.s32 %v3613_v0, %v3603_v1 }
 0x2b1   : > { %vm4119_vm7 = vmand %vm4083_vm6, %vm4047_vm5  ;;  %v2281_v54 = vadd.f32 %v2215_v8, %v1974_v17  ;;  %v2522_v40 = vpop.f32.mrf.mxu3  ;;  %v3634_v59 = vshrl.u32 %v3629_v42, 16  ;;  %vm3635_vm8 = vc.u32 %v3627_v5, %v3631_v2  ;;  %v3637_v43 = vadd.s32 %v3631_v2, %v3627_v5 }
 0x2b2   : > { %v4191_v47 = vsel %vm4119_vm7, %v4155_v31, %v3589_v38  ;;  %v1911_v25 = vpop.f32.mrf.mxu1  ;;  %v3615_v24 = vadd.s32 %v3614_v9, %v3605_v56  ;;  %v3636_v48 = vsel %vm3635_vm8, 1, %v7227_v34  ;;  %v3653_v36 = vand.u32 65535, %v6915_v22 }
 0x2b3   : > { %vm4227_vm9 = vcmp.lt.s32.totalorder %v4191_v47, 16  ;;  %v1975_v21 = vadd.f32 %v1911_v25, %v5797_v41  ;;  %v2588_v12 = vadd.f32 %v2522_v40, %v2281_v54  ;;  %v2832_v18 = vpop.f32.mrf.mxu0  ;;  %v3638_v58 = vadd.s32 %v3636_v48, %v3630_v19 }
 0x2b4   : > { %v4335_v44 = vsel %vm4227_vm9, %v2894_v26, 0.0  ;;  %v3616_v37 = vshrl.u32 %v3615_v24, 4  ;;  %vm3639_vm10 = vc.u32 %v3637_v43, %v3633_v4  ;;  %v3654_v41 = vshrl.u32 %v6915_v22, 16 }
 0x2b5   : > { %v4390_v53 = vsel %vm294_vm0, %v4335_v44, 0.0  ;;  %v4449_v57 = vmul.f32 %v4335_v44, %v4335_v44  ;;  %v2895_v30 = vadd.f32 %v2829_v32, %v2588_v12  ;;  %v3640_v29 = vsel %vm3639_vm10, 1, %v7227_v34  ;;  %v7296_v32 = vld [vmem:[#allocation8_spill] sm:$0xff]  ;;  %v7297_v44 = vld [vmem:[#allocation9_spill] sm:$0xff] }
 0x2b6   : > { %v4391_v1 = vadd.f32 %v4390_v53, %v4389_v14  ;;  %v3617_v35 = vmul.u32 18, %v3616_v37  ;;  %v3642_v56 = vadd.s32 %v3640_v29, %v3638_v58  ;;  %v3656_v15 = vmul.u32 14564, %v3653_v36 }
 0x2b7   : > { %v4504_v7 = vsel %vm294_vm0, %v4449_v57, 0.0  ;;  %2931 = vst.msk [vmem:[%s6086_s10 + $0xa8] sm:$0xff] %vm294_vm0, %v2895_v30  ;;  %v3657_v28 = vmul.u32 58254, %v3653_v36  ;;  %v6927_v45 = vadd.s32 192, %v5869_v49  ;;  %v3658_v6 = vmul.u32 14564, %v3654_v41 }
 0x2b8   : > { %v4505_v52 = vadd.f32 %v4504_v7, %v4503_v10  ;;  %v3618_v33 = vsub.s32 %v6866_v60, %v3617_v35  ;;  %v2218_v62 = vpop.f32.mrf.mxu2  ;;  %v3643_v16 = vadd.s32 %v3642_v56, %v3632_v20  ;;  %v3659_v61 = vmul.u32 58254, %v3654_v41 }
 0x2b9   : > { %v2282_v3 = vadd.f32 %v2218_v62, %v1975_v21  ;;  %v2525_v46 = vpop.f32.mrf.mxu3  ;;  %v3660_v5 = vshll.u32 %v3657_v28, 16  ;;  %v3661_v55 = vshrl.u32 %v3657_v28, 16  ;;  %v3662_v13 = vshll.u32 %v3658_v6, 16 }
 0x2ba   : > { %vm4048_vm11 = vcmp.ne.s32.totalorder %v3618_v33, 0  ;;  %vm4084_vm12 = vcmp.lt.s32.totalorder %v3618_v33, 0  ;;  %v4156_v23 = vadd.s32 18, %v3618_v33  ;;  %v1914_v17 = vpop.f32.mrf.mxu1  ;;  %v3644_v27 = vadd.s32 %v3643_v16, %v3634_v59 }
 0x2bb   : > { %vm4120_vm13 = vmand %vm4084_vm12, %vm4048_vm11  ;;  %v1976_v14 = vadd.f32 %v1914_v17, %v7296_v32  ;;  %v2589_v63 = vadd.f32 %v2525_v46, %v2282_v3  ;;  %v2835_v50 = vpop.f32.mrf.mxu0  ;;  %v3663_v60 = vshrl.u32 %v3658_v6, 16  ;;  %vm3664_vm14 = vc.u32 %v3656_v15, %v3660_v5 }
 0x2bc   : > { %v4192_v26 = vsel %vm4120_vm13, %v4156_v23, %v3618_v33  ;;  %v3645_v11 = vshrl.u32 %v3644_v27, 4  ;;  %v3666_v51 = vadd.s32 %v3660_v5, %v3656_v15  ;;  %v3665_v38 = vsel %vm3664_vm14, 1, %v7227_v34 }
 0x2bd   : > { %vm4228_vm15 = vcmp.lt.s32.totalorder %v4192_v26, 16  ;;  %v2896_v10 = vadd.f32 %v2832_v18, %v2589_v63  ;;  %v3682_v0 = vand.u32 65535, %v6927_v45  ;;  %v3667_v2 = vadd.s32 %v3665_v38, %v3659_v61 }
 0x2be   : > { %v4336_v42 = vsel %vm4228_vm15, %v2895_v30, 0.0  ;;  %v3646_v19 = vmul.u32 18, %v3645_v11  ;;  %vm3668_vm1 = vc.u32 %v3666_v51, %v3662_v13  ;;  %v3683_v9 = vshrl.u32 %v6927_v45, 16  ;;  %v7298_v11 = vld [vmem:[#allocation10_spill] sm:$0xff] }
 0x2bf   : > { %v4392_v20 = vsel %vm294_vm0, %v4336_v42, 0.0  ;;  %v4450_v31 = vmul.f32 %v4336_v42, %v4336_v42  ;;  %2932 = vst.msk [vmem:[%s6086_s10 + $0xb0] sm:$0xff] %vm294_vm0, %v2896_v10  ;;  %v3669_v8 = vsel %vm3668_vm1, 1, %v7227_v34  ;;  %v3685_v47 = vmul.u32 14564, %v3682_v0 }
 0x2c0   : > { %v4393_v54 = vadd.f32 %v4392_v20, %v4391_v1  ;;  %v3647_v40 = vsub.s32 %v6898_v39, %v3646_v19  ;;  %v2221_v4 = vpop.f32.mrf.mxu2  ;;  %v3671_v59 = vadd.s32 %v3669_v8, %v3667_v2  ;;  %v3686_v43 = vmul.u32 58254, %v3682_v0 }
 0x2c1   : > { %v4506_v25 = vsel %vm294_vm0, %v4450_v31, 0.0  ;;  %v2283_v24 = vadd.f32 %v2221_v4, %v1976_v14  ;;  %v2528_v48 = vpop.f32.mrf.mxu3  ;;  %v3687_v21 = vmul.u32 14564, %v3683_v9  ;;  %v3688_v57 = vmul.u32 58254, %v3683_v9 }
 0x2c2   : > { %v4507_v12 = vadd.f32 %v4506_v25, %v4505_v52  ;;  %vm4049_vm2 = vcmp.ne.s32.totalorder %v3647_v40, 0  ;;  %vm4085_vm3 = vcmp.lt.s32.totalorder %v3647_v40, 0  ;;  %v4157_v18 = vadd.s32 18, %v3647_v40  ;;  %v1917_v58 = vpop.f32.mrf.mxu1 }
 0x2c3   : > { %vm4121_vm4 = vmand %vm4085_vm3, %vm4049_vm2  ;;  %v1977_v37 = vadd.f32 %v1917_v58, %v7297_v44  ;;  %v2590_v36 = vadd.f32 %v2528_v48, %v2283_v24  ;;  %v3672_v53 = vadd.s32 %v3671_v59, %v3661_v55  ;;  %v2838_v39 = vpop.f32.mrf.mxu0  ;;  %v3689_v29 = vshll.u32 %v3686_v43, 16 }
 0x2c4   : > { %v4193_v30 = vsel %vm4121_vm4, %v4157_v18, %v3647_v40  ;;  %v3690_v1 = vshrl.u32 %v3686_v43, 16  ;;  %v3691_v35 = vshll.u32 %v3687_v21, 16  ;;  %v3692_v7 = vshrl.u32 %v3687_v21, 16 }
 0x2c5   : > { %vm4229_vm5 = vcmp.lt.s32.totalorder %v4193_v30, 16  ;;  %v2897_v56 = vadd.f32 %v2835_v50, %v2590_v36  ;;  %v3673_v41 = vadd.s32 %v3672_v53, %v3663_v60  ;;  %vm3693_vm6 = vc.u32 %v3685_v47, %v3689_v29 }
 0x2c6   : > { %v4337_v15 = vsel %vm4229_vm5, %v2896_v10, 0.0  ;;  %v3695_v28 = vadd.s32 %v3689_v29, %v3685_v47  ;;  %v6942_v52 = vadd.s32 200, %v5869_v49  ;;  %v3694_v6 = vsel %vm3693_vm6, 1, %v7227_v34  ;;  %v7299_v29 = vld [vmem:[#allocation11_spill] sm:$0xff] }
 0x2c7   : > { %v4394_v33 = vsel %vm294_vm0, %v4337_v15, 0.0  ;;  %v4451_v62 = vmul.f32 %v4337_v15, %v4337_v15  ;;  %2933 = vst.msk [vmem:[%s6086_s10 + $0xb8] sm:$0xff] %vm294_vm0, %v2897_v56  ;;  %v3674_v16 = vshrl.u32 %v3673_v41, 4  ;;  %v3696_v61 = vadd.s32 %v3694_v6, %v3688_v57 }
 0x2c8   : > { %v4395_v3 = vadd.f32 %v4394_v33, %v4393_v54  ;;  %v2224_v46 = vpop.f32.mrf.mxu2  ;;  %vm3697_vm7 = vc.u32 %v3695_v28, %v3691_v35  ;;  %v3711_v5 = vand.u32 65535, %v6942_v52  ;;  %v3712_v13 = vshrl.u32 %v6942_v52, 16 }
 0x2c9   : > { %v4508_v55 = vsel %vm294_vm0, %v4451_v62, 0.0  ;;  %v3675_v23 = vmul.u32 18, %v3674_v16  ;;  %v2284_v17 = vadd.f32 %v2224_v46, %v1977_v37  ;;  %v2531_v27 = vpop.f32.mrf.mxu3  ;;  %v3698_v32 = vsel %vm3697_vm7, 1, %v7227_v34 }
 0x2ca   : > { %v4509_v14 = vadd.f32 %v4508_v55, %v4507_v12  ;;  %v1920_v63 = vpop.f32.mrf.mxu1  ;;  %v3700_v50 = vadd.s32 %v3698_v32, %v3696_v61  ;;  %v3714_v60 = vmul.u32 14564, %v3711_v5  ;;  %v3715_v0 = vmul.u32 58254, %v3711_v5 }
 0x2cb   : > { %v3676_v26 = vsub.s32 %v6915_v22, %v3675_v23  ;;  %v1978_v51 = vadd.f32 %v1920_v63, %v7298_v11  ;;  %v2591_v10 = vadd.f32 %v2531_v27, %v2284_v17  ;;  %v2841_v38 = vpop.f32.mrf.mxu0  ;;  %v3716_v19 = vmul.u32 14564, %v3712_v13 }
 0x2cc   : > { %v3701_v42 = vadd.s32 %v3700_v50, %v3690_v1  ;;  %v3717_v2 = vmul.u32 58254, %v3712_v13  ;;  %v6955_v20 = vadd.s32 208, %v5869_v49  ;;  %v3718_v54 = vshll.u32 %v3715_v0, 16 }
 0x2cd   : > { %vm4050_vm8 = vcmp.ne.s32.totalorder %v3676_v26, 0  ;;  %vm4086_vm9 = vcmp.lt.s32.totalorder %v3676_v26, 0  ;;  %v4158_v31 = vadd.s32 18, %v3676_v26  ;;  %v2898_v8 = vadd.f32 %v2838_v39, %v2591_v10 }
 0x2ce   : > { %vm4122_vm10 = vmand %vm4086_vm9, %vm4050_vm8  ;;  %v3702_v9 = vadd.s32 %v3701_v42, %v3692_v7  ;;  %v3719_v22 = vshrl.u32 %v3715_v0, 16  ;;  %v3720_v40 = vshll.u32 %v3716_v19, 16  ;;  %v3721_v59 = vshrl.u32 %v3716_v19, 16  ;;  %v7300_v19 = vld [vmem:[#allocation12_spill] sm:$0xff] }
 0x2cf   : > { %v4194_v4 = vsel %vm4122_vm10, %v4158_v31, %v3676_v26  ;;  %2934 = vst.msk [vmem:[%s6086_s10 + $0xc0] sm:$0xff] %vm294_vm0, %v2898_v8  ;;  %v3740_v47 = vand.u32 65535, %v6955_v20  ;;  %v3741_v25 = vshrl.u32 %v6955_v20, 16  ;;  %vm3722_vm12 = vc.u32 %v3714_v60, %v3718_v54 }
 0x2d0   : > { %vm4230_vm11 = vcmp.lt.s32.totalorder %v4194_v4, 16  ;;  %v3703_v24 = vshrl.u32 %v3702_v9, 4  ;;  %v2227_v48 = vpop.f32.mrf.mxu2  ;;  %v3724_v43 = vadd.s32 %v3718_v54, %v3714_v60  ;;  %v3723_v58 = vsel %vm3722_vm12, 1, %v7227_v34 }
 0x2d1   : > { %v4338_v21 = vsel %vm4230_vm11, %v2897_v56, 0.0  ;;  %v2285_v12 = vadd.f32 %v2227_v48, %v1978_v51  ;;  %v2534_v18 = vpop.f32.mrf.mxu3  ;;  %v3743_v44 = vmul.u32 14564, %v3740_v47  ;;  %v3725_v57 = vadd.s32 %v3723_v58, %v3717_v2 }
 0x2d2   : > { %v4396_v37 = vsel %vm294_vm0, %v4338_v21, 0.0  ;;  %v4452_v36 = vmul.f32 %v4338_v21, %v4338_v21  ;;  %v3704_v53 = vmul.u32 18, %v3703_v24  ;;  %v1923_v39 = vpop.f32.mrf.mxu1  ;;  %vm3726_vm13 = vc.u32 %v3724_v43, %v3720_v40 }
 0x2d3   : > { %v4397_v30 = vadd.f32 %v4396_v37, %v4395_v3  ;;  %v1979_v1 = vadd.f32 %v1923_v39, %v7299_v29  ;;  %v2592_v35 = vadd.f32 %v2534_v18, %v2285_v12  ;;  %v2844_v41 = vpop.f32.mrf.mxu0  ;;  %v3727_v15 = vsel %vm3726_vm13, 1, %v7227_v34 }
 0x2d4   : > { %v4510_v56 = vsel %vm294_vm0, %v4452_v36, 0.0  ;;  %v3705_v7 = vsub.s32 %v6927_v45, %v3704_v53  ;;  %v3744_v28 = vmul.u32 58254, %v3740_v47  ;;  %v3729_v16 = vadd.s32 %v3727_v15, %v3725_v57 }
 0x2d5   : > { %v4511_v33 = vadd.f32 %v4510_v56, %v4509_v14  ;;  %v6967_v62 = vadd.f32 %v2841_v38, %v2592_v35  ;;  %v3745_v6 = vmul.u32 14564, %v3741_v25  ;;  %v3746_v46 = vmul.u32 58254, %v3741_v25 }
 0x2d6   : > { %vm4051_vm14 = vcmp.ne.s32.totalorder %v3705_v7, 0  ;;  %vm4087_vm15 = vcmp.lt.s32.totalorder %v3705_v7, 0  ;;  %v4159_v3 = vadd.s32 18, %v3705_v7  ;;  %v3730_v61 = vadd.s32 %v3729_v16, %v3719_v22 }
 0x2d7   : > { %vm4123_vm1 = vmand %vm4087_vm15, %vm4051_vm14  ;;  %2935 = vst.msk [vmem:[%s6086_s10 + $0xc8] sm:$0xff] %vm294_vm0, %v6967_v62  ;;  %v3747_v5 = vshll.u32 %v3744_v28, 16  ;;  %v3748_v55 = vshrl.u32 %v3744_v28, 16  ;;  %v3749_v45 = vshll.u32 %v3745_v6, 16  ;;  %v3750_v27 = vshrl.u32 %v3745_v6, 16 }
 0x2d8   : > { %v4195_v23 = vsel %vm4123_vm1, %v4159_v3, %v3705_v7  ;;  %v2230_v17 = vpop.f32.mrf.mxu2  ;;  %v6973_v32 = vadd.s32 216, %v5869_v49  ;;  %v6976_v14 = vadd.s32 224, %v5869_v49  ;;  %v3731_v63 = vadd.s32 %v3730_v61, %v3721_v59  ;;  %v7301_v7 = vld [vmem:[#allocation13_spill] sm:$0xff] }
 0x2d9   : > { %vm4231_vm2 = vcmp.lt.s32.totalorder %v4195_v23, 16  ;;  %v2286_v50 = vadd.f32 %v2230_v17, %v1979_v1  ;;  %v2537_v13 = vpop.f32.mrf.mxu3  ;;  %vm3751_vm3 = vc.u32 %v3743_v44, %v3747_v5  ;;  %v3753_v51 = vadd.s32 %v3747_v5, %v3743_v44 }
 0x2da   : > { %v4339_v60 = vsel %vm4231_vm2, %v2898_v8, 0.0  ;;  %v1926_v26 = vpop.f32.mrf.mxu1  ;;  %v3752_v11 = vsel %vm3751_vm3, 1, %v7227_v34  ;;  %v3769_v10 = vand.u32 65535, %v6973_v32  ;;  %v3732_v42 = vshrl.u32 %v3731_v63, 4 }
 0x2db   : > { %v4398_v38 = vsel %vm294_vm0, %v4339_v60, 0.0  ;;  %v4453_v0 = vmul.f32 %v4339_v60, %v4339_v60  ;;  %v1980_v2 = vadd.f32 %v1926_v26, %v7300_v19  ;;  %v2847_v31 = vpop.f32.mrf.mxu0  ;;  %v2593_v54 = vadd.f32 %v2537_v13, %v2286_v50 }
 0x2dc   : > { %v4399_v9 = vadd.f32 %v4398_v38, %v4397_v30  ;;  %v3754_v22 = vadd.s32 %v3752_v11, %v3746_v46  ;;  %vm3755_vm4 = vc.u32 %v3753_v51, %v3749_v45  ;;  %v3733_v40 = vmul.u32 18, %v3732_v42 }
 0x2dd   : > { %v4512_v8 = vsel %vm294_vm0, %v4453_v0, 0.0  ;;  %v3756_v4 = vsel %vm3755_vm4, 1, %v7227_v34  ;;  %v3770_v59 = vshrl.u32 %v6973_v32, 16  ;;  %v6985_v25 = vadd.f32 %v2844_v41, %v2593_v54 }
 0x2de   : > { %v4513_v47 = vadd.f32 %v4512_v8, %v4511_v33  ;;  %v3758_v24 = vadd.s32 %v3756_v4, %v3754_v22  ;;  %v3772_v48 = vmul.u32 14564, %v3769_v10  ;;  %v3734_v43 = vsub.s32 %v6942_v52, %v3733_v40  ;;  %v7302_v22 = vld [vmem:[#allocation14_spill] sm:$0xff] }
 0x2df   : > { %v3773_v21 = vmul.u32 58254, %v3769_v10  ;;  %v6988_v12 = vmul.u32 14564, %v3770_v59  ;;  %v3775_v18 = vmul.u32 58254, %v3770_v59  ;;  %2936 = vst.msk [vmem:[%s6086_s10 + $0xd0] sm:$0xff] %vm294_vm0, %v6985_v25  ;;  %v3798_v37 = vand.u32 65535, %v6976_v14 }
 0x2e0   : > { %v3759_v58 = vadd.s32 %v3758_v24, %v3748_v55  ;;  %v2233_v44 = vpop.f32.mrf.mxu2  ;;  %v3799_v36 = vshrl.u32 %v6976_v14, 16  ;;  %v6996_v53 = vadd.s32 232, %v5869_v49  ;;  %vm4052_vm5 = vcmp.ne.s32.totalorder %v3734_v43, 0 }
 0x2e1   : > { %vm4088_vm6 = vcmp.lt.s32.totalorder %v3734_v43, 0  ;;  %v4160_v39 = vadd.s32 18, %v3734_v43  ;;  %v2287_v52 = vadd.f32 %v2233_v44, %v1980_v2  ;;  %v2540_v57 = vpop.f32.mrf.mxu3  ;;  %v3776_v1 = vshll.u32 %v3773_v21, 16 }
 0x2e2   : > { %vm4124_vm7 = vmand %vm4088_vm6, %vm4052_vm5  ;;  %v3760_v30 = vadd.s32 %v3759_v58, %v3750_v27  ;;  %v1929_v29 = vpop.f32.mrf.mxu1  ;;  %v3777_v35 = vshrl.u32 %v3773_v21, 16  ;;  %v3778_v41 = vshll.u32 %v6988_v12, 16  ;;  %v3779_v33 = vshrl.u32 %v6988_v12, 16 }
 0x2e3   : > { %v4196_v56 = vsel %vm4124_vm7, %v4160_v39, %v3734_v43  ;;  %v1981_v15 = vadd.f32 %v1929_v29, %v7301_v7  ;;  %v2594_v28 = vadd.f32 %v2540_v57, %v2287_v52  ;;  %v2850_v16 = vpop.f32.mrf.mxu0  ;;  %vm3780_vm9 = vc.u32 %v3772_v48, %v3776_v1 }
 0x2e4   : > { %vm4232_vm8 = vcmp.lt.s32.totalorder %v4196_v56, 16  ;;  %v3761_v6 = vshrl.u32 %v3760_v30, 4  ;;  %v3782_v3 = vadd.s32 %v3776_v1, %v3772_v48  ;;  %v3781_v5 = vsel %vm3780_vm9, 1, %v7227_v34 }
 0x2e5   : > { %v4340_v46 = vsel %vm4232_vm8, %v6967_v62, 0.0  ;;  %v7002_v61 = vadd.f32 %v2847_v31, %v2594_v28  ;;  %v3801_v55 = vmul.u32 14564, %v3798_v37  ;;  %v3783_v27 = vadd.s32 %v3781_v5, %v3775_v18 }
 0x2e6   : > { %v4400_v45 = vsel %vm294_vm0, %v4340_v46, 0.0  ;;  %v4454_v23 = vmul.f32 %v4340_v46, %v4340_v46  ;;  %v3762_v17 = vmul.u32 18, %v3761_v6  ;;  %vm3784_vm10 = vc.u32 %v3782_v3, %v3778_v41  ;;  %v7303_v46 = vld [vmem:[#allocation15_spill] sm:$0xff] }
 0x2e7   : > { %v4401_v63 = vadd.f32 %v4400_v45, %v4399_v9  ;;  %2937 = vst.msk [vmem:[%s6086_s10 + $0xd8] sm:$0xff] %vm294_vm0, %v7002_v61  ;;  %v3802_v50 = vmul.u32 58254, %v3798_v37  ;;  %v3803_v13 = vmul.u32 14564, %v3799_v36  ;;  %v3785_v26 = vsel %vm3784_vm10, 1, %v7227_v34 }
 0x2e8   : > { %v4514_v60 = vsel %vm294_vm0, %v4454_v23, 0.0  ;;  %v3763_v62 = vsub.s32 %v6955_v20, %v3762_v17  ;;  %v2236_v11 = vpop.f32.mrf.mxu2  ;;  %v3804_v51 = vmul.u32 58254, %v3799_v36  ;;  %v3787_v38 = vadd.s32 %v3785_v26, %v3783_v27 }
 0x2e9   : > { %v4515_v10 = vadd.f32 %v4514_v60, %v4513_v47  ;;  %v2288_v0 = vadd.f32 %v2236_v11, %v1981_v15  ;;  %v2543_v42 = vpop.f32.mrf.mxu3  ;;  %v3805_v19 = vshll.u32 %v3802_v50, 16  ;;  %v3806_v9 = vshrl.u32 %v3802_v50, 16 }
 0x2ea   : > { %vm4053_vm11 = vcmp.ne.s32.totalorder %v3763_v62, 0  ;;  %vm4089_vm12 = vcmp.lt.s32.totalorder %v3763_v62, 0  ;;  %v4161_v2 = vadd.s32 18, %v3763_v62  ;;  %v1932_v31 = vpop.f32.mrf.mxu1  ;;  %v3788_v54 = vadd.s32 %v3787_v38, %v3777_v35 }
 0x2eb   : > { %vm4125_vm13 = vmand %vm4089_vm12, %vm4053_vm11  ;;  %v1982_v8 = vadd.f32 %v1932_v31, %v7302_v22  ;;  %v2595_v40 = vadd.f32 %v2543_v42, %v2288_v0  ;;  %v3807_v20 = vshll.u32 %v3803_v13, 16  ;;  %v2853_v4 = vpop.f32.mrf.mxu0  ;;  %v3808_v24 = vshrl.u32 %v3803_v13, 16 }
 0x2ec   : > { %v4197_v59 = vsel %vm4125_vm13, %v4161_v2, %v3763_v62  ;;  %vm3809_vm14 = vc.u32 %v3801_v55, %v3805_v19  ;;  %v3811_v47 = vadd.s32 %v3805_v19, %v3801_v55  ;;  %v3789_v48 = vadd.s32 %v3788_v54, %v3779_v33 }
 0x2ed   : > { %vm4233_vm15 = vcmp.lt.s32.totalorder %v4197_v59, 16  ;;  %v7013_v43 = vadd.f32 %v2850_v16, %v2595_v40  ;;  %v3810_v21 = vsel %vm3809_vm14, 1, %v7227_v34  ;;  %v3827_v58 = vand.u32 65535, %v6996_v53 }
 0x2ee   : > { %v4341_v12 = vsel %vm4233_vm15, %v6985_v25, 0.0  ;;  %v3812_v18 = vadd.s32 %v3810_v21, %v3804_v51  ;;  %vm3813_vm1 = vc.u32 %v3811_v47, %v3807_v20  ;;  %v3790_v36 = vshrl.u32 %v3789_v48, 4  ;;  %v7304_v47 = vld [vmem:[#allocation16_spill] sm:$0xff] }
 0x2ef   : > { %v4402_v44 = vsel %vm294_vm0, %v4341_v12, 0.0  ;;  %v4455_v37 = vmul.f32 %v4341_v12, %v4341_v12  ;;  %2938 = vst.msk [vmem:[%s6086_s10 + $0xe0] sm:$0xff] %vm294_vm0, %v7013_v43  ;;  %v3814_v39 = vsel %vm3813_vm1, 1, %v7227_v34  ;;  %v3828_v29 = vshrl.u32 %v6996_v53, 16 }
 0x2f0   : > { %v4403_v52 = vadd.f32 %v4402_v44, %v4401_v63  ;;  %v3816_v57 = vadd.s32 %v3814_v39, %v3812_v18  ;;  %v2239_v30 = vpop.f32.mrf.mxu2  ;;  %v3830_v1 = vmul.u32 14564, %v3827_v58  ;;  %v3791_v35 = vmul.u32 18, %v3790_v36 }
 0x2f1   : > { %v4516_v25 = vsel %vm294_vm0, %v4455_v37, 0.0  ;;  %v2289_v41 = vadd.f32 %v2239_v30, %v1982_v8  ;;  %v2546_v56 = vpop.f32.mrf.mxu3  ;;  %v3831_v7 = vmul.u32 58254, %v3827_v58  ;;  %v3832_v16 = vmul.u32 14564, %v3828_v29 }
 0x2f2   : > { %v4517_v15 = vadd.f32 %v4516_v25, %v4515_v10  ;;  %v3817_v28 = vadd.s32 %v3816_v57, %v3806_v9  ;;  %v1935_v33 = vpop.f32.mrf.mxu1  ;;  %v3833_v6 = vmul.u32 58254, %v3828_v29  ;;  %v3792_v3 = vsub.s32 %v6973_v32, %v3791_v35 }
 0x2f3   : > { %v1983_v5 = vadd.f32 %v1935_v33, %v7303_v46  ;;  %v2596_v55 = vadd.f32 %v2546_v56, %v2289_v41  ;;  %v3834_v45 = vshll.u32 %v3831_v7, 16  ;;  %v2856_v23 = vpop.f32.mrf.mxu0  ;;  %v3835_v27 = vshrl.u32 %v3831_v7, 16 }
 0x2f4   : > { %v3818_v17 = vadd.s32 %v3817_v28, %v3808_v24  ;;  %v3836_v63 = vshll.u32 %v3832_v16, 16  ;;  %v3837_v50 = vshrl.u32 %v3832_v16, 16  ;;  %vm4054_vm2 = vcmp.ne.s32.totalorder %v3792_v3, 0 }
 0x2f5   : > { %vm4090_vm3 = vcmp.lt.s32.totalorder %v3792_v3, 0  ;;  %v4162_v13 = vadd.s32 18, %v3792_v3  ;;  %v7027_v60 = vadd.f32 %v2853_v4, %v2596_v55  ;;  %vm3838_vm5 = vc.u32 %v3830_v1, %v3834_v45 }
 0x2f6   : > { %vm4126_vm4 = vmand %vm4090_vm3, %vm4054_vm2  ;;  %v3819_v62 = vshrl.u32 %v3818_v17, 4  ;;  %v3840_v26 = vadd.s32 %v3834_v45, %v3830_v1  ;;  %v7030_v32 = vadd.s32 240, %v5869_v49  ;;  %v3839_v51 = vsel %vm3838_vm5, 1, %v7227_v34 }
 0x2f7   : > { %v4198_v11 = vsel %vm4126_vm4, %v4162_v13, %v3792_v3  ;;  %2939 = vst.msk [vmem:[%s6086_s10 + $0xe8] sm:$0xff] %vm294_vm0, %v7027_v60  ;;  %v7037_v10 = vadd.s32 248, %v5869_v49  ;;  %v7040_v38 = vadd.s32 256, %v5869_v49  ;;  %v3841_v42 = vadd.s32 %v3839_v51, %v3833_v6 }
 0x2f8   : > { %vm4234_vm6 = vcmp.lt.s32.totalorder %v4198_v11, 16  ;;  %v3820_v0 = vmul.u32 18, %v3819_v62  ;;  %vm3842_vm7 = vc.u32 %v3840_v26, %v3836_v63  ;;  %v2242_v19 = vpop.f32.mrf.mxu2  ;;  %v3856_v22 = vand.u32 65535, %v7030_v32 }
 0x2f9   : > { %v4342_v2 = vsel %vm4234_vm6, %v7002_v61, 0.0  ;;  %v3843_v31 = vsel %vm3842_vm7, 1, %v7227_v34  ;;  %v2290_v9 = vadd.f32 %v2242_v19, %v1983_v5  ;;  %v2549_v54 = vpop.f32.mrf.mxu3  ;;  %v3857_v12 = vshrl.u32 %v7030_v32, 16 }
 0x2fa   : > { %v4404_v8 = vsel %vm294_vm0, %v4342_v2, 0.0  ;;  %v4456_v40 = vmul.f32 %v4342_v2, %v4342_v2  ;;  %v3821_v20 = vsub.s32 %v6976_v14, %v3820_v0  ;;  %v3845_v4 = vadd.s32 %v3843_v31, %v3841_v42  ;;  %v1938_v59 = vpop.f32.mrf.mxu1 }
 0x2fb   : > { %v4405_v24 = vadd.f32 %v4404_v8, %v4403_v52  ;;  %v1984_v48 = vadd.f32 %v1938_v59, %v7304_v47  ;;  %v2597_v21 = vadd.f32 %v2549_v54, %v2290_v9  ;;  %v3859_v14 = vmul.u32 14564, %v3856_v22  ;;  %v2859_v36 = vpop.f32.mrf.mxu0 }
 0x2fc   : > { %v4518_v61 = vsel %vm294_vm0, %v4456_v40, 0.0  ;;  %vm4055_vm8 = vcmp.ne.s32.totalorder %v3821_v20, 0  ;;  %vm4091_vm9 = vcmp.lt.s32.totalorder %v3821_v20, 0  ;;  %v4163_v18 = vadd.s32 18, %v3821_v20 }
 0x2fd   : > { %v4519_v58 = vadd.f32 %v4518_v61, %v4517_v15  ;;  %vm4127_vm10 = vmand %vm4091_vm9, %vm4055_vm8  ;;  %v3846_v44 = vadd.s32 %v3845_v4, %v3835_v27  ;;  %v7050_v37 = vadd.f32 %v2856_v23, %v2597_v21  ;;  %v3860_v52 = vmul.u32 58254, %v3856_v22  ;;  %v7305_v27 = vld [vmem:[#allocation17_spill] sm:$0xff] }
 0x2fe   : > { %v4199_v39 = vsel %vm4127_vm10, %v4163_v18, %v3821_v20  ;;  %v3861_v57 = vmul.u32 14564, %v3857_v12  ;;  %v3862_v30 = vmul.u32 58254, %v3857_v12  ;;  %v3885_v1 = vand.u32 65535, %v7037_v10 }
 0x2ff   : > { %vm4235_vm11 = vcmp.lt.s32.totalorder %v4199_v39, 16  ;;  %v3847_v29 = vadd.s32 %v3846_v44, %v3837_v50  ;;  %2940 = vst.msk [vmem:[%s6086_s10 + $0xf0] sm:$0xff] %vm294_vm0, %v7050_v37  ;;  %v3886_v25 = vshrl.u32 %v7037_v10, 16  ;;  %v3863_v41 = vshll.u32 %v3860_v52, 16 }
 0x300   : > { %v4343_v35 = vsel %vm4235_vm11, %v7013_v43, 0.0  ;;  %v3864_v56 = vshrl.u32 %v3860_v52, 16  ;;  %v3865_v7 = vshll.u32 %v3861_v57, 16  ;;  %v2245_v15 = vpop.f32.mrf.mxu2  ;;  %v3866_v6 = vshrl.u32 %v3861_v57, 16 }
 0x301   : > { %v4406_v28 = vsel %vm294_vm0, %v4343_v35, 0.0  ;;  %v4457_v33 = vmul.f32 %v4343_v35, %v4343_v35  ;;  %v3848_v16 = vshrl.u32 %v3847_v29, 4  ;;  %v2552_v3 = vpop.f32.mrf.mxu3  ;;  %vm3867_vm12 = vc.u32 %v3859_v14, %v3863_v41 }
 0x302   : > { %v4407_v46 = vadd.f32 %v4406_v28, %v4405_v24  ;;  %v3869_v5 = vadd.s32 %v3863_v41, %v3859_v14  ;;  %v2291_v55 = vadd.f32 %v2245_v15, %v1984_v48  ;;  %v1941_v45 = vpop.f32.mrf.mxu1  ;;  %v3868_v43 = vsel %vm3867_vm12, 1, %v7227_v34  ;;  %v7306_v14 = vld [vmem:[#allocation18_spill] sm:$0xff] }
 0x303   : > { %v4520_v23 = vsel %vm294_vm0, %v4457_v33, 0.0  ;;  %v3849_v17 = vmul.u32 18, %v3848_v16  ;;  %v1985_v63 = vadd.f32 %v1941_v45, %v7305_v27  ;;  %v3870_v13 = vadd.s32 %v3868_v43, %v3862_v30  ;;  %v2862_v22 = vpop.f32.mrf.mxu0 }
 0x304   : > { %v4521_v50 = vadd.f32 %v4520_v23, %v4519_v58  ;;  %vm3871_vm13 = vc.u32 %v3869_v5, %v3865_v7  ;;  %v2598_v62 = vadd.f32 %v2552_v3, %v2291_v55  ;;  %v3888_v51 = vmul.u32 14564, %v3885_v1 }
 0x305   : > { %v3850_v26 = vsub.s32 %v6996_v53, %v3849_v17  ;;  %v3872_v11 = vsel %vm3871_vm13, 1, %v7227_v34  ;;  %v3889_v0 = vmul.u32 58254, %v3885_v1  ;;  %v3890_v2 = vmul.u32 14564, %v3886_v25 }
 0x306   : > { %v3874_v42 = vadd.s32 %v3872_v11, %v3870_v13  ;;  %v7064_v19 = vadd.f32 %v2859_v36, %v2598_v62  ;;  %v3891_v31 = vmul.u32 58254, %v3886_v25  ;;  %v3914_v18 = vand.u32 65535, %v7040_v38  ;;  %v7307_v11 = vld [vmem:[#allocation19_spill] sm:$0xff] }
 0x307   : > { %vm4056_vm14 = vcmp.ne.s32.totalorder %v3850_v26, 0  ;;  %vm4092_vm15 = vcmp.lt.s32.totalorder %v3850_v26, 0  ;;  %v4164_v9 = vadd.s32 18, %v3850_v26  ;;  %v3892_v54 = vshll.u32 %v3889_v0, 16 }
 0x308   : > { %vm4128_vm1 = vmand %vm4092_vm15, %vm4056_vm14  ;;  %v3875_v8 = vadd.s32 %v3874_v42, %v3864_v56  ;;  %2941 = vst.msk [vmem:[%s6086_s10 + $0xf8] sm:$0xff] %vm294_vm0, %v7064_v19  ;;  %v3893_v53 = vshrl.u32 %v3889_v0, 16  ;;  %v3894_v40 = vshll.u32 %v3890_v2, 16  ;;  %v3895_v20 = vshrl.u32 %v3890_v2, 16  ;;  %v2248_v4 = vpop.f32.mrf.mxu2 }
 0x309   : > { %v4200_v59 = vsel %vm4128_vm1, %v4164_v9, %v3850_v26  ;;  %vm3896_vm2 = vc.u32 %v3888_v51, %v3892_v54  ;;  %v3898_v24 = vadd.s32 %v3892_v54, %v3888_v51  ;;  %v2292_v47 = vadd.f32 %v2248_v4, %v1985_v63  ;;  %v2555_v48 = vpop.f32.mrf.mxu3 }
 0x30a   : > { %vm4236_vm3 = vcmp.lt.s32.totalorder %v4200_v59, 16  ;;  %v3876_v21 = vadd.s32 %v3875_v8, %v3866_v6  ;;  %v3897_v12 = vsel %vm3896_vm2, 1, %v7227_v34  ;;  %v1944_v61 = vpop.f32.mrf.mxu1  ;;  %v3915_v35 = vshrl.u32 %v7040_v38, 16 }
 0x30b   : > { %v4344_v58 = vsel %vm4236_vm3, %v7027_v60, 0.0  ;;  %v3899_v44 = vadd.s32 %v3897_v12, %v3891_v31  ;;  %vm3900_vm4 = vc.u32 %v3898_v24, %v3894_v40  ;;  %v1986_v36 = vadd.f32 %v1944_v61, %v7306_v14  ;;  %v2865_v63 = vpop.f32.mrf.mxu0 }
 0x30c   : > { %v4408_v39 = vsel %vm294_vm0, %v4344_v58, 0.0  ;;  %v4458_v52 = vmul.f32 %v4344_v58, %v4344_v58  ;;  %v3877_v57 = vshrl.u32 %v3876_v21, 4  ;;  %v3901_v30 = vsel %vm3900_vm4, 1, %v7227_v34 }
 0x30d   : > { %v4409_v29 = vadd.f32 %v4408_v39, %v4407_v46  ;;  %v3903_v1 = vadd.s32 %v3901_v30, %v3899_v44  ;;  %v2599_v25 = vadd.f32 %v2555_v48, %v2292_v47  ;;  %v3917_v60 = vmul.u32 14564, %v3914_v18 }
 0x30e   : > { %v4522_v41 = vsel %vm294_vm0, %v4458_v52, 0.0  ;;  %v3878_v56 = vmul.u32 18, %v3877_v57  ;;  %v3918_v7 = vmul.u32 58254, %v3914_v18  ;;  %v7079_v16 = vmul.u32 14564, %v3915_v35 }
 0x30f   : > { %v4523_v15 = vadd.f32 %v4522_v41, %v4521_v50  ;;  %v3904_v28 = vadd.s32 %v3903_v1, %v3893_v53  ;;  %v7077_v33 = vadd.f32 %v2862_v22, %v2599_v25  ;;  %v3920_v3 = vmul.u32 58254, %v3915_v35 }
 0x310   : > { %v3879_v6 = vsub.s32 %v7030_v32, %v3878_v56  ;;  %v3921_v46 = vshll.u32 %v3918_v7, 16  ;;  %v3922_v5 = vshrl.u32 %v3918_v7, 16  ;;  %v2251_v55 = vpop.f32.mrf.mxu2  ;;  %v3923_v23 = vshll.u32 %v7079_v16, 16  ;;  %v7308_v7 = vld [vmem:[#allocation20_spill] sm:$0xff] }
 0x311   : > { %v3905_v45 = vadd.s32 %v3904_v28, %v3895_v20  ;;  %2942 = vst.msk [vmem:[%s6086_s10 + $0x100] sm:$0xff] %vm294_vm0, %v7077_v33  ;;  %v3924_v17 = vshrl.u32 %v7079_v16, 16  ;;  %v2293_v43 = vadd.f32 %v2251_v55, %v1986_v36  ;;  %v2558_v27 = vpop.f32.mrf.mxu3  ;;  %v7090_v31 = vadd.s32 264, %v5869_v49 }
 0x312   : > { %vm4057_vm5 = vcmp.ne.s32.totalorder %v3879_v6, 0  ;;  %vm4093_vm6 = vcmp.lt.s32.totalorder %v3879_v6, 0  ;;  %v4165_v50 = vadd.s32 18, %v3879_v6  ;;  %vm3925_vm7 = vc.u32 %v3917_v60, %v3921_v46  ;;  %v1947_v32 = vpop.f32.mrf.mxu1 }
 0x313   : > { %vm4129_vm8 = vmand %vm4093_vm6, %vm4057_vm5  ;;  %v3906_v13 = vshrl.u32 %v3905_v45, 4  ;;  %v3926_v62 = vsel %vm3925_vm7, 1, %v7227_v34  ;;  %v3927_v26 = vadd.s32 %v3921_v46, %v3917_v60  ;;  %v1987_v51 = vadd.f32 %v1947_v32, %v7307_v11  ;;  %v2868_v1 = vpop.f32.mrf.mxu0 }
 0x314   : > { %v4201_v0 = vsel %vm4129_vm8, %v4165_v50, %v3879_v6  ;;  %v3928_v42 = vadd.s32 %v3926_v62, %v3920_v3  ;;  %v2600_v2 = vadd.f32 %v2558_v27, %v2293_v43  ;;  %v7093_v54 = vadd.s32 272, %v5869_v49 }
 0x315   : > { %vm4237_vm9 = vcmp.lt.s32.totalorder %v4201_v0, 16  ;;  %v3907_v9 = vmul.u32 18, %v3906_v13  ;;  %vm3929_vm10 = vc.u32 %v3927_v26, %v3923_v23  ;;  %v3943_v40 = vand.u32 65535, %v7090_v31 }
 0x316   : > { %v4345_v22 = vsel %vm4237_vm9, %v7050_v37, 0.0  ;;  %v3930_v8 = vsel %vm3929_vm10, 1, %v7227_v34  ;;  %v7097_v53 = vadd.f32 %v2865_v63, %v2600_v2  ;;  %v3944_v48 = vshrl.u32 %v7090_v31, 16 }
 0x317   : > { %v4410_v20 = vsel %vm294_vm0, %v4345_v22, 0.0  ;;  %v4459_v4 = vmul.f32 %v4345_v22, %v4345_v22  ;;  %v3908_v59 = vsub.s32 %v7037_v10, %v3907_v9  ;;  %v3932_v24 = vadd.s32 %v3930_v8, %v3928_v42 }
 0x318   : > { %v4411_v47 = vadd.f32 %v4410_v20, %v4409_v29  ;;  %2943 = vst.msk [vmem:[%s6086_s10 + $0x108] sm:$0xff] %vm294_vm0, %v7097_v53  ;;  %v3946_v21 = vmul.u32 14564, %v3943_v40  ;;  %v3947_v37 = vmul.u32 58254, %v3943_v40  ;;  %v2254_v12 = vpop.f32.mrf.mxu2  ;;  %v3948_v10 = vmul.u32 14564, %v3944_v48 }
 0x319   : > { %v4524_v61 = vsel %vm294_vm0, %v4459_v4, 0.0  ;;  %vm4058_vm11 = vcmp.ne.s32.totalorder %v3908_v59, 0  ;;  %vm4094_vm12 = vcmp.lt.s32.totalorder %v3908_v59, 0  ;;  %v4166_v18 = vadd.s32 18, %v3908_v59  ;;  %v2561_v58 = vpop.f32.mrf.mxu3 }
 0x31a   : > { %v4525_v44 = vadd.f32 %v4524_v61, %v4523_v15  ;;  %vm4130_vm13 = vmand %vm4094_vm12, %vm4058_vm11  ;;  %v3933_v14 = vadd.s32 %v3932_v24, %v3922_v5  ;;  %v3949_v36 = vmul.u32 58254, %v3944_v48  ;;  %v1950_v39 = vpop.f32.mrf.mxu1  ;;  %v3950_v57 = vshll.u32 %v3947_v37, 16 }
 0x31b   : > { %v4202_v52 = vsel %vm4130_vm13, %v4166_v18, %v3908_v59  ;;  %v3951_v30 = vshrl.u32 %v3947_v37, 16  ;;  %v2294_v29 = vadd.f32 %v2254_v12, %v1987_v51  ;;  %v3952_v35 = vshll.u32 %v3948_v10, 16  ;;  %v2871_v4 = vpop.f32.mrf.mxu0 }
 0x31c   : > { %vm4238_vm14 = vcmp.lt.s32.totalorder %v4202_v52, 16  ;;  %v3934_v25 = vadd.s32 %v3933_v14, %v3924_v17  ;;  %v3953_v41 = vshrl.u32 %v3948_v10, 16  ;;  %vm3954_vm15 = vc.u32 %v3946_v21, %v3950_v57 }
 0x31d   : > { %v4346_v56 = vsel %vm4238_vm14, %v7064_v19, 0.0  ;;  %v3956_v60 = vadd.s32 %v3950_v57, %v3946_v21  ;;  %v1988_v15 = vadd.f32 %v1950_v39, %v7308_v7  ;;  %v3955_v3 = vsel %vm3954_vm15, 1, %v7227_v34 }
 0x31e   : > { %v4412_v28 = vsel %vm294_vm0, %v4346_v56, 0.0  ;;  %v4460_v16 = vmul.f32 %v4346_v56, %v4346_v56  ;;  %v3935_v6 = vshrl.u32 %v3934_v25, 4  ;;  %v3957_v5 = vadd.s32 %v3955_v3, %v3949_v36 }
 0x31f   : > { %v4413_v46 = vadd.f32 %v4412_v28, %v4411_v47  ;;  %vm3958_vm1 = vc.u32 %v3956_v60, %v3952_v35  ;;  %v2601_v55 = vadd.f32 %v2561_v58, %v2294_v29  ;;  %v3972_v17 = vand.u32 65535, %v7093_v54 }
 0x320   : > { %v4526_v45 = vsel %vm294_vm0, %v4460_v16, 0.0  ;;  %v3936_v23 = vmul.u32 18, %v3935_v6  ;;  %v3959_v19 = vsel %vm3958_vm1, 1, %v7227_v34  ;;  %v2257_v43 = vpop.f32.mrf.mxu2  ;;  %v3973_v32 = vshrl.u32 %v7093_v54, 16 }
 0x321   : > { %v4527_v27 = vadd.f32 %v4526_v45, %v4525_v44  ;;  %v3961_v63 = vadd.s32 %v3959_v19, %v3957_v5  ;;  %v7114_v50 = vadd.f32 %v2868_v1, %v2601_v55  ;;  %v3975_v62 = vmul.u32 14564, %v3972_v17  ;;  %v2564_v2 = vpop.f32.mrf.mxu3 }
 0x322   : > { %v3937_v13 = vsub.s32 %v7040_v38, %v3936_v23  ;;  %v3976_v26 = vmul.u32 58254, %v3972_v17  ;;  %v2295_v11 = vadd.f32 %v2257_v43, %v1988_v15  ;;  %v3977_v0 = vmul.u32 14564, %v3973_v32 }
 0x323   : > { %v3962_v51 = vadd.s32 %v3961_v63, %v3951_v30  ;;  %2944 = vst.msk [vmem:[%s6086_s10 + $0x110] sm:$0xff] %vm294_vm0, %v7114_v50  ;;  %v3978_v42 = vmul.u32 58254, %v3973_v32  ;;  %v7122_v9 = vadd.s32 280, %v5869_v49 }
 0x324   : > { %vm4059_vm2 = vcmp.ne.s32.totalorder %v3937_v13, 0  ;;  %vm4095_vm3 = vcmp.lt.s32.totalorder %v3937_v13, 0  ;;  %v4167_v22 = vadd.s32 18, %v3937_v13  ;;  %v3979_v8 = vshll.u32 %v3976_v26, 16 }
 0x325   : > { %vm4131_vm4 = vmand %vm4095_vm3, %vm4059_vm2  ;;  %v3963_v40 = vadd.s32 %v3962_v51, %v3953_v41  ;;  %v3980_v38 = vshrl.u32 %v3976_v26, 16  ;;  %v3981_v20 = vshll.u32 %v3977_v0, 16  ;;  %v2602_v47 = vadd.f32 %v2564_v2, %v2295_v11 }
 0x326   : > { %v4203_v59 = vsel %vm4131_vm4, %v4167_v22, %v3937_v13  ;;  %vm3983_vm5 = vc.u32 %v3975_v62, %v3979_v8  ;;  %v3985_v24 = vadd.s32 %v3979_v8, %v3975_v62  ;;  %v4001_v49 = vand.u32 65535, %v7122_v9 }
 0x327   : > { %vm4239_vm6 = vcmp.lt.s32.totalorder %v4203_v59, 16  ;;  %v3964_v48 = vshrl.u32 %v3963_v40, 4  ;;  %v3984_v21 = vsel %vm3983_vm5, 1, %v7227_v34  ;;  %v7127_v61 = vadd.f32 %v2871_v4, %v2602_v47 }
 0x328   : > { %v4347_v37 = vsel %vm4239_vm6, %v7077_v33, 0.0  ;;  %v3986_v12 = vadd.s32 %v3984_v21, %v3978_v42  ;;  %vm3987_vm7 = vc.u32 %v3985_v24, %v3981_v20  ;;  %v3982_v36 = vshrl.u32 %v3977_v0, 16 }
 0x329   : > { %v4414_v18 = vsel %vm294_vm0, %v4347_v37, 0.0  ;;  %v4461_v58 = vmul.f32 %v4347_v37, %v4347_v37  ;;  %v3965_v44 = vmul.u32 18, %v3964_v48  ;;  %v3988_v14 = vsel %vm3987_vm7, 1, %v7227_v34  ;;  %2945 = vst.msk [vmem:[%s6086_s10 + $0x118] sm:$0xff] %vm294_vm0, %v7127_v61  ;;  %s5115_s10 = scalar_lea.hbm %s5114_s9, 8 }
 0x32a   : > { %v4415_v10 = vadd.f32 %v4414_v18, %v4413_v46  ;;  %v3990_v39 = vadd.s32 %v3988_v14, %v3986_v12  ;;  %v4002_v52 = vshrl.u32 %v7122_v9, 16  ;;  %v4004_v30 = vmul.u32 14564, %v4001_v49  ;;  %p5116_p11 = scmp.ne.s32.totalorder %s5114_s9, %s5115_s10  ;;  %p5121_p1 = scmp.lt.s32.totalorder %s5119_s14, %s5115_s10 }
 0x32b   : > { %v4528_v33 = vsel %vm294_vm0, %v4461_v58, 0.0  ;;  %v3966_v57 = vsub.s32 %v7090_v31, %v3965_v44  ;;  %v4005_v29 = vmul.u32 58254, %v4001_v49 }
 0x32c   : > { %v4529_v1 = vadd.f32 %v4528_v33, %v4527_v27  ;;  %v3991_v25 = vadd.s32 %v3990_v39, %v3980_v38  ;;  %v4006_v35 = vmul.u32 14564, %v4002_v52  ;;  %v4007_v41 = vmul.u32 58254, %v4002_v52  ;;  %p5117_p12 = pnand %p5116_p11, %p5259_p5  ;;  %p5122_p2 = por %p5121_p1, %p5120_p0 }
 0x32d   : > { %vm4060_vm8 = vcmp.ne.s32.totalorder %v3966_v57, 0  ;;  %vm4096_vm9 = vcmp.lt.s32.totalorder %v3966_v57, 0  ;;  %v4168_v56 = vadd.s32 18, %v3966_v57  ;;  %v4008_v60 = vshll.u32 %v4005_v29, 16 }
 0x32e   : > { %vm4132_vm10 = vmand %vm4096_vm9, %vm4060_vm8  ;;  %v3992_v7 = vadd.s32 %v3991_v25, %v3982_v36  ;;  %v4010_v15 = vshll.u32 %v4006_v35, 16  ;;  %v4009_v46 = vshrl.u32 %v4005_v29, 16  ;;  %v4011_v43 = vshrl.u32 %v4006_v35, 16  ;;  %p5118_p13 = pneg %p5117_p12 }
 0x32f   : > { %v4204_v28 = vsel %vm4132_vm10, %v4168_v56, %v3966_v57  ;;  %vm4012_vm11 = vc.u32 %v4004_v30, %v4008_v60  ;;  %v4014_v16 = vadd.s32 %v4008_v60, %v4004_v30 }
 0x330   : > { %vm4240_vm12 = vcmp.lt.s32.totalorder %v4204_v28, 16  ;;  %v3993_v6 = vshrl.u32 %v3992_v7, 4  ;;  %v4013_v31 = vsel %vm4012_vm11, 1, %v7227_v34  ;;  %p5123_p3 = pnand %p5122_p2, %p5118_p13 }
 0x331   : > { %v4348_v3 = vsel %vm4240_vm12, %v7097_v53, 0.0  ;;  %v4015_v5 = vadd.s32 %v4013_v31, %v4007_v41  ;;  %vm4016_vm13 = vc.u32 %v4014_v16, %v4010_v15 }
 0x332   : > { %v4416_v55 = vsel %vm294_vm0, %v4348_v3, 0.0  ;;  %v4462_v45 = vmul.f32 %v4348_v3, %v4348_v3  ;;  %v3994_v23 = vmul.u32 18, %v3993_v6  ;;  %v4017_v19 = vsel %vm4016_vm13, 1, %v7227_v34 }
 0x333   : > { %v4417_v17 = vadd.f32 %v4416_v55, %v4415_v10  ;;  %v4019_v27 = vadd.s32 %v4017_v19, %v4015_v5 }
 0x334   : > { %v4530_v63 = vsel %vm294_vm0, %v4462_v45, 0.0  ;;  %v3995_v32 = vsub.s32 %v7093_v54, %v3994_v23 }
 0x335   : > { %v4531_v13 = vadd.f32 %v4530_v63, %v4529_v1  ;;  %v4020_v62 = vadd.s32 %v4019_v27, %v4009_v46 }
 0x336   : > { %vm4061_vm14 = vcmp.ne.s32.totalorder %v3995_v32, 0  ;;  %vm4097_vm15 = vcmp.lt.s32.totalorder %v3995_v32, 0  ;;  %v4169_v53 = vadd.s32 18, %v3995_v32 }
 0x337   : > { %vm4133_vm1 = vmand %vm4097_vm15, %vm4061_vm14  ;;  %v4021_v26 = vadd.s32 %v4020_v62, %v4011_v43 }
 0x338   : > { %v4205_v11 = vsel %vm4133_vm1, %v4169_v53, %v3995_v32 }
 0x339   : > { %vm4241_vm2 = vcmp.lt.s32.totalorder %v4205_v11, 16  ;;  %v4022_v51 = vshrl.u32 %v4021_v26, 4 }
 0x33a   : > { %v4349_v0 = vsel %vm4241_vm2, %v7114_v50, 0.0 }
 0x33b   : > { %v4418_v34 = vsel %vm294_vm0, %v4349_v0, 0.0  ;;  %v4463_v42 = vmul.f32 %v4349_v0, %v4349_v0  ;;  %v4023_v2 = vmul.u32 18, %v4022_v51 }
 0x33c   : > { %v4419_v22 = vadd.f32 %v4418_v34, %v4417_v17 }
 0x33d   : > { %v4532_v54 = vsel %vm294_vm0, %v4463_v42, 0.0  ;;  %v4024_v8 = vsub.s32 %v7122_v9, %v4023_v2 }
 0x33e   : > { %v4533_v40 = vadd.f32 %v4532_v54, %v4531_v13 }
 0x33f   : > { %vm4062_vm3 = vcmp.ne.s32.totalorder %v4024_v8, 0  ;;  %vm4098_vm4 = vcmp.lt.s32.totalorder %v4024_v8, 0  ;;  %v4170_v38 = vadd.s32 18, %v4024_v8 }
 0x340   : > { %vm4134_vm5 = vmand %vm4098_vm4, %vm4062_vm3 }
 0x341   : > { %v4206_v20 = vsel %vm4134_vm5, %v4170_v38, %v4024_v8 }
 0x342   : > { %vm4242_vm6 = vcmp.lt.s32.totalorder %v4206_v20, 16 }
 0x343   : > { %v4350_v50 = vsel %vm4242_vm6, %v7127_v61, 0.0 }
 0x344   : > { %v4420_v4 = vsel %vm294_vm0, %v4350_v50, 0.0  ;;  %v4464_v59 = vmul.f32 %v4350_v50, %v4350_v50 }
 0x345   : > { %v4421_v24 = vadd.f32 %v4420_v4, %v4419_v22 }
 0x346   : > { %v4534_v47 = vsel %vm294_vm0, %v4464_v59, 0.0 }
 0x347   : > { %v4422_v9 = vrot.slane %v4421_v24, 4  ;;  %v4535_v48 = vadd.f32 %v4534_v47, %v4533_v40 }
 0x349   : > { %v4423_v21 = vadd.f32 %v4422_v9, %v4421_v24  ;;  %v4536_v49 = vrot.slane %v4535_v48, 4 }
 0x34b   : > { %v4424_v37 = vrot.slane %v4423_v21, 2  ;;  %v4537_v12 = vadd.f32 %v4536_v49, %v4535_v48 }
 0x34d   : > { %v4425_v61 = vadd.f32 %v4424_v37, %v4423_v21  ;;  %v4538_v18 = vrot.slane %v4537_v12, 2 }
 0x34f   : > { %v4426_v58 = vrot.slane %v4425_v61, 1  ;;  %v4539_v44 = vadd.f32 %v4538_v18, %v4537_v12 }
 0x351   : > { %v4427_v14 = vadd.f32 %v4426_v58, %v4425_v61  ;;  %v4540_v10 = vrot.slane %v4539_v44, 1 }
 0x353   : > { %4428 = vst.msk [vmem:[%s201_s29] sm:$0xff] %vm294_vm0, %v4427_v14  ;;  %v4541_v36 = vadd.f32 %v4540_v10, %v4539_v44 }
 0x354   : > { %5126 = shalt.err (!%p5123_p3)
}
 0x355   : > { %5054 = dma.vmem_to_hbm [thread:$0]  (%p5259_p5), %s4570_s30, 128, %s4572_s5, %s4549_s8   ;;  %4542 = vst.msk [vmem:[%s208_s19] sm:$0xff] %vm294_vm0, %v4541_v36 }
 0x356   : > { %s4554_s23 = scalar_lea.sflag [#allocation5], %s7150_s11  ;;  %s5141_s27 = sshra.s32 %s7164_s7, 4  ;;  %s5142_s27 = int_to_ptr.hbm [resolvable:$true] %s5141_s27 }
 0x357   : > { %s5143_s28 = scalar_lea.hbm %s5142_s27, 8  ;;  %s5147_s10 = scalar_lea.hbm %s7213_s4, 16 }
 0x358   : > { %p5144_p4 = scmp.ne.s32.totalorder %s5142_s27, %s5143_s28  ;;  %p5148_p9 = scmp.lt.s32.totalorder %s5142_s27, %s7213_s4 }
 0x359   : > { %p5149_p10 = scmp.lt.s32.totalorder %s5147_s10, %s5143_s28 }
 0x35a   : > { %p5145_p7 = pnand %p5144_p4, %p5259_p5 }
 0x35b   : > { %p5150_p11 = por %p5149_p10, %p5148_p9 }
 0x35c   : > { %p5146_p8 = pneg %p5145_p7 }
 0x35e   : > { %p5151_p12 = pnand %p5150_p11, %p5146_p8 }
 0x360   : > { %5154 = shalt.err (!%p5151_p12)
}
 0x361   : > { %5055 = dma.vmem_to_hbm [thread:$0]  (%p5259_p5), %s7162_s6, 128, %s7164_s7, %s4554_s23  }
 0x362 PF: > { %p5065_p13 = scmp.ge.s32.totalorder %s5193_s18, 2  ;;  %s4605_s11 = sand.u32 1, %s5181_s15  }
 0x363   : > { %s4606_s30 = scalar_lea.sflag [#allocation3], %s4605_s11 }
 0x364   : > { %p5059_p0 = pnand %p5065_p13, %p5263_p6 }
 0x366   : > { %p5060_p1 = pneg %p5059_p0 }
 0x368   : > { %5172 = dma.done.wait (%p5060_p1), %s4606_s30, 128  }
 0x369   : > { %5174 = vsyncadd (%p5060_p1), %s4606_s30, 4294967168  ;;  %s4616_s5 = scalar_lea.sflag [#allocation5], %s4605_s11 }
 0x36a   : > { %5176 = dma.done.wait (%p5060_p1), %s4616_s5, 128  }
 0x36b   : > { %5178 = vsyncadd (%p5060_p1), %s4616_s5, 4294967168  ;;  %p18_p5 = scmp.ge.s32.totalorder %s5246_s21, 4   ;;  %s7309_s15 = smov %s5185_s16 }
 0x36c   : > { %s7310_s16 = smov %s5189_s17  ;;  %s7311_s17 = smov %s5257_s24 }
 0x36d   : > { %s7312_s18 = smov %s5246_s21  ;;  %20 = sbr.rel (!%p18_p5) target bundleno = 5 (0x5), region = 100 }
 0x372   :  { %4622 = vsyncpa [#allocation3], 1 }
 0x373   :  { %4624 = vsyncpa [#allocation3 + $0x1], 1 }
 0x374   :  { %4625 = vsyncpa [#allocation5], 1 }
 0x375   :  { %4627 = vsyncpa [#allocation5 + $0x1], 1 }

</bundles_post_ra>
